<compile_context>
chip_gen: v7x
topology: tpu7x:2x2x1
jax: 0.10.0
libtpu: 0.0.40
codegen_flags: <defaults>
</compile_context>

<pallas_src>
import functools

import jax
import jax.numpy as jnp
import numpy as np
from jax import lax
from jax.experimental import pallas as pl
from jax.experimental.pallas import tpu as pltpu


# ----------------------------- Pallas kernel --------------------------------

def _res_seq_kernel(x_ref, w_ref, b_ref, o_ref, xe_ref, *, H, W, n_blocks):
    """Fused sequence of `n_blocks` residual blocks for one batch item.

    Each block:  y = x + conv3x3(relu(conv3x3(x)))     (both convs C->C, bias, pad=1)

    x_ref  : (1, C, H*W)          f32 activation (channels on sublanes, pixels on lanes)
    w_ref  : (n_blocks*18, C, C)  bf16 taps; tap t of conv s of block m is
                                  w_ref[m*18 + s*9 + t], t = dy*3 + dx, laid out (C_out, C_in)
    b_ref  : (n_blocks*2, C, 1)   f32 biases
    o_ref  : (1, C, H*W)
    xe_ref : (C, H*W + 2*(W+1))   bf16 VMEM scratch: zero-bordered line buffer so every
                                  3x3 tap is a static lane-shifted load ('SAME' padding
                                  comes from the zero border, not from an HBM pad).
    """
    C = x_ref.shape[1]
    HW = H * W
    P = W + 1  # halo size in the flattened row-major layout

    # Column-validity masks for the horizontal taps (built once, reused by all convs).
    # Vertical (dy) boundaries need no mask: the zero border supplies the zeros.
    col = lax.broadcasted_iota(jnp.int32, (C, HW), 1) % W
    ok_left = col >= 1          # tap reads column j-1
    ok_right = col <= W - 2     # tap reads column j+1

    # Zero the scratch once; every conv only rewrites the interior, so the halo
    # stays zero for the whole sequence.
    xe_ref[...] = jnp.zeros_like(xe_ref)

    def conv3x3(inp, w_base, bias):
        """inp: (C, H*W) f32 -> (C, H*W) f32 = conv3x3(inp) + bias."""
        xe_ref[:, P:P + HW] = inp.astype(jnp.bfloat16)
        acc = jnp.zeros((C, HW), jnp.float32)
        t = 0
        for sy in (-1, 0, 1):
            for sx in (-1, 0, 1):
                start = P + sy * W + sx
                xs = xe_ref[:, start:start + HW]          # (C, H*W) bf16, shifted tap
                if sx == -1:
                    xs = jnp.where(ok_left, xs, jnp.zeros_like(xs))
                elif sx == 1:
                    xs = jnp.where(ok_right, xs, jnp.zeros_like(xs))
                # (C_out, C_in) @ (C_in, H*W): lane-dense MXU matmul, f32 accumulate.
                acc = acc + jnp.dot(w_ref[w_base + t], xs,
                                    preferred_element_type=jnp.float32)
                t += 1
        return acc + bias                                  # bias (C,1) broadcasts on lanes

    cur = x_ref[0]                      # (C, H*W) f32; also reused as the residual
    for m in range(n_blocks):
        base = m * 18
        h = jnp.maximum(conv3x3(cur, base, b_ref[2 * m]), 0.0)
        cur = conv3x3(h, base + 9, b_ref[2 * m + 1]) + cur
    o_ref[0] = cur.astype(o_ref.dtype)


def res_seq_pallas(x, packed):
    """Apply a fused residual sequence.  x: (N, C, H, W) f32."""
    w_flat, b_flat = packed
    N, C, H, W = x.shape
    HW = H * W
    n_blocks = w_flat.shape[0] // 18
    xf = x.reshape(N, C, HW)

    kernel = functools.partial(_res_seq_kernel, H=H, W=W, n_blocks=n_blocks)
    y = pl.pallas_call(
        kernel,
        out_shape=jax.ShapeDtypeStruct((N, C, HW), x.dtype),
        grid=(N,),
        in_specs=[
            pl.BlockSpec((1, C, HW), lambda n: (n, 0, 0)),
            pl.BlockSpec(w_flat.shape, lambda n: (0, 0, 0)),
            pl.BlockSpec(b_flat.shape, lambda n: (0, 0, 0)),
        ],
        out_specs=pl.BlockSpec((1, C, HW), lambda n: (n, 0, 0)),
        scratch_shapes=[pltpu.VMEM((C, HW + 2 * (W + 1)), jnp.bfloat16)],
        compiler_params=pltpu.CompilerParams(
            dimension_semantics=("parallel",)),
    )(xf, w_flat, b_flat)
    return y.reshape(N, C, H, W)


# ----------------------------- parameter packing ----------------------------

def pack_branch(blocks):
    """Pack a list of residual blocks into MXU-ready stacked bf16 tap matrices."""
    w_list, b_list = [], []
    for (w1, b1, w2, b2) in blocks:
        for w, b in ((w1, b1), (w2, b2)):
            C = w.shape[3]
            # HWIO (dy, dx, ci, co) -> 9 x (co, ci) tap matrices, tap index = dy*3 + dx
            w_list.append(jnp.transpose(w, (0, 1, 3, 2)).reshape(9, C, C))
            b_list.append(b.reshape(C, 1))
    w_flat = jnp.concatenate(w_list, axis=0).astype(jnp.bfloat16)   # (M*18, C, C)
    b_flat = jnp.stack(b_list, axis=0).astype(jnp.float32)          # (M*2,  C, 1)
    return w_flat, b_flat


def pack_params(params):
    return [[pack_branch(branch) for branch in level] for level in params]


# --------------------------- pooling / upsampling glue -----------------------

def maxpool2(x):   # nn.MaxPool2d(kernel_size=2, stride=2), NCHW
    N, C, H, W = x.shape
    return x.reshape(N, C, H // 2, 2, W // 2, 2).max(axis=(3, 5))


def upsample2(x):  # nn.Upsample(scale_factor=2, mode='nearest'), NCHW
    N, C, H, W = x.shape
    y = jnp.broadcast_to(x[:, :, :, None, :, None], (N, C, H, 2, W, 2))
    return y.reshape(N, C, 2 * H, 2 * W)


# ------------------------------ hourglass graphs -----------------------------

def _hourglass_fwd_pallas(d, x, packed, depth):
    up1 = res_seq_pallas(x, packed[d][0])
    low1 = res_seq_pallas(maxpool2(x), packed[d][1])
    if d == depth - 1:
        low2 = res_seq_pallas(low1, packed[d][3])
    else:
        low2 = _hourglass_fwd_pallas(d + 1, low1, packed, depth)
    low3 = res_seq_pallas(low2, packed[d][2])
    return up1 + upsample2(low3)


def hourglass_pallas(x_nchw, packed, *, depth):
    return _hourglass_fwd_pallas(0, x_nchw, packed, depth)


# ------------------------------ pure-JAX reference ---------------------------

def conv3x3_ref(x, w, b, *, relu, residual=None):
    # Matches the kernel's numerics: bf16 operands, f32 accumulation.
    xb = x.astype(jnp.bfloat16).astype(jnp.float32)
    wb = w.astype(jnp.bfloat16).astype(jnp.float32)
    y = lax.conv_general_dilated(
        xb, wb, window_strides=(1, 1), padding="SAME",
        dimension_numbers=("NCHW", "HWIO", "NCHW"),
        precision=lax.Precision.HIGHEST)
    y = y + b[None, :, None, None]
    if relu:
        y = jnp.maximum(y, 0.0)
    if residual is not None:
        y = y + residual
    return y


def res_seq_ref(x, blocks):
    for (w1, b1, w2, b2) in blocks:
        h = conv3x3_ref(x, w1, b1, relu=True)
        x = conv3x3_ref(h, w2, b2, relu=False, residual=x)
    return x


def _hourglass_fwd_ref(d, x, params, depth):
    up1 = res_seq_ref(x, params[d][0])
    low1 = res_seq_ref(maxpool2(x), params[d][1])
    if d == depth - 1:
        low2 = res_seq_ref(low1, params[d][3])
    else:
        low2 = _hourglass_fwd_ref(d + 1, low1, params, depth)
    low3 = res_seq_ref(low2, params[d][2])
    return up1 + upsample2(low3)


def hourglass_ref(x_nchw, params, *, depth):
    return _hourglass_fwd_ref(0, x_nchw, params, depth)


# ----------------------------- parameter init --------------------------------

def init_params(key, depth, nFeat, nModules):
    params = []
    scale = 1.0 / np.sqrt(9.0 * nFeat)
    for i in range(depth):
        n_branches = 4 if i == depth - 1 else 3
        branches = []
        for _ in range(n_branches):
            blocks = []
            for _ in range(nModules):
                key, k1, k2, k3, k4 = jax.random.split(key, 5)
                w1 = jax.random.normal(k1, (3, 3, nFeat, nFeat), jnp.float32) * scale
                w2 = jax.random.normal(k2, (3, 3, nFeat, nFeat), jnp.float32) * scale
                b1 = jax.random.normal(k3, (nFeat,), jnp.float32) * 0.1
                b2 = jax.random.normal(k4, (nFeat,), jnp.float32) * 0.1
                blocks.append((w1, b1, w2, b2))
            branches.append(blocks)
        params.append(branches)
    return params


# ----------------------------------- main ------------------------------------

if __name__ == "__main__":
    depth, nFeat, nModules = 2, 16, 1
    N, H, W = 2, 16, 16                      # H, W divisible by 2**depth

    key = jax.random.PRNGKey(0)
    key, kx = jax.random.split(key)
    x_nchw = jax.random.normal(kx, (N, nFeat, H, W), jnp.float32)
    params = init_params(key, depth, nFeat, nModules)
    packed = pack_params(params)

    fwd = jax.jit(functools.partial(hourglass_pallas, depth=depth))
    y = jax.block_until_ready(fwd(x_nchw, packed))

    ref = jax.jit(functools.partial(hourglass_ref, depth=depth))
    y_ref = jax.block_until_ready(ref(x_nchw, params))

    np.testing.assert_allclose(np.asarray(y), np.asarray(y_ref),
                               rtol=1e-2, atol=1e-2)
    print("KERNEL_OK")
</pallas_src>

<mosaic_0001>
module attributes {stable_mosaic.version = 11 : i64} {
  func.func @_res_seq_kernel(%arg0: i32, %arg1: memref<1x16x64xf32, #tpu.memory_space<vmem>>, %arg2: memref<18x16x16xbf16, #tpu.memory_space<vmem>>, %arg3: memref<2x16x1xf32, #tpu.memory_space<vmem>>, %arg4: memref<1x16x64xf32, #tpu.memory_space<vmem>>, %arg5: memref<16x82xbf16, #tpu.memory_space<vmem>>) attributes {dimension_semantics = [#tpu.dimension_semantics<parallel>], iteration_bounds = array<i64: 2>, scalar_prefetch = 0 : i64, scratch_operands = 1 : i64, tpu.core_type = #tpu.core_type<tc>, window_params = [{transform_indices = @transform_0, window_bounds = array<i64: 1, 16, 64>}, {pipeline_mode = #tpu.pipeline_mode<synchronous>, transform_indices = @transform_1, window_bounds = array<i64: 18, 16, 16>}, {pipeline_mode = #tpu.pipeline_mode<synchronous>, transform_indices = @transform_2, window_bounds = array<i64: 2, 16, 1>}, {transform_indices = @transform_3, window_bounds = array<i64: 1, 16, 64>}]} {
    %0 = tpu.iota {dimensions = array<i32: 1>} : vector<16x64xi32>
    %c8_i32 = arith.constant 8 : i32
    %c0_i32 = arith.constant 0 : i32
    %1 = arith.cmpi eq, %c8_i32, %c0_i32 : i32
    %c1_i32 = arith.constant 1 : i32
    %2 = arith.select %1, %c1_i32, %c8_i32 : i32
    %3 = vector.broadcast %2 : i32 to vector<16x64xi32>
    %4 = arith.remsi %0, %3 : vector<16x64xi32>
    %c0_i32_0 = arith.constant 0 : i32
    %5 = vector.broadcast %c0_i32_0 : i32 to vector<16x64xi32>
    %6 = arith.cmpi ne, %4, %5 : vector<16x64xi32>
    %c0_i32_1 = arith.constant 0 : i32
    %7 = vector.broadcast %c0_i32_1 : i32 to vector<16x64xi32>
    %8 = arith.cmpi slt, %4, %7 : vector<16x64xi32>
    %c0_i32_2 = arith.constant 0 : i32
    %9 = arith.cmpi slt, %2, %c0_i32_2 : i32
    %10 = vector.broadcast %9 : i1 to vector<16x64xi1>
    %11 = vector.broadcast %10 : vector<16x64xi1> to vector<16x64xi1>
    %12 = arith.xori %8, %11 : vector<16x64xi1>
    %13 = arith.andi %12, %6 : vector<16x64xi1>
    %14 = vector.broadcast %2 : i32 to vector<16x64xi32>
    %15 = arith.addi %4, %14 : vector<16x64xi32>
    %16 = arith.select %13, %15, %4 : vector<16x64xi1>, vector<16x64xi32>
    %c1_i32_3 = arith.constant 1 : i32
    %17 = vector.broadcast %c1_i32_3 : i32 to vector<16x64xi32>
    %18 = arith.cmpi sge, %16, %17 : vector<16x64xi32>
    %c6_i32 = arith.constant 6 : i32
    %19 = vector.broadcast %c6_i32 : i32 to vector<16x64xi32>
    %20 = arith.cmpi sle, %16, %19 : vector<16x64xi32>
    %cst = arith.constant 0.000000e+00 : bf16
    %21 = vector.broadcast %cst : bf16 to vector<16x82xbf16>
    %c0 = arith.constant 0 : index
    %c0_4 = arith.constant 0 : index
    %22 = vector.load %arg5[%c0, %c0_4] : memref<16x82xbf16, #tpu.memory_space<vmem>>, vector<16x82xbf16>
    tpu.vector_store %arg5[%c0, %c0_4], %21 {strides = array<i32>} : memref<16x82xbf16, #tpu.memory_space<vmem>>, vector<16x82xbf16>,
    %c0_5 = arith.constant 0 : index
    %c0_6 = arith.constant 0 : index
    %c0_7 = arith.constant 0 : index
    %23 = vector.load %arg1[%c0_5, %c0_6, %c0_7] : memref<1x16x64xf32, #tpu.memory_space<vmem>>, vector<1x16x64xf32>
    %24 = vector.shape_cast %23 : vector<1x16x64xf32> to vector<16x64xf32>
    %c0_8 = arith.constant 0 : index
    %c0_9 = arith.constant 0 : index
    %c0_10 = arith.constant 0 : index
    %25 = vector.load %arg3[%c0_8, %c0_9, %c0_10] : memref<2x16x1xf32, #tpu.memory_space<vmem>>, vector<1x16x1xf32>
    %26 = vector.shape_cast %25 : vector<1x16x1xf32> to vector<16x1xf32>
    %27 = arith.truncf %24 : vector<16x64xf32> to vector<16x64xbf16>
    %c0_11 = arith.constant 0 : index
    %c9 = arith.constant 9 : index
    %28 = vector.load %arg5[%c0_11, %c9] : memref<16x82xbf16, #tpu.memory_space<vmem>>, vector<16x64xbf16>
    tpu.vector_store %arg5[%c0_11, %c9], %27 {strides = array<i32>} : memref<16x82xbf16, #tpu.memory_space<vmem>>, vector<16x64xbf16>,
    %cst_12 = arith.constant 0.000000e+00 : f32
    %29 = vector.broadcast %cst_12 : f32 to vector<16x64xf32>
    %c0_13 = arith.constant 0 : index
    %c0_14 = arith.constant 0 : index
    %30 = vector.load %arg5[%c0_13, %c0_14] : memref<16x82xbf16, #tpu.memory_space<vmem>>, vector<16x64xbf16>
    %cst_15 = arith.constant 0.000000e+00 : bf16
    %31 = vector.broadcast %cst_15 : bf16 to vector<16x64xbf16>
    %32 = arith.select %18, %30, %31 : vector<16x64xi1>, vector<16x64xbf16>
    %c0_16 = arith.constant 0 : index
    %c0_17 = arith.constant 0 : index
    %c0_18 = arith.constant 0 : index
    %33 = vector.load %arg2[%c0_16, %c0_17, %c0_18] : memref<18x16x16xbf16, #tpu.memory_space<vmem>>, vector<1x16x16xbf16>
    %34 = vector.shape_cast %33 : vector<1x16x16xbf16> to vector<16x16xbf16>
    %cst_19 = arith.constant dense<0.000000e+00> : vector<16x64xf32>
    %35 = tpu.matmul %34, %32, %cst_19 {dimension_numbers = #tpu.dot_dimension_numbers<[1], [0], [0], [1], [0, 0, 1, 1], [], []>} : vector<16x16xbf16>, vector<16x64xbf16>, vector<16x64xf32> -> vector<16x64xf32>
    %36 = arith.addf %29, %35 : vector<16x64xf32>
    %c0_20 = arith.constant 0 : index
    %c1 = arith.constant 1 : index
    %37 = vector.load %arg5[%c0_20, %c1] : memref<16x82xbf16, #tpu.memory_space<vmem>>, vector<16x64xbf16>
    %c1_21 = arith.constant 1 : index
    %c0_22 = arith.constant 0 : index
    %c0_23 = arith.constant 0 : index
    %38 = vector.load %arg2[%c1_21, %c0_22, %c0_23] : memref<18x16x16xbf16, #tpu.memory_space<vmem>>, vector<1x16x16xbf16>
    %39 = vector.shape_cast %38 : vector<1x16x16xbf16> to vector<16x16xbf16>
    %cst_24 = arith.constant dense<0.000000e+00> : vector<16x64xf32>
    %40 = tpu.matmul %39, %37, %cst_24 {dimension_numbers = #tpu.dot_dimension_numbers<[1], [0], [0], [1], [0, 0, 1, 1], [], []>} : vector<16x16xbf16>, vector<16x64xbf16>, vector<16x64xf32> -> vector<16x64xf32>
    %41 = arith.addf %36, %40 : vector<16x64xf32>
    %c0_25 = arith.constant 0 : index
    %c2 = arith.constant 2 : index
    %42 = vector.load %arg5[%c0_25, %c2] : memref<16x82xbf16, #tpu.memory_space<vmem>>, vector<16x64xbf16>
    %cst_26 = arith.constant 0.000000e+00 : bf16
    %43 = vector.broadcast %cst_26 : bf16 to vector<16x64xbf16>
    %44 = arith.select %20, %42, %43 : vector<16x64xi1>, vector<16x64xbf16>
    %c2_27 = arith.constant 2 : index
    %c0_28 = arith.constant 0 : index
    %c0_29 = arith.constant 0 : index
    %45 = vector.load %arg2[%c2_27, %c0_28, %c0_29] : memref<18x16x16xbf16, #tpu.memory_space<vmem>>, vector<1x16x16xbf16>
    %46 = vector.shape_cast %45 : vector<1x16x16xbf16> to vector<16x16xbf16>
    %cst_30 = arith.constant dense<0.000000e+00> : vector<16x64xf32>
    %47 = tpu.matmul %46, %44, %cst_30 {dimension_numbers = #tpu.dot_dimension_numbers<[1], [0], [0], [1], [0, 0, 1, 1], [], []>} : vector<16x16xbf16>, vector<16x64xbf16>, vector<16x64xf32> -> vector<16x64xf32>
    %48 = arith.addf %41, %47 : vector<16x64xf32>
    %c0_31 = arith.constant 0 : index
    %c8 = arith.constant 8 : index
    %49 = vector.load %arg5[%c0_31, %c8] : memref<16x82xbf16, #tpu.memory_space<vmem>>, vector<16x64xbf16>
    %cst_32 = arith.constant 0.000000e+00 : bf16
    %50 = vector.broadcast %cst_32 : bf16 to vector<16x64xbf16>
    %51 = arith.select %18, %49, %50 : vector<16x64xi1>, vector<16x64xbf16>
    %c3 = arith.constant 3 : index
    %c0_33 = arith.constant 0 : index
    %c0_34 = arith.constant 0 : index
    %52 = vector.load %arg2[%c3, %c0_33, %c0_34] : memref<18x16x16xbf16, #tpu.memory_space<vmem>>, vector<1x16x16xbf16>
    %53 = vector.shape_cast %52 : vector<1x16x16xbf16> to vector<16x16xbf16>
    %cst_35 = arith.constant dense<0.000000e+00> : vector<16x64xf32>
    %54 = tpu.matmul %53, %51, %cst_35 {dimension_numbers = #tpu.dot_dimension_numbers<[1], [0], [0], [1], [0, 0, 1, 1], [], []>} : vector<16x16xbf16>, vector<16x64xbf16>, vector<16x64xf32> -> vector<16x64xf32>
    %55 = arith.addf %48, %54 : vector<16x64xf32>
    %c0_36 = arith.constant 0 : index
    %c9_37 = arith.constant 9 : index
    %56 = vector.load %arg5[%c0_36, %c9_37] : memref<16x82xbf16, #tpu.memory_space<vmem>>, vector<16x64xbf16>
    %c4 = arith.constant 4 : index
    %c0_38 = arith.constant 0 : index
    %c0_39 = arith.constant 0 : index
    %57 = vector.load %arg2[%c4, %c0_38, %c0_39] : memref<18x16x16xbf16, #tpu.memory_space<vmem>>, vector<1x16x16xbf16>
    %58 = vector.shape_cast %57 : vector<1x16x16xbf16> to vector<16x16xbf16>
    %cst_40 = arith.constant dense<0.000000e+00> : vector<16x64xf32>
    %59 = tpu.matmul %58, %56, %cst_40 {dimension_numbers = #tpu.dot_dimension_numbers<[1], [0], [0], [1], [0, 0, 1, 1], [], []>} : vector<16x16xbf16>, vector<16x64xbf16>, vector<16x64xf32> -> vector<16x64xf32>
    %60 = arith.addf %55, %59 : vector<16x64xf32>
    %c0_41 = arith.constant 0 : index
    %c10 = arith.constant 10 : index
    %61 = vector.load %arg5[%c0_41, %c10] : memref<16x82xbf16, #tpu.memory_space<vmem>>, vector<16x64xbf16>
    %cst_42 = arith.constant 0.000000e+00 : bf16
    %62 = vector.broadcast %cst_42 : bf16 to vector<16x64xbf16>
    %63 = arith.select %20, %61, %62 : vector<16x64xi1>, vector<16x64xbf16>
    %c5 = arith.constant 5 : index
    %c0_43 = arith.constant 0 : index
    %c0_44 = arith.constant 0 : index
    %64 = vector.load %arg2[%c5, %c0_43, %c0_44] : memref<18x16x16xbf16, #tpu.memory_space<vmem>>, vector<1x16x16xbf16>
    %65 = vector.shape_cast %64 : vector<1x16x16xbf16> to vector<16x16xbf16>
    %cst_45 = arith.constant dense<0.000000e+00> : vector<16x64xf32>
    %66 = tpu.matmul %65, %63, %cst_45 {dimension_numbers = #tpu.dot_dimension_numbers<[1], [0], [0], [1], [0, 0, 1, 1], [], []>} : vector<16x16xbf16>, vector<16x64xbf16>, vector<16x64xf32> -> vector<16x64xf32>
    %67 = arith.addf %60, %66 : vector<16x64xf32>
    %c0_46 = arith.constant 0 : index
    %c16 = arith.constant 16 : index
    %68 = vector.load %arg5[%c0_46, %c16] : memref<16x82xbf16, #tpu.memory_space<vmem>>, vector<16x64xbf16>
    %cst_47 = arith.constant 0.000000e+00 : bf16
    %69 = vector.broadcast %cst_47 : bf16 to vector<16x64xbf16>
    %70 = arith.select %18, %68, %69 : vector<16x64xi1>, vector<16x64xbf16>
    %c6 = arith.constant 6 : index
    %c0_48 = arith.constant 0 : index
    %c0_49 = arith.constant 0 : index
    %71 = vector.load %arg2[%c6, %c0_48, %c0_49] : memref<18x16x16xbf16, #tpu.memory_space<vmem>>, vector<1x16x16xbf16>
    %72 = vector.shape_cast %71 : vector<1x16x16xbf16> to vector<16x16xbf16>
    %cst_50 = arith.constant dense<0.000000e+00> : vector<16x64xf32>
    %73 = tpu.matmul %72, %70, %cst_50 {dimension_numbers = #tpu.dot_dimension_numbers<[1], [0], [0], [1], [0, 0, 1, 1], [], []>} : vector<16x16xbf16>, vector<16x64xbf16>, vector<16x64xf32> -> vector<16x64xf32>
    %74 = arith.addf %67, %73 : vector<16x64xf32>
    %c0_51 = arith.constant 0 : index
    %c17 = arith.constant 17 : index
    %75 = vector.load %arg5[%c0_51, %c17] : memref<16x82xbf16, #tpu.memory_space<vmem>>, vector<16x64xbf16>
    %c7 = arith.constant 7 : index
    %c0_52 = arith.constant 0 : index
    %c0_53 = arith.constant 0 : index
    %76 = vector.load %arg2[%c7, %c0_52, %c0_53] : memref<18x16x16xbf16, #tpu.memory_space<vmem>>, vector<1x16x16xbf16>
    %77 = vector.shape_cast %76 : vector<1x16x16xbf16> to vector<16x16xbf16>
    %cst_54 = arith.constant dense<0.000000e+00> : vector<16x64xf32>
    %78 = tpu.matmul %77, %75, %cst_54 {dimension_numbers = #tpu.dot_dimension_numbers<[1], [0], [0], [1], [0, 0, 1, 1], [], []>} : vector<16x16xbf16>, vector<16x64xbf16>, vector<16x64xf32> -> vector<16x64xf32>
    %79 = arith.addf %74, %78 : vector<16x64xf32>
    %c0_55 = arith.constant 0 : index
    %c18 = arith.constant 18 : index
    %80 = vector.load %arg5[%c0_55, %c18] : memref<16x82xbf16, #tpu.memory_space<vmem>>, vector<16x64xbf16>
    %cst_56 = arith.constant 0.000000e+00 : bf16
    %81 = vector.broadcast %cst_56 : bf16 to vector<16x64xbf16>
    %82 = arith.select %20, %80, %81 : vector<16x64xi1>, vector<16x64xbf16>
    %c8_57 = arith.constant 8 : index
    %c0_58 = arith.constant 0 : index
    %c0_59 = arith.constant 0 : index
    %83 = vector.load %arg2[%c8_57, %c0_58, %c0_59] : memref<18x16x16xbf16, #tpu.memory_space<vmem>>, vector<1x16x16xbf16>
    %84 = vector.shape_cast %83 : vector<1x16x16xbf16> to vector<16x16xbf16>
    %cst_60 = arith.constant dense<0.000000e+00> : vector<16x64xf32>
    %85 = tpu.matmul %84, %82, %cst_60 {dimension_numbers = #tpu.dot_dimension_numbers<[1], [0], [0], [1], [0, 0, 1, 1], [], []>} : vector<16x16xbf16>, vector<16x64xbf16>, vector<16x64xf32> -> vector<16x64xf32>
    %86 = arith.addf %79, %85 : vector<16x64xf32>
    %87 = vector.broadcast %26 : vector<16x1xf32> to vector<16x64xf32>
    %88 = arith.addf %86, %87 : vector<16x64xf32>
    %cst_61 = arith.constant 0.000000e+00 : f32
    %89 = vector.broadcast %cst_61 : f32 to vector<16x64xf32>
    %90 = arith.maximumf %88, %89 : vector<16x64xf32>
    %c1_62 = arith.constant 1 : index
    %c0_63 = arith.constant 0 : index
    %c0_64 = arith.constant 0 : index
    %91 = vector.load %arg3[%c1_62, %c0_63, %c0_64] : memref<2x16x1xf32, #tpu.memory_space<vmem>>, vector<1x16x1xf32>
    %92 = vector.shape_cast %91 : vector<1x16x1xf32> to vector<16x1xf32>
    %93 = arith.truncf %90 : vector<16x64xf32> to vector<16x64xbf16>
    %c0_65 = arith.constant 0 : index
    %c9_66 = arith.constant 9 : index
    %94 = vector.load %arg5[%c0_65, %c9_66] : memref<16x82xbf16, #tpu.memory_space<vmem>>, vector<16x64xbf16>
    tpu.vector_store %arg5[%c0_65, %c9_66], %93 {strides = array<i32>} : memref<16x82xbf16, #tpu.memory_space<vmem>>, vector<16x64xbf16>,
    %cst_67 = arith.constant 0.000000e+00 : f32
    %95 = vector.broadcast %cst_67 : f32 to vector<16x64xf32>
    %c0_68 = arith.constant 0 : index
    %c0_69 = arith.constant 0 : index
    %96 = vector.load %arg5[%c0_68, %c0_69] : memref<16x82xbf16, #tpu.memory_space<vmem>>, vector<16x64xbf16>
    %cst_70 = arith.constant 0.000000e+00 : bf16
    %97 = vector.broadcast %cst_70 : bf16 to vector<16x64xbf16>
    %98 = arith.select %18, %96, %97 : vector<16x64xi1>, vector<16x64xbf16>
    %c9_71 = arith.constant 9 : index
    %c0_72 = arith.constant 0 : index
    %c0_73 = arith.constant 0 : index
    %99 = vector.load %arg2[%c9_71, %c0_72, %c0_73] : memref<18x16x16xbf16, #tpu.memory_space<vmem>>, vector<1x16x16xbf16>
    %100 = vector.shape_cast %99 : vector<1x16x16xbf16> to vector<16x16xbf16>
    %cst_74 = arith.constant dense<0.000000e+00> : vector<16x64xf32>
    %101 = tpu.matmul %100, %98, %cst_74 {dimension_numbers = #tpu.dot_dimension_numbers<[1], [0], [0], [1], [0, 0, 1, 1], [], []>} : vector<16x16xbf16>, vector<16x64xbf16>, vector<16x64xf32> -> vector<16x64xf32>
    %102 = arith.addf %95, %101 : vector<16x64xf32>
    %c0_75 = arith.constant 0 : index
    %c1_76 = arith.constant 1 : index
    %103 = vector.load %arg5[%c0_75, %c1_76] : memref<16x82xbf16, #tpu.memory_space<vmem>>, vector<16x64xbf16>
    %c10_77 = arith.constant 10 : index
    %c0_78 = arith.constant 0 : index
    %c0_79 = arith.constant 0 : index
    %104 = vector.load %arg2[%c10_77, %c0_78, %c0_79] : memref<18x16x16xbf16, #tpu.memory_space<vmem>>, vector<1x16x16xbf16>
    %105 = vector.shape_cast %104 : vector<1x16x16xbf16> to vector<16x16xbf16>
    %cst_80 = arith.constant dense<0.000000e+00> : vector<16x64xf32>
    %106 = tpu.matmul %105, %103, %cst_80 {dimension_numbers = #tpu.dot_dimension_numbers<[1], [0], [0], [1], [0, 0, 1, 1], [], []>} : vector<16x16xbf16>, vector<16x64xbf16>, vector<16x64xf32> -> vector<16x64xf32>
    %107 = arith.addf %102, %106 : vector<16x64xf32>
    %c0_81 = arith.constant 0 : index
    %c2_82 = arith.constant 2 : index
    %108 = vector.load %arg5[%c0_81, %c2_82] : memref<16x82xbf16, #tpu.memory_space<vmem>>, vector<16x64xbf16>
    %cst_83 = arith.constant 0.000000e+00 : bf16
    %109 = vector.broadcast %cst_83 : bf16 to vector<16x64xbf16>
    %110 = arith.select %20, %108, %109 : vector<16x64xi1>, vector<16x64xbf16>
    %c11 = arith.constant 11 : index
    %c0_84 = arith.constant 0 : index
    %c0_85 = arith.constant 0 : index
    %111 = vector.load %arg2[%c11, %c0_84, %c0_85] : memref<18x16x16xbf16, #tpu.memory_space<vmem>>, vector<1x16x16xbf16>
    %112 = vector.shape_cast %111 : vector<1x16x16xbf16> to vector<16x16xbf16>
    %cst_86 = arith.constant dense<0.000000e+00> : vector<16x64xf32>
    %113 = tpu.matmul %112, %110, %cst_86 {dimension_numbers = #tpu.dot_dimension_numbers<[1], [0], [0], [1], [0, 0, 1, 1], [], []>} : vector<16x16xbf16>, vector<16x64xbf16>, vector<16x64xf32> -> vector<16x64xf32>
    %114 = arith.addf %107, %113 : vector<16x64xf32>
    %c0_87 = arith.constant 0 : index
    %c8_88 = arith.constant 8 : index
    %115 = vector.load %arg5[%c0_87, %c8_88] : memref<16x82xbf16, #tpu.memory_space<vmem>>, vector<16x64xbf16>
    %cst_89 = arith.constant 0.000000e+00 : bf16
    %116 = vector.broadcast %cst_89 : bf16 to vector<16x64xbf16>
    %117 = arith.select %18, %115, %116 : vector<16x64xi1>, vector<16x64xbf16>
    %c12 = arith.constant 12 : index
    %c0_90 = arith.constant 0 : index
    %c0_91 = arith.constant 0 : index
    %118 = vector.load %arg2[%c12, %c0_90, %c0_91] : memref<18x16x16xbf16, #tpu.memory_space<vmem>>, vector<1x16x16xbf16>
    %119 = vector.shape_cast %118 : vector<1x16x16xbf16> to vector<16x16xbf16>
    %cst_92 = arith.constant dense<0.000000e+00> : vector<16x64xf32>
    %120 = tpu.matmul %119, %117, %cst_92 {dimension_numbers = #tpu.dot_dimension_numbers<[1], [0], [0], [1], [0, 0, 1, 1], [], []>} : vector<16x16xbf16>, vector<16x64xbf16>, vector<16x64xf32> -> vector<16x64xf32>
    %121 = arith.addf %114, %120 : vector<16x64xf32>
    %c0_93 = arith.constant 0 : index
    %c9_94 = arith.constant 9 : index
    %122 = vector.load %arg5[%c0_93, %c9_94] : memref<16x82xbf16, #tpu.memory_space<vmem>>, vector<16x64xbf16>
    %c13 = arith.constant 13 : index
    %c0_95 = arith.constant 0 : index
    %c0_96 = arith.constant 0 : index
    %123 = vector.load %arg2[%c13, %c0_95, %c0_96] : memref<18x16x16xbf16, #tpu.memory_space<vmem>>, vector<1x16x16xbf16>
    %124 = vector.shape_cast %123 : vector<1x16x16xbf16> to vector<16x16xbf16>
    %cst_97 = arith.constant dense<0.000000e+00> : vector<16x64xf32>
    %125 = tpu.matmul %124, %122, %cst_97 {dimension_numbers = #tpu.dot_dimension_numbers<[1], [0], [0], [1], [0, 0, 1, 1], [], []>} : vector<16x16xbf16>, vector<16x64xbf16>, vector<16x64xf32> -> vector<16x64xf32>
    %126 = arith.addf %121, %125 : vector<16x64xf32>
    %c0_98 = arith.constant 0 : index
    %c10_99 = arith.constant 10 : index
    %127 = vector.load %arg5[%c0_98, %c10_99] : memref<16x82xbf16, #tpu.memory_space<vmem>>, vector<16x64xbf16>
    %cst_100 = arith.constant 0.000000e+00 : bf16
    %128 = vector.broadcast %cst_100 : bf16 to vector<16x64xbf16>
    %129 = arith.select %20, %127, %128 : vector<16x64xi1>, vector<16x64xbf16>
    %c14 = arith.constant 14 : index
    %c0_101 = arith.constant 0 : index
    %c0_102 = arith.constant 0 : index
    %130 = vector.load %arg2[%c14, %c0_101, %c0_102] : memref<18x16x16xbf16, #tpu.memory_space<vmem>>, vector<1x16x16xbf16>
    %131 = vector.shape_cast %130 : vector<1x16x16xbf16> to vector<16x16xbf16>
    %cst_103 = arith.constant dense<0.000000e+00> : vector<16x64xf32>
    %132 = tpu.matmul %131, %129, %cst_103 {dimension_numbers = #tpu.dot_dimension_numbers<[1], [0], [0], [1], [0, 0, 1, 1], [], []>} : vector<16x16xbf16>, vector<16x64xbf16>, vector<16x64xf32> -> vector<16x64xf32>
    %133 = arith.addf %126, %132 : vector<16x64xf32>
    %c0_104 = arith.constant 0 : index
    %c16_105 = arith.constant 16 : index
    %134 = vector.load %arg5[%c0_104, %c16_105] : memref<16x82xbf16, #tpu.memory_space<vmem>>, vector<16x64xbf16>
    %cst_106 = arith.constant 0.000000e+00 : bf16
    %135 = vector.broadcast %cst_106 : bf16 to vector<16x64xbf16>
    %136 = arith.select %18, %134, %135 : vector<16x64xi1>, vector<16x64xbf16>
    %c15 = arith.constant 15 : index
    %c0_107 = arith.constant 0 : index
    %c0_108 = arith.constant 0 : index
    %137 = vector.load %arg2[%c15, %c0_107, %c0_108] : memref<18x16x16xbf16, #tpu.memory_space<vmem>>, vector<1x16x16xbf16>
    %138 = vector.shape_cast %137 : vector<1x16x16xbf16> to vector<16x16xbf16>
    %cst_109 = arith.constant dense<0.000000e+00> : vector<16x64xf32>
    %139 = tpu.matmul %138, %136, %cst_109 {dimension_numbers = #tpu.dot_dimension_numbers<[1], [0], [0], [1], [0, 0, 1, 1], [], []>} : vector<16x16xbf16>, vector<16x64xbf16>, vector<16x64xf32> -> vector<16x64xf32>
    %140 = arith.addf %133, %139 : vector<16x64xf32>
    %c0_110 = arith.constant 0 : index
    %c17_111 = arith.constant 17 : index
    %141 = vector.load %arg5[%c0_110, %c17_111] : memref<16x82xbf16, #tpu.memory_space<vmem>>, vector<16x64xbf16>
    %c16_112 = arith.constant 16 : index
    %c0_113 = arith.constant 0 : index
    %c0_114 = arith.constant 0 : index
    %142 = vector.load %arg2[%c16_112, %c0_113, %c0_114] : memref<18x16x16xbf16, #tpu.memory_space<vmem>>, vector<1x16x16xbf16>
    %143 = vector.shape_cast %142 : vector<1x16x16xbf16> to vector<16x16xbf16>
    %cst_115 = arith.constant dense<0.000000e+00> : vector<16x64xf32>
    %144 = tpu.matmul %143, %141, %cst_115 {dimension_numbers = #tpu.dot_dimension_numbers<[1], [0], [0], [1], [0, 0, 1, 1], [], []>} : vector<16x16xbf16>, vector<16x64xbf16>, vector<16x64xf32> -> vector<16x64xf32>
    %145 = arith.addf %140, %144 : vector<16x64xf32>
    %c0_116 = arith.constant 0 : index
    %c18_117 = arith.constant 18 : index
    %146 = vector.load %arg5[%c0_116, %c18_117] : memref<16x82xbf16, #tpu.memory_space<vmem>>, vector<16x64xbf16>
    %cst_118 = arith.constant 0.000000e+00 : bf16
    %147 = vector.broadcast %cst_118 : bf16 to vector<16x64xbf16>
    %148 = arith.select %20, %146, %147 : vector<16x64xi1>, vector<16x64xbf16>
    %c17_119 = arith.constant 17 : index
    %c0_120 = arith.constant 0 : index
    %c0_121 = arith.constant 0 : index
    %149 = vector.load %arg2[%c17_119, %c0_120, %c0_121] : memref<18x16x16xbf16, #tpu.memory_space<vmem>>, vector<1x16x16xbf16>
    %150 = vector.shape_cast %149 : vector<1x16x16xbf16> to vector<16x16xbf16>
    %cst_122 = arith.constant dense<0.000000e+00> : vector<16x64xf32>
    %151 = tpu.matmul %150, %148, %cst_122 {dimension_numbers = #tpu.dot_dimension_numbers<[1], [0], [0], [1], [0, 0, 1, 1], [], []>} : vector<16x16xbf16>, vector<16x64xbf16>, vector<16x64xf32> -> vector<16x64xf32>
    %152 = arith.addf %145, %151 : vector<16x64xf32>
    %153 = vector.broadcast %92 : vector<16x1xf32> to vector<16x64xf32>
    %154 = arith.addf %152, %153 : vector<16x64xf32>
    %155 = arith.addf %154, %24 : vector<16x64xf32>
    %c0_123 = arith.constant 0 : index
    %c0_124 = arith.constant 0 : index
    %c0_125 = arith.constant 0 : index
    %156 = vector.load %arg4[%c0_123, %c0_124, %c0_125] : memref<1x16x64xf32, #tpu.memory_space<vmem>>, vector<1x16x64xf32>
    %157 = vector.shape_cast %156 : vector<1x16x64xf32> to vector<16x64xf32>
    %158 = vector.shape_cast %155 : vector<16x64xf32> to vector<1x16x64xf32>
    tpu.vector_store %arg4[%c0_123, %c0_124, %c0_125], %158 {strides = array<i32>} : memref<1x16x64xf32, #tpu.memory_space<vmem>>, vector<1x16x64xf32>,
    return
  }
  func.func @transform_0(%arg0: i32) -> (i32, i32, i32) {
    %c0_i32 = arith.constant 0 : i32
    %c0_i32_0 = arith.constant 0 : i32
    %c0_i32_1 = arith.constant 0 : i32
    return %arg0, %c0_i32, %c0_i32_0 : i32, i32, i32
  }
  func.func @transform_1(%arg0: i32) -> (i32, i32, i32) {
    %c0_i32 = arith.constant 0 : i32
    %c0_i32_0 = arith.constant 0 : i32
    %c0_i32_1 = arith.constant 0 : i32
    %c0_i32_2 = arith.constant 0 : i32
    return %c0_i32, %c0_i32_0, %c0_i32_1 : i32, i32, i32
  }
  func.func @transform_2(%arg0: i32) -> (i32, i32, i32) {
    %c0_i32 = arith.constant 0 : i32
    %c0_i32_0 = arith.constant 0 : i32
    %c0_i32_1 = arith.constant 0 : i32
    %c0_i32_2 = arith.constant 0 : i32
    return %c0_i32, %c0_i32_0, %c0_i32_1 : i32, i32, i32
  }
  func.func @transform_3(%arg0: i32) -> (i32, i32, i32) {
    %c0_i32 = arith.constant 0 : i32
    %c0_i32_0 = arith.constant 0 : i32
    %c0_i32_1 = arith.constant 0 : i32
    return %arg0, %c0_i32, %c0_i32_0 : i32, i32, i32
  }
}

module attributes {stable_mosaic.version = 11 : i64} {
  func.func @_res_seq_kernel(%arg0: i32, %arg1: memref<1x16x16xf32, #tpu.memory_space<vmem>>, %arg2: memref<18x16x16xbf16, #tpu.memory_space<vmem>>, %arg3: memref<2x16x1xf32, #tpu.memory_space<vmem>>, %arg4: memref<1x16x16xf32, #tpu.memory_space<vmem>>, %arg5: memref<16x26xbf16, #tpu.memory_space<vmem>>) attributes {dimension_semantics = [#tpu.dimension_semantics<parallel>], iteration_bounds = array<i64: 2>, scalar_prefetch = 0 : i64, scratch_operands = 1 : i64, tpu.core_type = #tpu.core_type<tc>, window_params = [{transform_indices = @transform_0, window_bounds = array<i64: 1, 16, 16>}, {pipeline_mode = #tpu.pipeline_mode<synchronous>, transform_indices = @transform_1, window_bounds = array<i64: 18, 16, 16>}, {pipeline_mode = #tpu.pipeline_mode<synchronous>, transform_indices = @transform_2, window_bounds = array<i64: 2, 16, 1>}, {transform_indices = @transform_3, window_bounds = array<i64: 1, 16, 16>}]} {
    %0 = tpu.iota {dimensions = array<i32: 1>} : vector<16x16xi32>
    %c4_i32 = arith.constant 4 : i32
    %c0_i32 = arith.constant 0 : i32
    %1 = arith.cmpi eq, %c4_i32, %c0_i32 : i32
    %c1_i32 = arith.constant 1 : i32
    %2 = arith.select %1, %c1_i32, %c4_i32 : i32
    %3 = vector.broadcast %2 : i32 to vector<16x16xi32>
    %4 = arith.remsi %0, %3 : vector<16x16xi32>
    %c0_i32_0 = arith.constant 0 : i32
    %5 = vector.broadcast %c0_i32_0 : i32 to vector<16x16xi32>
    %6 = arith.cmpi ne, %4, %5 : vector<16x16xi32>
    %c0_i32_1 = arith.constant 0 : i32
    %7 = vector.broadcast %c0_i32_1 : i32 to vector<16x16xi32>
    %8 = arith.cmpi slt, %4, %7 : vector<16x16xi32>
    %c0_i32_2 = arith.constant 0 : i32
    %9 = arith.cmpi slt, %2, %c0_i32_2 : i32
    %10 = vector.broadcast %9 : i1 to vector<16x16xi1>
    %11 = vector.broadcast %10 : vector<16x16xi1> to vector<16x16xi1>
    %12 = arith.xori %8, %11 : vector<16x16xi1>
    %13 = arith.andi %12, %6 : vector<16x16xi1>
    %14 = vector.broadcast %2 : i32 to vector<16x16xi32>
    %15 = arith.addi %4, %14 : vector<16x16xi32>
    %16 = arith.select %13, %15, %4 : vector<16x16xi1>, vector<16x16xi32>
    %c1_i32_3 = arith.constant 1 : i32
    %17 = vector.broadcast %c1_i32_3 : i32 to vector<16x16xi32>
    %18 = arith.cmpi sge, %16, %17 : vector<16x16xi32>
    %c2_i32 = arith.constant 2 : i32
    %19 = vector.broadcast %c2_i32 : i32 to vector<16x16xi32>
    %20 = arith.cmpi sle, %16, %19 : vector<16x16xi32>
    %cst = arith.constant 0.000000e+00 : bf16
    %21 = vector.broadcast %cst : bf16 to vector<16x26xbf16>
    %c0 = arith.constant 0 : index
    %c0_4 = arith.constant 0 : index
    %22 = vector.load %arg5[%c0, %c0_4] : memref<16x26xbf16, #tpu.memory_space<vmem>>, vector<16x26xbf16>
    tpu.vector_store %arg5[%c0, %c0_4], %21 {strides = array<i32>} : memref<16x26xbf16, #tpu.memory_space<vmem>>, vector<16x26xbf16>,
    %c0_5 = arith.constant 0 : index
    %c0_6 = arith.constant 0 : index
    %c0_7 = arith.constant 0 : index
    %23 = vector.load %arg1[%c0_5, %c0_6, %c0_7] : memref<1x16x16xf32, #tpu.memory_space<vmem>>, vector<1x16x16xf32>
    %24 = vector.shape_cast %23 : vector<1x16x16xf32> to vector<16x16xf32>
    %c0_8 = arith.constant 0 : index
    %c0_9 = arith.constant 0 : index
    %c0_10 = arith.constant 0 : index
    %25 = vector.load %arg3[%c0_8, %c0_9, %c0_10] : memref<2x16x1xf32, #tpu.memory_space<vmem>>, vector<1x16x1xf32>
    %26 = vector.shape_cast %25 : vector<1x16x1xf32> to vector<16x1xf32>
    %27 = arith.truncf %24 : vector<16x16xf32> to vector<16x16xbf16>
    %c0_11 = arith.constant 0 : index
    %c5 = arith.constant 5 : index
    %28 = vector.load %arg5[%c0_11, %c5] : memref<16x26xbf16, #tpu.memory_space<vmem>>, vector<16x16xbf16>
    tpu.vector_store %arg5[%c0_11, %c5], %27 {strides = array<i32>} : memref<16x26xbf16, #tpu.memory_space<vmem>>, vector<16x16xbf16>,
    %cst_12 = arith.constant 0.000000e+00 : f32
    %29 = vector.broadcast %cst_12 : f32 to vector<16x16xf32>
    %c0_13 = arith.constant 0 : index
    %c0_14 = arith.constant 0 : index
    %30 = vector.load %arg5[%c0_13, %c0_14] : memref<16x26xbf16, #tpu.memory_space<vmem>>, vector<16x16xbf16>
    %cst_15 = arith.constant 0.000000e+00 : bf16
    %31 = vector.broadcast %cst_15 : bf16 to vector<16x16xbf16>
    %32 = arith.select %18, %30, %31 : vector<16x16xi1>, vector<16x16xbf16>
    %c0_16 = arith.constant 0 : index
    %c0_17 = arith.constant 0 : index
    %c0_18 = arith.constant 0 : index
    %33 = vector.load %arg2[%c0_16, %c0_17, %c0_18] : memref<18x16x16xbf16, #tpu.memory_space<vmem>>, vector<1x16x16xbf16>
    %34 = vector.shape_cast %33 : vector<1x16x16xbf16> to vector<16x16xbf16>
    %cst_19 = arith.constant dense<0.000000e+00> : vector<16x16xf32>
    %35 = tpu.matmul %34, %32, %cst_19 {dimension_numbers = #tpu.dot_dimension_numbers<[1], [0], [0], [1], [0, 0, 1, 1], [], []>} : vector<16x16xbf16>, vector<16x16xbf16>, vector<16x16xf32> -> vector<16x16xf32>
    %36 = arith.addf %29, %35 : vector<16x16xf32>
    %c0_20 = arith.constant 0 : index
    %c1 = arith.constant 1 : index
    %37 = vector.load %arg5[%c0_20, %c1] : memref<16x26xbf16, #tpu.memory_space<vmem>>, vector<16x16xbf16>
    %c1_21 = arith.constant 1 : index
    %c0_22 = arith.constant 0 : index
    %c0_23 = arith.constant 0 : index
    %38 = vector.load %arg2[%c1_21, %c0_22, %c0_23] : memref<18x16x16xbf16, #tpu.memory_space<vmem>>, vector<1x16x16xbf16>
    %39 = vector.shape_cast %38 : vector<1x16x16xbf16> to vector<16x16xbf16>
    %cst_24 = arith.constant dense<0.000000e+00> : vector<16x16xf32>
    %40 = tpu.matmul %39, %37, %cst_24 {dimension_numbers = #tpu.dot_dimension_numbers<[1], [0], [0], [1], [0, 0, 1, 1], [], []>} : vector<16x16xbf16>, vector<16x16xbf16>, vector<16x16xf32> -> vector<16x16xf32>
    %41 = arith.addf %36, %40 : vector<16x16xf32>
    %c0_25 = arith.constant 0 : index
    %c2 = arith.constant 2 : index
    %42 = vector.load %arg5[%c0_25, %c2] : memref<16x26xbf16, #tpu.memory_space<vmem>>, vector<16x16xbf16>
    %cst_26 = arith.constant 0.000000e+00 : bf16
    %43 = vector.broadcast %cst_26 : bf16 to vector<16x16xbf16>
    %44 = arith.select %20, %42, %43 : vector<16x16xi1>, vector<16x16xbf16>
    %c2_27 = arith.constant 2 : index
    %c0_28 = arith.constant 0 : index
    %c0_29 = arith.constant 0 : index
    %45 = vector.load %arg2[%c2_27, %c0_28, %c0_29] : memref<18x16x16xbf16, #tpu.memory_space<vmem>>, vector<1x16x16xbf16>
    %46 = vector.shape_cast %45 : vector<1x16x16xbf16> to vector<16x16xbf16>
    %cst_30 = arith.constant dense<0.000000e+00> : vector<16x16xf32>
    %47 = tpu.matmul %46, %44, %cst_30 {dimension_numbers = #tpu.dot_dimension_numbers<[1], [0], [0], [1], [0, 0, 1, 1], [], []>} : vector<16x16xbf16>, vector<16x16xbf16>, vector<16x16xf32> -> vector<16x16xf32>
    %48 = arith.addf %41, %47 : vector<16x16xf32>
    %c0_31 = arith.constant 0 : index
    %c4 = arith.constant 4 : index
    %49 = vector.load %arg5[%c0_31, %c4] : memref<16x26xbf16, #tpu.memory_space<vmem>>, vector<16x16xbf16>
    %cst_32 = arith.constant 0.000000e+00 : bf16
    %50 = vector.broadcast %cst_32 : bf16 to vector<16x16xbf16>
    %51 = arith.select %18, %49, %50 : vector<16x16xi1>, vector<16x16xbf16>
    %c3 = arith.constant 3 : index
    %c0_33 = arith.constant 0 : index
    %c0_34 = arith.constant 0 : index
    %52 = vector.load %arg2[%c3, %c0_33, %c0_34] : memref<18x16x16xbf16, #tpu.memory_space<vmem>>, vector<1x16x16xbf16>
    %53 = vector.shape_cast %52 : vector<1x16x16xbf16> to vector<16x16xbf16>
    %cst_35 = arith.constant dense<0.000000e+00> : vector<16x16xf32>
    %54 = tpu.matmul %53, %51, %cst_35 {dimension_numbers = #tpu.dot_dimension_numbers<[1], [0], [0], [1], [0, 0, 1, 1], [], []>} : vector<16x16xbf16>, vector<16x16xbf16>, vector<16x16xf32> -> vector<16x16xf32>
    %55 = arith.addf %48, %54 : vector<16x16xf32>
    %c0_36 = arith.constant 0 : index
    %c5_37 = arith.constant 5 : index
    %56 = vector.load %arg5[%c0_36, %c5_37] : memref<16x26xbf16, #tpu.memory_space<vmem>>, vector<16x16xbf16>
    %c4_38 = arith.constant 4 : index
    %c0_39 = arith.constant 0 : index
    %c0_40 = arith.constant 0 : index
    %57 = vector.load %arg2[%c4_38, %c0_39, %c0_40] : memref<18x16x16xbf16, #tpu.memory_space<vmem>>, vector<1x16x16xbf16>
    %58 = vector.shape_cast %57 : vector<1x16x16xbf16> to vector<16x16xbf16>
    %cst_41 = arith.constant dense<0.000000e+00> : vector<16x16xf32>
    %59 = tpu.matmul %58, %56, %cst_41 {dimension_numbers = #tpu.dot_dimension_numbers<[1], [0], [0], [1], [0, 0, 1, 1], [], []>} : vector<16x16xbf16>, vector<16x16xbf16>, vector<16x16xf32> -> vector<16x16xf32>
    %60 = arith.addf %55, %59 : vector<16x16xf32>
    %c0_42 = arith.constant 0 : index
    %c6 = arith.constant 6 : index
    %61 = vector.load %arg5[%c0_42, %c6] : memref<16x26xbf16, #tpu.memory_space<vmem>>, vector<16x16xbf16>
    %cst_43 = arith.constant 0.000000e+00 : bf16
    %62 = vector.broadcast %cst_43 : bf16 to vector<16x16xbf16>
    %63 = arith.select %20, %61, %62 : vector<16x16xi1>, vector<16x16xbf16>
    %c5_44 = arith.constant 5 : index
    %c0_45 = arith.constant 0 : index
    %c0_46 = arith.constant 0 : index
    %64 = vector.load %arg2[%c5_44, %c0_45, %c0_46] : memref<18x16x16xbf16, #tpu.memory_space<vmem>>, vector<1x16x16xbf16>
    %65 = vector.shape_cast %64 : vector<1x16x16xbf16> to vector<16x16xbf16>
    %cst_47 = arith.constant dense<0.000000e+00> : vector<16x16xf32>
    %66 = tpu.matmul %65, %63, %cst_47 {dimension_numbers = #tpu.dot_dimension_numbers<[1], [0], [0], [1], [0, 0, 1, 1], [], []>} : vector<16x16xbf16>, vector<16x16xbf16>, vector<16x16xf32> -> vector<16x16xf32>
    %67 = arith.addf %60, %66 : vector<16x16xf32>
    %c0_48 = arith.constant 0 : index
    %c8 = arith.constant 8 : index
    %68 = vector.load %arg5[%c0_48, %c8] : memref<16x26xbf16, #tpu.memory_space<vmem>>, vector<16x16xbf16>
    %cst_49 = arith.constant 0.000000e+00 : bf16
    %69 = vector.broadcast %cst_49 : bf16 to vector<16x16xbf16>
    %70 = arith.select %18, %68, %69 : vector<16x16xi1>, vector<16x16xbf16>
    %c6_50 = arith.constant 6 : index
    %c0_51 = arith.constant 0 : index
    %c0_52 = arith.constant 0 : index
    %71 = vector.load %arg2[%c6_50, %c0_51, %c0_52] : memref<18x16x16xbf16, #tpu.memory_space<vmem>>, vector<1x16x16xbf16>
    %72 = vector.shape_cast %71 : vector<1x16x16xbf16> to vector<16x16xbf16>
    %cst_53 = arith.constant dense<0.000000e+00> : vector<16x16xf32>
    %73 = tpu.matmul %72, %70, %cst_53 {dimension_numbers = #tpu.dot_dimension_numbers<[1], [0], [0], [1], [0, 0, 1, 1], [], []>} : vector<16x16xbf16>, vector<16x16xbf16>, vector<16x16xf32> -> vector<16x16xf32>
    %74 = arith.addf %67, %73 : vector<16x16xf32>
    %c0_54 = arith.constant 0 : index
    %c9 = arith.constant 9 : index
    %75 = vector.load %arg5[%c0_54, %c9] : memref<16x26xbf16, #tpu.memory_space<vmem>>, vector<16x16xbf16>
    %c7 = arith.constant 7 : index
    %c0_55 = arith.constant 0 : index
    %c0_56 = arith.constant 0 : index
    %76 = vector.load %arg2[%c7, %c0_55, %c0_56] : memref<18x16x16xbf16, #tpu.memory_space<vmem>>, vector<1x16x16xbf16>
    %77 = vector.shape_cast %76 : vector<1x16x16xbf16> to vector<16x16xbf16>
    %cst_57 = arith.constant dense<0.000000e+00> : vector<16x16xf32>
    %78 = tpu.matmul %77, %75, %cst_57 {dimension_numbers = #tpu.dot_dimension_numbers<[1], [0], [0], [1], [0, 0, 1, 1], [], []>} : vector<16x16xbf16>, vector<16x16xbf16>, vector<16x16xf32> -> vector<16x16xf32>
    %79 = arith.addf %74, %78 : vector<16x16xf32>
    %c0_58 = arith.constant 0 : index
    %c10 = arith.constant 10 : index
    %80 = vector.load %arg5[%c0_58, %c10] : memref<16x26xbf16, #tpu.memory_space<vmem>>, vector<16x16xbf16>
    %cst_59 = arith.constant 0.000000e+00 : bf16
    %81 = vector.broadcast %cst_59 : bf16 to vector<16x16xbf16>
    %82 = arith.select %20, %80, %81 : vector<16x16xi1>, vector<16x16xbf16>
    %c8_60 = arith.constant 8 : index
    %c0_61 = arith.constant 0 : index
    %c0_62 = arith.constant 0 : index
    %83 = vector.load %arg2[%c8_60, %c0_61, %c0_62] : memref<18x16x16xbf16, #tpu.memory_space<vmem>>, vector<1x16x16xbf16>
    %84 = vector.shape_cast %83 : vector<1x16x16xbf16> to vector<16x16xbf16>
    %cst_63 = arith.constant dense<0.000000e+00> : vector<16x16xf32>
    %85 = tpu.matmul %84, %82, %cst_63 {dimension_numbers = #tpu.dot_dimension_numbers<[1], [0], [0], [1], [0, 0, 1, 1], [], []>} : vector<16x16xbf16>, vector<16x16xbf16>, vector<16x16xf32> -> vector<16x16xf32>
    %86 = arith.addf %79, %85 : vector<16x16xf32>
    %87 = vector.broadcast %26 : vector<16x1xf32> to vector<16x16xf32>
    %88 = arith.addf %86, %87 : vector<16x16xf32>
    %cst_64 = arith.constant 0.000000e+00 : f32
    %89 = vector.broadcast %cst_64 : f32 to vector<16x16xf32>
    %90 = arith.maximumf %88, %89 : vector<16x16xf32>
    %c1_65 = arith.constant 1 : index
    %c0_66 = arith.constant 0 : index
    %c0_67 = arith.constant 0 : index
    %91 = vector.load %arg3[%c1_65, %c0_66, %c0_67] : memref<2x16x1xf32, #tpu.memory_space<vmem>>, vector<1x16x1xf32>
    %92 = vector.shape_cast %91 : vector<1x16x1xf32> to vector<16x1xf32>
    %93 = arith.truncf %90 : vector<16x16xf32> to vector<16x16xbf16>
    %c0_68 = arith.constant 0 : index
    %c5_69 = arith.constant 5 : index
    %94 = vector.load %arg5[%c0_68, %c5_69] : memref<16x26xbf16, #tpu.memory_space<vmem>>, vector<16x16xbf16>
    tpu.vector_store %arg5[%c0_68, %c5_69], %93 {strides = array<i32>} : memref<16x26xbf16, #tpu.memory_space<vmem>>, vector<16x16xbf16>,
    %cst_70 = arith.constant 0.000000e+00 : f32
    %95 = vector.broadcast %cst_70 : f32 to vector<16x16xf32>
    %c0_71 = arith.constant 0 : index
    %c0_72 = arith.constant 0 : index
    %96 = vector.load %arg5[%c0_71, %c0_72] : memref<16x26xbf16, #tpu.memory_space<vmem>>, vector<16x16xbf16>
    %cst_73 = arith.constant 0.000000e+00 : bf16
    %97 = vector.broadcast %cst_73 : bf16 to vector<16x16xbf16>
    %98 = arith.select %18, %96, %97 : vector<16x16xi1>, vector<16x16xbf16>
    %c9_74 = arith.constant 9 : index
    %c0_75 = arith.constant 0 : index
    %c0_76 = arith.constant 0 : index
    %99 = vector.load %arg2[%c9_74, %c0_75, %c0_76] : memref<18x16x16xbf16, #tpu.memory_space<vmem>>, vector<1x16x16xbf16>
    %100 = vector.shape_cast %99 : vector<1x16x16xbf16> to vector<16x16xbf16>
    %cst_77 = arith.constant dense<0.000000e+00> : vector<16x16xf32>
    %101 = tpu.matmul %100, %98, %cst_77 {dimension_numbers = #tpu.dot_dimension_numbers<[1], [0], [0], [1], [0, 0, 1, 1], [], []>} : vector<16x16xbf16>, vector<16x16xbf16>, vector<16x16xf32> -> vector<16x16xf32>
    %102 = arith.addf %95, %101 : vector<16x16xf32>
    %c0_78 = arith.constant 0 : index
    %c1_79 = arith.constant 1 : index
    %103 = vector.load %arg5[%c0_78, %c1_79] : memref<16x26xbf16, #tpu.memory_space<vmem>>, vector<16x16xbf16>
    %c10_80 = arith.constant 10 : index
    %c0_81 = arith.constant 0 : index
    %c0_82 = arith.constant 0 : index
    %104 = vector.load %arg2[%c10_80, %c0_81, %c0_82] : memref<18x16x16xbf16, #tpu.memory_space<vmem>>, vector<1x16x16xbf16>
    %105 = vector.shape_cast %104 : vector<1x16x16xbf16> to vector<16x16xbf16>
    %cst_83 = arith.constant dense<0.000000e+00> : vector<16x16xf32>
    %106 = tpu.matmul %105, %103, %cst_83 {dimension_numbers = #tpu.dot_dimension_numbers<[1], [0], [0], [1], [0, 0, 1, 1], [], []>} : vector<16x16xbf16>, vector<16x16xbf16>, vector<16x16xf32> -> vector<16x16xf32>
    %107 = arith.addf %102, %106 : vector<16x16xf32>
    %c0_84 = arith.constant 0 : index
    %c2_85 = arith.constant 2 : index
    %108 = vector.load %arg5[%c0_84, %c2_85] : memref<16x26xbf16, #tpu.memory_space<vmem>>, vector<16x16xbf16>
    %cst_86 = arith.constant 0.000000e+00 : bf16
    %109 = vector.broadcast %cst_86 : bf16 to vector<16x16xbf16>
    %110 = arith.select %20, %108, %109 : vector<16x16xi1>, vector<16x16xbf16>
    %c11 = arith.constant 11 : index
    %c0_87 = arith.constant 0 : index
    %c0_88 = arith.constant 0 : index
    %111 = vector.load %arg2[%c11, %c0_87, %c0_88] : memref<18x16x16xbf16, #tpu.memory_space<vmem>>, vector<1x16x16xbf16>
    %112 = vector.shape_cast %111 : vector<1x16x16xbf16> to vector<16x16xbf16>
    %cst_89 = arith.constant dense<0.000000e+00> : vector<16x16xf32>
    %113 = tpu.matmul %112, %110, %cst_89 {dimension_numbers = #tpu.dot_dimension_numbers<[1], [0], [0], [1], [0, 0, 1, 1], [], []>} : vector<16x16xbf16>, vector<16x16xbf16>, vector<16x16xf32> -> vector<16x16xf32>
    %114 = arith.addf %107, %113 : vector<16x16xf32>
    %c0_90 = arith.constant 0 : index
    %c4_91 = arith.constant 4 : index
    %115 = vector.load %arg5[%c0_90, %c4_91] : memref<16x26xbf16, #tpu.memory_space<vmem>>, vector<16x16xbf16>
    %cst_92 = arith.constant 0.000000e+00 : bf16
    %116 = vector.broadcast %cst_92 : bf16 to vector<16x16xbf16>
    %117 = arith.select %18, %115, %116 : vector<16x16xi1>, vector<16x16xbf16>
    %c12 = arith.constant 12 : index
    %c0_93 = arith.constant 0 : index
    %c0_94 = arith.constant 0 : index
    %118 = vector.load %arg2[%c12, %c0_93, %c0_94] : memref<18x16x16xbf16, #tpu.memory_space<vmem>>, vector<1x16x16xbf16>
    %119 = vector.shape_cast %118 : vector<1x16x16xbf16> to vector<16x16xbf16>
    %cst_95 = arith.constant dense<0.000000e+00> : vector<16x16xf32>
    %120 = tpu.matmul %119, %117, %cst_95 {dimension_numbers = #tpu.dot_dimension_numbers<[1], [0], [0], [1], [0, 0, 1, 1], [], []>} : vector<16x16xbf16>, vector<16x16xbf16>, vector<16x16xf32> -> vector<16x16xf32>
    %121 = arith.addf %114, %120 : vector<16x16xf32>
    %c0_96 = arith.constant 0 : index
    %c5_97 = arith.constant 5 : index
    %122 = vector.load %arg5[%c0_96, %c5_97] : memref<16x26xbf16, #tpu.memory_space<vmem>>, vector<16x16xbf16>
    %c13 = arith.constant 13 : index
    %c0_98 = arith.constant 0 : index
    %c0_99 = arith.constant 0 : index
    %123 = vector.load %arg2[%c13, %c0_98, %c0_99] : memref<18x16x16xbf16, #tpu.memory_space<vmem>>, vector<1x16x16xbf16>
    %124 = vector.shape_cast %123 : vector<1x16x16xbf16> to vector<16x16xbf16>
    %cst_100 = arith.constant dense<0.000000e+00> : vector<16x16xf32>
    %125 = tpu.matmul %124, %122, %cst_100 {dimension_numbers = #tpu.dot_dimension_numbers<[1], [0], [0], [1], [0, 0, 1, 1], [], []>} : vector<16x16xbf16>, vector<16x16xbf16>, vector<16x16xf32> -> vector<16x16xf32>
    %126 = arith.addf %121, %125 : vector<16x16xf32>
    %c0_101 = arith.constant 0 : index
    %c6_102 = arith.constant 6 : index
    %127 = vector.load %arg5[%c0_101, %c6_102] : memref<16x26xbf16, #tpu.memory_space<vmem>>, vector<16x16xbf16>
    %cst_103 = arith.constant 0.000000e+00 : bf16
    %128 = vector.broadcast %cst_103 : bf16 to vector<16x16xbf16>
    %129 = arith.select %20, %127, %128 : vector<16x16xi1>, vector<16x16xbf16>
    %c14 = arith.constant 14 : index
    %c0_104 = arith.constant 0 : index
    %c0_105 = arith.constant 0 : index
    %130 = vector.load %arg2[%c14, %c0_104, %c0_105] : memref<18x16x16xbf16, #tpu.memory_space<vmem>>, vector<1x16x16xbf16>
    %131 = vector.shape_cast %130 : vector<1x16x16xbf16> to vector<16x16xbf16>
    %cst_106 = arith.constant dense<0.000000e+00> : vector<16x16xf32>
    %132 = tpu.matmul %131, %129, %cst_106 {dimension_numbers = #tpu.dot_dimension_numbers<[1], [0], [0], [1], [0, 0, 1, 1], [], []>} : vector<16x16xbf16>, vector<16x16xbf16>, vector<16x16xf32> -> vector<16x16xf32>
    %133 = arith.addf %126, %132 : vector<16x16xf32>
    %c0_107 = arith.constant 0 : index
    %c8_108 = arith.constant 8 : index
    %134 = vector.load %arg5[%c0_107, %c8_108] : memref<16x26xbf16, #tpu.memory_space<vmem>>, vector<16x16xbf16>
    %cst_109 = arith.constant 0.000000e+00 : bf16
    %135 = vector.broadcast %cst_109 : bf16 to vector<16x16xbf16>
    %136 = arith.select %18, %134, %135 : vector<16x16xi1>, vector<16x16xbf16>
    %c15 = arith.constant 15 : index
    %c0_110 = arith.constant 0 : index
    %c0_111 = arith.constant 0 : index
    %137 = vector.load %arg2[%c15, %c0_110, %c0_111] : memref<18x16x16xbf16, #tpu.memory_space<vmem>>, vector<1x16x16xbf16>
    %138 = vector.shape_cast %137 : vector<1x16x16xbf16> to vector<16x16xbf16>
    %cst_112 = arith.constant dense<0.000000e+00> : vector<16x16xf32>
    %139 = tpu.matmul %138, %136, %cst_112 {dimension_numbers = #tpu.dot_dimension_numbers<[1], [0], [0], [1], [0, 0, 1, 1], [], []>} : vector<16x16xbf16>, vector<16x16xbf16>, vector<16x16xf32> -> vector<16x16xf32>
    %140 = arith.addf %133, %139 : vector<16x16xf32>
    %c0_113 = arith.constant 0 : index
    %c9_114 = arith.constant 9 : index
    %141 = vector.load %arg5[%c0_113, %c9_114] : memref<16x26xbf16, #tpu.memory_space<vmem>>, vector<16x16xbf16>
    %c16 = arith.constant 16 : index
    %c0_115 = arith.constant 0 : index
    %c0_116 = arith.constant 0 : index
    %142 = vector.load %arg2[%c16, %c0_115, %c0_116] : memref<18x16x16xbf16, #tpu.memory_space<vmem>>, vector<1x16x16xbf16>
    %143 = vector.shape_cast %142 : vector<1x16x16xbf16> to vector<16x16xbf16>
    %cst_117 = arith.constant dense<0.000000e+00> : vector<16x16xf32>
    %144 = tpu.matmul %143, %141, %cst_117 {dimension_numbers = #tpu.dot_dimension_numbers<[1], [0], [0], [1], [0, 0, 1, 1], [], []>} : vector<16x16xbf16>, vector<16x16xbf16>, vector<16x16xf32> -> vector<16x16xf32>
    %145 = arith.addf %140, %144 : vector<16x16xf32>
    %c0_118 = arith.constant 0 : index
    %c10_119 = arith.constant 10 : index
    %146 = vector.load %arg5[%c0_118, %c10_119] : memref<16x26xbf16, #tpu.memory_space<vmem>>, vector<16x16xbf16>
    %cst_120 = arith.constant 0.000000e+00 : bf16
    %147 = vector.broadcast %cst_120 : bf16 to vector<16x16xbf16>
    %148 = arith.select %20, %146, %147 : vector<16x16xi1>, vector<16x16xbf16>
    %c17 = arith.constant 17 : index
    %c0_121 = arith.constant 0 : index
    %c0_122 = arith.constant 0 : index
    %149 = vector.load %arg2[%c17, %c0_121, %c0_122] : memref<18x16x16xbf16, #tpu.memory_space<vmem>>, vector<1x16x16xbf16>
    %150 = vector.shape_cast %149 : vector<1x16x16xbf16> to vector<16x16xbf16>
    %cst_123 = arith.constant dense<0.000000e+00> : vector<16x16xf32>
    %151 = tpu.matmul %150, %148, %cst_123 {dimension_numbers = #tpu.dot_dimension_numbers<[1], [0], [0], [1], [0, 0, 1, 1], [], []>} : vector<16x16xbf16>, vector<16x16xbf16>, vector<16x16xf32> -> vector<16x16xf32>
    %152 = arith.addf %145, %151 : vector<16x16xf32>
    %153 = vector.broadcast %92 : vector<16x1xf32> to vector<16x16xf32>
    %154 = arith.addf %152, %153 : vector<16x16xf32>
    %155 = arith.addf %154, %24 : vector<16x16xf32>
    %c0_124 = arith.constant 0 : index
    %c0_125 = arith.constant 0 : index
    %c0_126 = arith.constant 0 : index
    %156 = vector.load %arg4[%c0_124, %c0_125, %c0_126] : memref<1x16x16xf32, #tpu.memory_space<vmem>>, vector<1x16x16xf32>
    %157 = vector.shape_cast %156 : vector<1x16x16xf32> to vector<16x16xf32>
    %158 = vector.shape_cast %155 : vector<16x16xf32> to vector<1x16x16xf32>
    tpu.vector_store %arg4[%c0_124, %c0_125, %c0_126], %158 {strides = array<i32>} : memref<1x16x16xf32, #tpu.memory_space<vmem>>, vector<1x16x16xf32>,
    return
  }
  func.func @transform_0(%arg0: i32) -> (i32, i32, i32) {
    %c0_i32 = arith.constant 0 : i32
    %c0_i32_0 = arith.constant 0 : i32
    %c0_i32_1 = arith.constant 0 : i32
    return %arg0, %c0_i32, %c0_i32_0 : i32, i32, i32
  }
  func.func @transform_1(%arg0: i32) -> (i32, i32, i32) {
    %c0_i32 = arith.constant 0 : i32
    %c0_i32_0 = arith.constant 0 : i32
    %c0_i32_1 = arith.constant 0 : i32
    %c0_i32_2 = arith.constant 0 : i32
    return %c0_i32, %c0_i32_0, %c0_i32_1 : i32, i32, i32
  }
  func.func @transform_2(%arg0: i32) -> (i32, i32, i32) {
    %c0_i32 = arith.constant 0 : i32
    %c0_i32_0 = arith.constant 0 : i32
    %c0_i32_1 = arith.constant 0 : i32
    %c0_i32_2 = arith.constant 0 : i32
    return %c0_i32, %c0_i32_0, %c0_i32_1 : i32, i32, i32
  }
  func.func @transform_3(%arg0: i32) -> (i32, i32, i32) {
    %c0_i32 = arith.constant 0 : i32
    %c0_i32_0 = arith.constant 0 : i32
    %c0_i32_1 = arith.constant 0 : i32
    return %arg0, %c0_i32, %c0_i32_0 : i32, i32, i32
  }
}

module attributes {stable_mosaic.version = 11 : i64} {
  func.func @_res_seq_kernel(%arg0: i32, %arg1: memref<1x16x256xf32, #tpu.memory_space<vmem>>, %arg2: memref<18x16x16xbf16, #tpu.memory_space<vmem>>, %arg3: memref<2x16x1xf32, #tpu.memory_space<vmem>>, %arg4: memref<1x16x256xf32, #tpu.memory_space<vmem>>, %arg5: memref<16x290xbf16, #tpu.memory_space<vmem>>) attributes {dimension_semantics = [#tpu.dimension_semantics<parallel>], iteration_bounds = array<i64: 2>, scalar_prefetch = 0 : i64, scratch_operands = 1 : i64, tpu.core_type = #tpu.core_type<tc>, window_params = [{transform_indices = @transform_0, window_bounds = array<i64: 1, 16, 256>}, {pipeline_mode = #tpu.pipeline_mode<synchronous>, transform_indices = @transform_1, window_bounds = array<i64: 18, 16, 16>}, {pipeline_mode = #tpu.pipeline_mode<synchronous>, transform_indices = @transform_2, window_bounds = array<i64: 2, 16, 1>}, {transform_indices = @transform_3, window_bounds = array<i64: 1, 16, 256>}]} {
    %0 = tpu.iota {dimensions = array<i32: 1>} : vector<16x256xi32>
    %c16_i32 = arith.constant 16 : i32
    %c0_i32 = arith.constant 0 : i32
    %1 = arith.cmpi eq, %c16_i32, %c0_i32 : i32
    %c1_i32 = arith.constant 1 : i32
    %2 = arith.select %1, %c1_i32, %c16_i32 : i32
    %3 = vector.broadcast %2 : i32 to vector<16x256xi32>
    %4 = arith.remsi %0, %3 : vector<16x256xi32>
    %c0_i32_0 = arith.constant 0 : i32
    %5 = vector.broadcast %c0_i32_0 : i32 to vector<16x256xi32>
    %6 = arith.cmpi ne, %4, %5 : vector<16x256xi32>
    %c0_i32_1 = arith.constant 0 : i32
    %7 = vector.broadcast %c0_i32_1 : i32 to vector<16x256xi32>
    %8 = arith.cmpi slt, %4, %7 : vector<16x256xi32>
    %c0_i32_2 = arith.constant 0 : i32
    %9 = arith.cmpi slt, %2, %c0_i32_2 : i32
    %10 = vector.broadcast %9 : i1 to vector<16x256xi1>
    %11 = vector.broadcast %10 : vector<16x256xi1> to vector<16x256xi1>
    %12 = arith.xori %8, %11 : vector<16x256xi1>
    %13 = arith.andi %12, %6 : vector<16x256xi1>
    %14 = vector.broadcast %2 : i32 to vector<16x256xi32>
    %15 = arith.addi %4, %14 : vector<16x256xi32>
    %16 = arith.select %13, %15, %4 : vector<16x256xi1>, vector<16x256xi32>
    %c1_i32_3 = arith.constant 1 : i32
    %17 = vector.broadcast %c1_i32_3 : i32 to vector<16x256xi32>
    %18 = arith.cmpi sge, %16, %17 : vector<16x256xi32>
    %c14_i32 = arith.constant 14 : i32
    %19 = vector.broadcast %c14_i32 : i32 to vector<16x256xi32>
    %20 = arith.cmpi sle, %16, %19 : vector<16x256xi32>
    %cst = arith.constant 0.000000e+00 : bf16
    %21 = vector.broadcast %cst : bf16 to vector<16x290xbf16>
    %c0 = arith.constant 0 : index
    %c0_4 = arith.constant 0 : index
    %22 = vector.load %arg5[%c0, %c0_4] : memref<16x290xbf16, #tpu.memory_space<vmem>>, vector<16x290xbf16>
    tpu.vector_store %arg5[%c0, %c0_4], %21 {strides = array<i32>} : memref<16x290xbf16, #tpu.memory_space<vmem>>, vector<16x290xbf16>,
    %c0_5 = arith.constant 0 : index
    %c0_6 = arith.constant 0 : index
    %c0_7 = arith.constant 0 : index
    %23 = vector.load %arg1[%c0_5, %c0_6, %c0_7] : memref<1x16x256xf32, #tpu.memory_space<vmem>>, vector<1x16x256xf32>
    %24 = vector.shape_cast %23 : vector<1x16x256xf32> to vector<16x256xf32>
    %c0_8 = arith.constant 0 : index
    %c0_9 = arith.constant 0 : index
    %c0_10 = arith.constant 0 : index
    %25 = vector.load %arg3[%c0_8, %c0_9, %c0_10] : memref<2x16x1xf32, #tpu.memory_space<vmem>>, vector<1x16x1xf32>
    %26 = vector.shape_cast %25 : vector<1x16x1xf32> to vector<16x1xf32>
    %27 = arith.truncf %24 : vector<16x256xf32> to vector<16x256xbf16>
    %c0_11 = arith.constant 0 : index
    %c17 = arith.constant 17 : index
    %28 = vector.load %arg5[%c0_11, %c17] : memref<16x290xbf16, #tpu.memory_space<vmem>>, vector<16x256xbf16>
    tpu.vector_store %arg5[%c0_11, %c17], %27 {strides = array<i32>} : memref<16x290xbf16, #tpu.memory_space<vmem>>, vector<16x256xbf16>,
    %cst_12 = arith.constant 0.000000e+00 : f32
    %29 = vector.broadcast %cst_12 : f32 to vector<16x256xf32>
    %c0_13 = arith.constant 0 : index
    %c0_14 = arith.constant 0 : index
    %30 = vector.load %arg5[%c0_13, %c0_14] : memref<16x290xbf16, #tpu.memory_space<vmem>>, vector<16x256xbf16>
    %cst_15 = arith.constant 0.000000e+00 : bf16
    %31 = vector.broadcast %cst_15 : bf16 to vector<16x256xbf16>
    %32 = arith.select %18, %30, %31 : vector<16x256xi1>, vector<16x256xbf16>
    %c0_16 = arith.constant 0 : index
    %c0_17 = arith.constant 0 : index
    %c0_18 = arith.constant 0 : index
    %33 = vector.load %arg2[%c0_16, %c0_17, %c0_18] : memref<18x16x16xbf16, #tpu.memory_space<vmem>>, vector<1x16x16xbf16>
    %34 = vector.shape_cast %33 : vector<1x16x16xbf16> to vector<16x16xbf16>
    %cst_19 = arith.constant dense<0.000000e+00> : vector<16x256xf32>
    %35 = tpu.matmul %34, %32, %cst_19 {dimension_numbers = #tpu.dot_dimension_numbers<[1], [0], [0], [1], [0, 0, 1, 1], [], []>} : vector<16x16xbf16>, vector<16x256xbf16>, vector<16x256xf32> -> vector<16x256xf32>
    %36 = arith.addf %29, %35 : vector<16x256xf32>
    %c0_20 = arith.constant 0 : index
    %c1 = arith.constant 1 : index
    %37 = vector.load %arg5[%c0_20, %c1] : memref<16x290xbf16, #tpu.memory_space<vmem>>, vector<16x256xbf16>
    %c1_21 = arith.constant 1 : index
    %c0_22 = arith.constant 0 : index
    %c0_23 = arith.constant 0 : index
    %38 = vector.load %arg2[%c1_21, %c0_22, %c0_23] : memref<18x16x16xbf16, #tpu.memory_space<vmem>>, vector<1x16x16xbf16>
    %39 = vector.shape_cast %38 : vector<1x16x16xbf16> to vector<16x16xbf16>
    %cst_24 = arith.constant dense<0.000000e+00> : vector<16x256xf32>
    %40 = tpu.matmul %39, %37, %cst_24 {dimension_numbers = #tpu.dot_dimension_numbers<[1], [0], [0], [1], [0, 0, 1, 1], [], []>} : vector<16x16xbf16>, vector<16x256xbf16>, vector<16x256xf32> -> vector<16x256xf32>
    %41 = arith.addf %36, %40 : vector<16x256xf32>
    %c0_25 = arith.constant 0 : index
    %c2 = arith.constant 2 : index
    %42 = vector.load %arg5[%c0_25, %c2] : memref<16x290xbf16, #tpu.memory_space<vmem>>, vector<16x256xbf16>
    %cst_26 = arith.constant 0.000000e+00 : bf16
    %43 = vector.broadcast %cst_26 : bf16 to vector<16x256xbf16>
    %44 = arith.select %20, %42, %43 : vector<16x256xi1>, vector<16x256xbf16>
    %c2_27 = arith.constant 2 : index
    %c0_28 = arith.constant 0 : index
    %c0_29 = arith.constant 0 : index
    %45 = vector.load %arg2[%c2_27, %c0_28, %c0_29] : memref<18x16x16xbf16, #tpu.memory_space<vmem>>, vector<1x16x16xbf16>
    %46 = vector.shape_cast %45 : vector<1x16x16xbf16> to vector<16x16xbf16>
    %cst_30 = arith.constant dense<0.000000e+00> : vector<16x256xf32>
    %47 = tpu.matmul %46, %44, %cst_30 {dimension_numbers = #tpu.dot_dimension_numbers<[1], [0], [0], [1], [0, 0, 1, 1], [], []>} : vector<16x16xbf16>, vector<16x256xbf16>, vector<16x256xf32> -> vector<16x256xf32>
    %48 = arith.addf %41, %47 : vector<16x256xf32>
    %c0_31 = arith.constant 0 : index
    %c16 = arith.constant 16 : index
    %49 = vector.load %arg5[%c0_31, %c16] : memref<16x290xbf16, #tpu.memory_space<vmem>>, vector<16x256xbf16>
    %cst_32 = arith.constant 0.000000e+00 : bf16
    %50 = vector.broadcast %cst_32 : bf16 to vector<16x256xbf16>
    %51 = arith.select %18, %49, %50 : vector<16x256xi1>, vector<16x256xbf16>
    %c3 = arith.constant 3 : index
    %c0_33 = arith.constant 0 : index
    %c0_34 = arith.constant 0 : index
    %52 = vector.load %arg2[%c3, %c0_33, %c0_34] : memref<18x16x16xbf16, #tpu.memory_space<vmem>>, vector<1x16x16xbf16>
    %53 = vector.shape_cast %52 : vector<1x16x16xbf16> to vector<16x16xbf16>
    %cst_35 = arith.constant dense<0.000000e+00> : vector<16x256xf32>
    %54 = tpu.matmul %53, %51, %cst_35 {dimension_numbers = #tpu.dot_dimension_numbers<[1], [0], [0], [1], [0, 0, 1, 1], [], []>} : vector<16x16xbf16>, vector<16x256xbf16>, vector<16x256xf32> -> vector<16x256xf32>
    %55 = arith.addf %48, %54 : vector<16x256xf32>
    %c0_36 = arith.constant 0 : index
    %c17_37 = arith.constant 17 : index
    %56 = vector.load %arg5[%c0_36, %c17_37] : memref<16x290xbf16, #tpu.memory_space<vmem>>, vector<16x256xbf16>
    %c4 = arith.constant 4 : index
    %c0_38 = arith.constant 0 : index
    %c0_39 = arith.constant 0 : index
    %57 = vector.load %arg2[%c4, %c0_38, %c0_39] : memref<18x16x16xbf16, #tpu.memory_space<vmem>>, vector<1x16x16xbf16>
    %58 = vector.shape_cast %57 : vector<1x16x16xbf16> to vector<16x16xbf16>
    %cst_40 = arith.constant dense<0.000000e+00> : vector<16x256xf32>
    %59 = tpu.matmul %58, %56, %cst_40 {dimension_numbers = #tpu.dot_dimension_numbers<[1], [0], [0], [1], [0, 0, 1, 1], [], []>} : vector<16x16xbf16>, vector<16x256xbf16>, vector<16x256xf32> -> vector<16x256xf32>
    %60 = arith.addf %55, %59 : vector<16x256xf32>
    %c0_41 = arith.constant 0 : index
    %c18 = arith.constant 18 : index
    %61 = vector.load %arg5[%c0_41, %c18] : memref<16x290xbf16, #tpu.memory_space<vmem>>, vector<16x256xbf16>
    %cst_42 = arith.constant 0.000000e+00 : bf16
    %62 = vector.broadcast %cst_42 : bf16 to vector<16x256xbf16>
    %63 = arith.select %20, %61, %62 : vector<16x256xi1>, vector<16x256xbf16>
    %c5 = arith.constant 5 : index
    %c0_43 = arith.constant 0 : index
    %c0_44 = arith.constant 0 : index
    %64 = vector.load %arg2[%c5, %c0_43, %c0_44] : memref<18x16x16xbf16, #tpu.memory_space<vmem>>, vector<1x16x16xbf16>
    %65 = vector.shape_cast %64 : vector<1x16x16xbf16> to vector<16x16xbf16>
    %cst_45 = arith.constant dense<0.000000e+00> : vector<16x256xf32>
    %66 = tpu.matmul %65, %63, %cst_45 {dimension_numbers = #tpu.dot_dimension_numbers<[1], [0], [0], [1], [0, 0, 1, 1], [], []>} : vector<16x16xbf16>, vector<16x256xbf16>, vector<16x256xf32> -> vector<16x256xf32>
    %67 = arith.addf %60, %66 : vector<16x256xf32>
    %c0_46 = arith.constant 0 : index
    %c32 = arith.constant 32 : index
    %68 = vector.load %arg5[%c0_46, %c32] : memref<16x290xbf16, #tpu.memory_space<vmem>>, vector<16x256xbf16>
    %cst_47 = arith.constant 0.000000e+00 : bf16
    %69 = vector.broadcast %cst_47 : bf16 to vector<16x256xbf16>
    %70 = arith.select %18, %68, %69 : vector<16x256xi1>, vector<16x256xbf16>
    %c6 = arith.constant 6 : index
    %c0_48 = arith.constant 0 : index
    %c0_49 = arith.constant 0 : index
    %71 = vector.load %arg2[%c6, %c0_48, %c0_49] : memref<18x16x16xbf16, #tpu.memory_space<vmem>>, vector<1x16x16xbf16>
    %72 = vector.shape_cast %71 : vector<1x16x16xbf16> to vector<16x16xbf16>
    %cst_50 = arith.constant dense<0.000000e+00> : vector<16x256xf32>
    %73 = tpu.matmul %72, %70, %cst_50 {dimension_numbers = #tpu.dot_dimension_numbers<[1], [0], [0], [1], [0, 0, 1, 1], [], []>} : vector<16x16xbf16>, vector<16x256xbf16>, vector<16x256xf32> -> vector<16x256xf32>
    %74 = arith.addf %67, %73 : vector<16x256xf32>
    %c0_51 = arith.constant 0 : index
    %c33 = arith.constant 33 : index
    %75 = vector.load %arg5[%c0_51, %c33] : memref<16x290xbf16, #tpu.memory_space<vmem>>, vector<16x256xbf16>
    %c7 = arith.constant 7 : index
    %c0_52 = arith.constant 0 : index
    %c0_53 = arith.constant 0 : index
    %76 = vector.load %arg2[%c7, %c0_52, %c0_53] : memref<18x16x16xbf16, #tpu.memory_space<vmem>>, vector<1x16x16xbf16>
    %77 = vector.shape_cast %76 : vector<1x16x16xbf16> to vector<16x16xbf16>
    %cst_54 = arith.constant dense<0.000000e+00> : vector<16x256xf32>
    %78 = tpu.matmul %77, %75, %cst_54 {dimension_numbers = #tpu.dot_dimension_numbers<[1], [0], [0], [1], [0, 0, 1, 1], [], []>} : vector<16x16xbf16>, vector<16x256xbf16>, vector<16x256xf32> -> vector<16x256xf32>
    %79 = arith.addf %74, %78 : vector<16x256xf32>
    %c0_55 = arith.constant 0 : index
    %c34 = arith.constant 34 : index
    %80 = vector.load %arg5[%c0_55, %c34] : memref<16x290xbf16, #tpu.memory_space<vmem>>, vector<16x256xbf16>
    %cst_56 = arith.constant 0.000000e+00 : bf16
    %81 = vector.broadcast %cst_56 : bf16 to vector<16x256xbf16>
    %82 = arith.select %20, %80, %81 : vector<16x256xi1>, vector<16x256xbf16>
    %c8 = arith.constant 8 : index
    %c0_57 = arith.constant 0 : index
    %c0_58 = arith.constant 0 : index
    %83 = vector.load %arg2[%c8, %c0_57, %c0_58] : memref<18x16x16xbf16, #tpu.memory_space<vmem>>, vector<1x16x16xbf16>
    %84 = vector.shape_cast %83 : vector<1x16x16xbf16> to vector<16x16xbf16>
    %cst_59 = arith.constant dense<0.000000e+00> : vector<16x256xf32>
    %85 = tpu.matmul %84, %82, %cst_59 {dimension_numbers = #tpu.dot_dimension_numbers<[1], [0], [0], [1], [0, 0, 1, 1], [], []>} : vector<16x16xbf16>, vector<16x256xbf16>, vector<16x256xf32> -> vector<16x256xf32>
    %86 = arith.addf %79, %85 : vector<16x256xf32>
    %87 = vector.broadcast %26 : vector<16x1xf32> to vector<16x256xf32>
    %88 = arith.addf %86, %87 : vector<16x256xf32>
    %cst_60 = arith.constant 0.000000e+00 : f32
    %89 = vector.broadcast %cst_60 : f32 to vector<16x256xf32>
    %90 = arith.maximumf %88, %89 : vector<16x256xf32>
    %c1_61 = arith.constant 1 : index
    %c0_62 = arith.constant 0 : index
    %c0_63 = arith.constant 0 : index
    %91 = vector.load %arg3[%c1_61, %c0_62, %c0_63] : memref<2x16x1xf32, #tpu.memory_space<vmem>>, vector<1x16x1xf32>
    %92 = vector.shape_cast %91 : vector<1x16x1xf32> to vector<16x1xf32>
    %93 = arith.truncf %90 : vector<16x256xf32> to vector<16x256xbf16>
    %c0_64 = arith.constant 0 : index
    %c17_65 = arith.constant 17 : index
    %94 = vector.load %arg5[%c0_64, %c17_65] : memref<16x290xbf16, #tpu.memory_space<vmem>>, vector<16x256xbf16>
    tpu.vector_store %arg5[%c0_64, %c17_65], %93 {strides = array<i32>} : memref<16x290xbf16, #tpu.memory_space<vmem>>, vector<16x256xbf16>,
    %cst_66 = arith.constant 0.000000e+00 : f32
    %95 = vector.broadcast %cst_66 : f32 to vector<16x256xf32>
    %c0_67 = arith.constant 0 : index
    %c0_68 = arith.constant 0 : index
    %96 = vector.load %arg5[%c0_67, %c0_68] : memref<16x290xbf16, #tpu.memory_space<vmem>>, vector<16x256xbf16>
    %cst_69 = arith.constant 0.000000e+00 : bf16
    %97 = vector.broadcast %cst_69 : bf16 to vector<16x256xbf16>
    %98 = arith.select %18, %96, %97 : vector<16x256xi1>, vector<16x256xbf16>
    %c9 = arith.constant 9 : index
    %c0_70 = arith.constant 0 : index
    %c0_71 = arith.constant 0 : index
    %99 = vector.load %arg2[%c9, %c0_70, %c0_71] : memref<18x16x16xbf16, #tpu.memory_space<vmem>>, vector<1x16x16xbf16>
    %100 = vector.shape_cast %99 : vector<1x16x16xbf16> to vector<16x16xbf16>
    %cst_72 = arith.constant dense<0.000000e+00> : vector<16x256xf32>
    %101 = tpu.matmul %100, %98, %cst_72 {dimension_numbers = #tpu.dot_dimension_numbers<[1], [0], [0], [1], [0, 0, 1, 1], [], []>} : vector<16x16xbf16>, vector<16x256xbf16>, vector<16x256xf32> -> vector<16x256xf32>
    %102 = arith.addf %95, %101 : vector<16x256xf32>
    %c0_73 = arith.constant 0 : index
    %c1_74 = arith.constant 1 : index
    %103 = vector.load %arg5[%c0_73, %c1_74] : memref<16x290xbf16, #tpu.memory_space<vmem>>, vector<16x256xbf16>
    %c10 = arith.constant 10 : index
    %c0_75 = arith.constant 0 : index
    %c0_76 = arith.constant 0 : index
    %104 = vector.load %arg2[%c10, %c0_75, %c0_76] : memref<18x16x16xbf16, #tpu.memory_space<vmem>>, vector<1x16x16xbf16>
    %105 = vector.shape_cast %104 : vector<1x16x16xbf16> to vector<16x16xbf16>
    %cst_77 = arith.constant dense<0.000000e+00> : vector<16x256xf32>
    %106 = tpu.matmul %105, %103, %cst_77 {dimension_numbers = #tpu.dot_dimension_numbers<[1], [0], [0], [1], [0, 0, 1, 1], [], []>} : vector<16x16xbf16>, vector<16x256xbf16>, vector<16x256xf32> -> vector<16x256xf32>
    %107 = arith.addf %102, %106 : vector<16x256xf32>
    %c0_78 = arith.constant 0 : index
    %c2_79 = arith.constant 2 : index
    %108 = vector.load %arg5[%c0_78, %c2_79] : memref<16x290xbf16, #tpu.memory_space<vmem>>, vector<16x256xbf16>
    %cst_80 = arith.constant 0.000000e+00 : bf16
    %109 = vector.broadcast %cst_80 : bf16 to vector<16x256xbf16>
    %110 = arith.select %20, %108, %109 : vector<16x256xi1>, vector<16x256xbf16>
    %c11 = arith.constant 11 : index
    %c0_81 = arith.constant 0 : index
    %c0_82 = arith.constant 0 : index
    %111 = vector.load %arg2[%c11, %c0_81, %c0_82] : memref<18x16x16xbf16, #tpu.memory_space<vmem>>, vector<1x16x16xbf16>
    %112 = vector.shape_cast %111 : vector<1x16x16xbf16> to vector<16x16xbf16>
    %cst_83 = arith.constant dense<0.000000e+00> : vector<16x256xf32>
    %113 = tpu.matmul %112, %110, %cst_83 {dimension_numbers = #tpu.dot_dimension_numbers<[1], [0], [0], [1], [0, 0, 1, 1], [], []>} : vector<16x16xbf16>, vector<16x256xbf16>, vector<16x256xf32> -> vector<16x256xf32>
    %114 = arith.addf %107, %113 : vector<16x256xf32>
    %c0_84 = arith.constant 0 : index
    %c16_85 = arith.constant 16 : index
    %115 = vector.load %arg5[%c0_84, %c16_85] : memref<16x290xbf16, #tpu.memory_space<vmem>>, vector<16x256xbf16>
    %cst_86 = arith.constant 0.000000e+00 : bf16
    %116 = vector.broadcast %cst_86 : bf16 to vector<16x256xbf16>
    %117 = arith.select %18, %115, %116 : vector<16x256xi1>, vector<16x256xbf16>
    %c12 = arith.constant 12 : index
    %c0_87 = arith.constant 0 : index
    %c0_88 = arith.constant 0 : index
    %118 = vector.load %arg2[%c12, %c0_87, %c0_88] : memref<18x16x16xbf16, #tpu.memory_space<vmem>>, vector<1x16x16xbf16>
    %119 = vector.shape_cast %118 : vector<1x16x16xbf16> to vector<16x16xbf16>
    %cst_89 = arith.constant dense<0.000000e+00> : vector<16x256xf32>
    %120 = tpu.matmul %119, %117, %cst_89 {dimension_numbers = #tpu.dot_dimension_numbers<[1], [0], [0], [1], [0, 0, 1, 1], [], []>} : vector<16x16xbf16>, vector<16x256xbf16>, vector<16x256xf32> -> vector<16x256xf32>
    %121 = arith.addf %114, %120 : vector<16x256xf32>
    %c0_90 = arith.constant 0 : index
    %c17_91 = arith.constant 17 : index
    %122 = vector.load %arg5[%c0_90, %c17_91] : memref<16x290xbf16, #tpu.memory_space<vmem>>, vector<16x256xbf16>
    %c13 = arith.constant 13 : index
    %c0_92 = arith.constant 0 : index
    %c0_93 = arith.constant 0 : index
    %123 = vector.load %arg2[%c13, %c0_92, %c0_93] : memref<18x16x16xbf16, #tpu.memory_space<vmem>>, vector<1x16x16xbf16>
    %124 = vector.shape_cast %123 : vector<1x16x16xbf16> to vector<16x16xbf16>
    %cst_94 = arith.constant dense<0.000000e+00> : vector<16x256xf32>
    %125 = tpu.matmul %124, %122, %cst_94 {dimension_numbers = #tpu.dot_dimension_numbers<[1], [0], [0], [1], [0, 0, 1, 1], [], []>} : vector<16x16xbf16>, vector<16x256xbf16>, vector<16x256xf32> -> vector<16x256xf32>
    %126 = arith.addf %121, %125 : vector<16x256xf32>
    %c0_95 = arith.constant 0 : index
    %c18_96 = arith.constant 18 : index
    %127 = vector.load %arg5[%c0_95, %c18_96] : memref<16x290xbf16, #tpu.memory_space<vmem>>, vector<16x256xbf16>
    %cst_97 = arith.constant 0.000000e+00 : bf16
    %128 = vector.broadcast %cst_97 : bf16 to vector<16x256xbf16>
    %129 = arith.select %20, %127, %128 : vector<16x256xi1>, vector<16x256xbf16>
    %c14 = arith.constant 14 : index
    %c0_98 = arith.constant 0 : index
    %c0_99 = arith.constant 0 : index
    %130 = vector.load %arg2[%c14, %c0_98, %c0_99] : memref<18x16x16xbf16, #tpu.memory_space<vmem>>, vector<1x16x16xbf16>
    %131 = vector.shape_cast %130 : vector<1x16x16xbf16> to vector<16x16xbf16>
    %cst_100 = arith.constant dense<0.000000e+00> : vector<16x256xf32>
    %132 = tpu.matmul %131, %129, %cst_100 {dimension_numbers = #tpu.dot_dimension_numbers<[1], [0], [0], [1], [0, 0, 1, 1], [], []>} : vector<16x16xbf16>, vector<16x256xbf16>, vector<16x256xf32> -> vector<16x256xf32>
    %133 = arith.addf %126, %132 : vector<16x256xf32>
    %c0_101 = arith.constant 0 : index
    %c32_102 = arith.constant 32 : index
    %134 = vector.load %arg5[%c0_101, %c32_102] : memref<16x290xbf16, #tpu.memory_space<vmem>>, vector<16x256xbf16>
    %cst_103 = arith.constant 0.000000e+00 : bf16
    %135 = vector.broadcast %cst_103 : bf16 to vector<16x256xbf16>
    %136 = arith.select %18, %134, %135 : vector<16x256xi1>, vector<16x256xbf16>
    %c15 = arith.constant 15 : index
    %c0_104 = arith.constant 0 : index
    %c0_105 = arith.constant 0 : index
    %137 = vector.load %arg2[%c15, %c0_104, %c0_105] : memref<18x16x16xbf16, #tpu.memory_space<vmem>>, vector<1x16x16xbf16>
    %138 = vector.shape_cast %137 : vector<1x16x16xbf16> to vector<16x16xbf16>
    %cst_106 = arith.constant dense<0.000000e+00> : vector<16x256xf32>
    %139 = tpu.matmul %138, %136, %cst_106 {dimension_numbers = #tpu.dot_dimension_numbers<[1], [0], [0], [1], [0, 0, 1, 1], [], []>} : vector<16x16xbf16>, vector<16x256xbf16>, vector<16x256xf32> -> vector<16x256xf32>
    %140 = arith.addf %133, %139 : vector<16x256xf32>
    %c0_107 = arith.constant 0 : index
    %c33_108 = arith.constant 33 : index
    %141 = vector.load %arg5[%c0_107, %c33_108] : memref<16x290xbf16, #tpu.memory_space<vmem>>, vector<16x256xbf16>
    %c16_109 = arith.constant 16 : index
    %c0_110 = arith.constant 0 : index
    %c0_111 = arith.constant 0 : index
    %142 = vector.load %arg2[%c16_109, %c0_110, %c0_111] : memref<18x16x16xbf16, #tpu.memory_space<vmem>>, vector<1x16x16xbf16>
    %143 = vector.shape_cast %142 : vector<1x16x16xbf16> to vector<16x16xbf16>
    %cst_112 = arith.constant dense<0.000000e+00> : vector<16x256xf32>
    %144 = tpu.matmul %143, %141, %cst_112 {dimension_numbers = #tpu.dot_dimension_numbers<[1], [0], [0], [1], [0, 0, 1, 1], [], []>} : vector<16x16xbf16>, vector<16x256xbf16>, vector<16x256xf32> -> vector<16x256xf32>
    %145 = arith.addf %140, %144 : vector<16x256xf32>
    %c0_113 = arith.constant 0 : index
    %c34_114 = arith.constant 34 : index
    %146 = vector.load %arg5[%c0_113, %c34_114] : memref<16x290xbf16, #tpu.memory_space<vmem>>, vector<16x256xbf16>
    %cst_115 = arith.constant 0.000000e+00 : bf16
    %147 = vector.broadcast %cst_115 : bf16 to vector<16x256xbf16>
    %148 = arith.select %20, %146, %147 : vector<16x256xi1>, vector<16x256xbf16>
    %c17_116 = arith.constant 17 : index
    %c0_117 = arith.constant 0 : index
    %c0_118 = arith.constant 0 : index
    %149 = vector.load %arg2[%c17_116, %c0_117, %c0_118] : memref<18x16x16xbf16, #tpu.memory_space<vmem>>, vector<1x16x16xbf16>
    %150 = vector.shape_cast %149 : vector<1x16x16xbf16> to vector<16x16xbf16>
    %cst_119 = arith.constant dense<0.000000e+00> : vector<16x256xf32>
    %151 = tpu.matmul %150, %148, %cst_119 {dimension_numbers = #tpu.dot_dimension_numbers<[1], [0], [0], [1], [0, 0, 1, 1], [], []>} : vector<16x16xbf16>, vector<16x256xbf16>, vector<16x256xf32> -> vector<16x256xf32>
    %152 = arith.addf %145, %151 : vector<16x256xf32>
    %153 = vector.broadcast %92 : vector<16x1xf32> to vector<16x256xf32>
    %154 = arith.addf %152, %153 : vector<16x256xf32>
    %155 = arith.addf %154, %24 : vector<16x256xf32>
    %c0_120 = arith.constant 0 : index
    %c0_121 = arith.constant 0 : index
    %c0_122 = arith.constant 0 : index
    %156 = vector.load %arg4[%c0_120, %c0_121, %c0_122] : memref<1x16x256xf32, #tpu.memory_space<vmem>>, vector<1x16x256xf32>
    %157 = vector.shape_cast %156 : vector<1x16x256xf32> to vector<16x256xf32>
    %158 = vector.shape_cast %155 : vector<16x256xf32> to vector<1x16x256xf32>
    tpu.vector_store %arg4[%c0_120, %c0_121, %c0_122], %158 {strides = array<i32>} : memref<1x16x256xf32, #tpu.memory_space<vmem>>, vector<1x16x256xf32>,
    return
  }
  func.func @transform_0(%arg0: i32) -> (i32, i32, i32) {
    %c0_i32 = arith.constant 0 : i32
    %c0_i32_0 = arith.constant 0 : i32
    %c0_i32_1 = arith.constant 0 : i32
    return %arg0, %c0_i32, %c0_i32_0 : i32, i32, i32
  }
  func.func @transform_1(%arg0: i32) -> (i32, i32, i32) {
    %c0_i32 = arith.constant 0 : i32
    %c0_i32_0 = arith.constant 0 : i32
    %c0_i32_1 = arith.constant 0 : i32
    %c0_i32_2 = arith.constant 0 : i32
    return %c0_i32, %c0_i32_0, %c0_i32_1 : i32, i32, i32
  }
  func.func @transform_2(%arg0: i32) -> (i32, i32, i32) {
    %c0_i32 = arith.constant 0 : i32
    %c0_i32_0 = arith.constant 0 : i32
    %c0_i32_1 = arith.constant 0 : i32
    %c0_i32_2 = arith.constant 0 : i32
    return %c0_i32, %c0_i32_0, %c0_i32_1 : i32, i32, i32
  }
  func.func @transform_3(%arg0: i32) -> (i32, i32, i32) {
    %c0_i32 = arith.constant 0 : i32
    %c0_i32_0 = arith.constant 0 : i32
    %c0_i32_1 = arith.constant 0 : i32
    return %arg0, %c0_i32, %c0_i32_0 : i32, i32, i32
  }
}

</mosaic_0001>

<bundles_post_ra>
// kernel: hourglass_pallas.8
= control target key start
LH: loop header
LB: loop body
LE: loop exit
PB: predicated region body
PF: predicated region fallthrough
CT: control target
= control target key end

     0   :  { %s1683_s12 = smov 0   ;;  %s1917_s0 = inlined_call_operand.vmem [shape: f32[2,16,64], index: 0, kind: input, shape index: {}]   ;;  %s1918_s1 = inlined_call_operand.vmem [shape: bf16[18,16,16], index: 1, kind: input, shape index: {}]   ;;  %s1919_s2 = inlined_call_operand.vmem [shape: f32[2,16,1], index: 2, kind: input, shape index: {}]   ;;  %s1920_s3 = inlined_call_operand.vmem [shape: f32[2,16,64], index: 3, kind: output, shape index: {}]  }
   0x1 LB: > { %s1364_s13 = sadd.s32 4294967295, %s1644_s12   ;;  %p1368_p0 = scmp.ge.s32.totalorder %s1644_s12, 1  ;;  %s1644_s12 = sphi %s1683_s12, %s13_s12  }
   0x2   : > { %p137_p1 = scmp.lt.s32.totalorder %s1644_s12, 3 }
   0x4   : > { %p138_p2 = pnand %p1368_p0, %p137_p1 }
   0x5   : > { %p161_p3 = scmp.lt.s32.totalorder (!%p138_p2), %s1364_s13, 1  ;;  %v174_v0 = vlaneseq (!%p138_p2)  ;;  %vm190_vm0 = vcmask (!%p138_p2), 670720   ;;  %v1646_v1 = vmov (!%p138_p2), 0   ;;  %v1647_v6 = vmov (!%p138_p2), 0.0   ;;  %s1648_s18 = smov (!%p138_p2), 9   ;;  %v1620_v21 = vld [vmem:[%s1918_s1] sm:$0xff] (!%p138_p2)  }
   0x6   : > { %141 = sbr.rel (%p138_p2) target bundleno = 1008 (0x3f0), region = 32  ;;  %191 = vst.msk [vmem:[#allocation2] sm:$0xff] (!%p138_p2), %vm190_vm0, %v1646_v1  ;;  %1618 = vset.pattern.permute.xlu0 (!%p138_p2), %v1646_v1  ;;  %1619 = vset.pattern.permute.xlu1 (!%p138_p2), %v1646_v1  ;;  %s1649_s19 = smov (!%p138_p2), 8   ;;  %vm1653_vm5 = vmmov (!%p138_p2), 0   ;;  %vm201_vm6 = vcmask (!%p138_p2), 597064   ;;  %vm226_vm10 = vcmask (!%p138_p2), 130048  }
   0x7   : > { %v175_v2 = vand.u32 (!%p138_p2), 127, %v174_v0  ;;  %v207_v3 = vshrl.u32 (!%p138_p2), %v174_v0, 7  ;;  %1491 = vmatprep.subr.bf16.mxu1 (!%p138_p2), %v1647_v6  ;;  %1485 = vmatprep.subr.bf16.mxu0 (!%p138_p2), %v1647_v6  ;;  %s1650_s20 = smov (!%p138_p2), 2   ;;  %s1651_s21 = smov (!%p138_p2), 10   ;;  %v194_v28 = vld [vmem:[%s1919_s2] sm:$0xff] (!%p138_p2)  ;;  %v195_v29 = vld [vmem:[%s1919_s2 + $0x8] sm:$0xff] (!%p138_p2) }
   0x8   : > { %s1652_s22 = smov (!%p138_p2), 16   ;;  %1493 = vmatprep.mubr.msk.bf16.mxu1 (!%p138_p2), %vm1653_vm5, %v1647_v6  ;;  %1487 = vmatprep.mubr.msk.bf16.mxu0 (!%p138_p2), %vm1653_vm5, %v1647_v6  ;;  %s1654_s23 = smov (!%p138_p2), 18   ;;  %v1621_v31 = vld [vmem:[%s1918_s1 + $0x8] sm:$0xff] (!%p138_p2)   ;;  %v1622_v34 = vld [vmem:[%s1918_s1 + $0x18] sm:$0xff] (!%p138_p2)   ;;  %v1623_v36 = vld [vmem:[%s1918_s1 + $0x10] sm:$0xff] (!%p138_p2)   ;;  %vm1306_vm14 = vcmask (!%p138_p2), 523264  }
   0x9   : > { %v180_v4 = vand.u32 (!%p138_p2), 7, %v175_v2  ;;  %v208_v5 = vsub.s32 (!%p138_p2), 0, %v207_v3  ;;  %s1655_s24 = smov (!%p138_p2), 127   ;;  %s1656_s25 = smov (!%p138_p2), 126   ;;  %v1624_v38 = vld [vmem:[%s1918_s1 + $0x28] sm:$0xff] (!%p138_p2)   ;;  %v1625_v40 = vld [vmem:[%s1918_s1 + $0x20] sm:$0xff] (!%p138_p2)  }
   0xa   : > { %s1657_s28 = smov (!%p138_p2), 120   ;;  %s1658_s29 = smov (!%p138_p2), 119   ;;  %v1627_v42 = vld [vmem:[%s1918_s1 + $0x38] sm:$0xff] (!%p138_p2)   ;;  %v1626_v43 = vld [vmem:[%s1918_s1 + $0x30] sm:$0xff] (!%p138_p2)   ;;  %v1628_v45 = vld [vmem:[%s1918_s1 + $0x40] sm:$0xff] (!%p138_p2)  }
   0xb   : > { %vm188_vm1 = vcmp.ge.s32.totalorder (!%p138_p2), %v180_v4, 1  ;;  %vm189_vm2 = vcmp.le.s32.totalorder (!%p138_p2), %v180_v4, 6  ;;  %s1659_s30 = smov (!%p138_p2), 118   ;;  %s1660_s4 = smov (!%p138_p2), 112  }
   0xc   : > { %vm204_vm3 = vmpackc.low (!%p138_p2), %vm188_vm1, %vm188_vm1  ;;  %s1661_s5 = smov (!%p138_p2), 111   ;;  %s1662_s6 = smov (!%p138_p2), 110  }
   0xd   : > { %s1922_s13 = smov (!%p161_p3, %s1364_s13), 1  ;;  %v205_v10 = vsel %vm204_vm3, 65537, %v1646_v1  ;;  %vm320_vm4 = vmpackc.low %vm189_vm2, %vm189_vm2 }
   0xe   : > { %s1447_s14 = sshll.u32 %s1922_s13, 4  ;;  %v1708_v11 = vrot.slane %v205_v10, %v208_v5  ;;  %v321_v12 = vsel %vm320_vm4, 65537, %v1646_v1 }
   0xf   : > { %s165_s17 = scalar_lea.vmem %s1917_s0, %s1447_s14  ;;  %v325_v13 = vrot.slane %v321_v12, %v208_v5  ;;  %s170_s15 = scalar_lea.vmem %s1920_s3, %s1447_s14 }
  0x10   : > { %v1701_v7 = vld [vmem:[%s165_s17] sm:$0xff]  ;;  %v1703_v8 = vld [vmem:[%s165_s17 + $0x8] sm:$0xff]  ;;  %388 = vrot.lane.b32.xlu1 %v1708_v11, %s1649_s19  ;;  %vm210_vm8 = vcmp.ne.s16.totalorder %v1708_v11, 0 }
  0x11   : > { %v196_v9 = vpack.c.bf16 %v1703_v8, %v1701_v7 }
  0x13   : > { %198 = vrot.lane.b32.xlu0 %v196_v9, %s1648_s18 }
  0x14   : > { %507 = vrot.lane.b32.xlu1 %v325_v13, %s1651_s21 }
  0x17   : > { %326 = vrot.lane.b32.xlu0 %v325_v13, %s1650_s20 }
  0x18   : > { %688 = vrot.lane.b32.xlu1 %v325_v13, %s1654_s23 }
  0x1b   : > { %569 = vrot.lane.b32.xlu0 %v1708_v11, %s1652_s22 }
  0x82   : > { %v1717_v15 = vpop.permute.xlu1 %388 }
  0x83   : > { %vm390_vm9 = vcmp.ne.s16.totalorder %v1717_v15, 0 }
  0x85   : > { %v199_v14 = vpop.permute.xlu0 %198 }
  0x86   : > { %202 = vst.msk [vmem:[#allocation2] sm:$0xff] %vm201_vm6, %v199_v14  ;;  %v1726_v19 = vpop.permute.xlu1 %507 }
  0x87   : > { %vm509_vm11 = vcmp.ne.s16.totalorder %v1726_v19, 0  ;;  %v1408_v19 = vld [vmem:[%s1919_s2 + $0x18] sm:$0xff] }
  0x89   : > { %v1719_v16 = vpop.permute.xlu0 %326 }
  0x8a   : > { %vm328_vm7 = vcmp.ne.s16.totalorder %v1719_v16, 0  ;;  %v1745_v24 = vpop.permute.xlu1 %688 }
  0x8b   : > { %vm690_vm13 = vcmp.ne.s16.totalorder %v1745_v24, 0 }
  0x8d   : > { %v203_v17 = vld [vmem:[#allocation2] sm:$0xff]  ;;  %v1735_v22 = vpop.permute.xlu0 %569 }
  0x8e   : > { %v329_v18 = vsel %vm328_vm7, %v203_v17, 0  ;;  %223 = vrot.lane.b32.xlu0 %v203_v17, %s1655_s24  ;;  %v211_v20 = vsel %vm210_vm8, %v203_v17, 0  ;;  %v391_v23 = vsel %vm390_vm9, %v203_v17, 0  ;;  %vm571_vm12 = vcmp.ne.s16.totalorder %v1735_v22, 0 }
  0x8f   : > { %339 = vrot.lane.b32.xlu1 %v329_v18, %s1656_s25  ;;  %1492 = vmatpush3.bf16.msra.mxu1 %v211_v20  ;;  %v510_v25 = vsel %vm509_vm11, %v203_v17, 0  ;;  %v572_v26 = vsel %vm571_vm12, %v203_v17, 0  ;;  %v691_v27 = vsel %vm690_vm13, %v203_v17, 0 }
  0x90   : > { %1503 = vmatprep.subr.bf16.mxu1 %v1647_v6 }
  0x92   : > { %401 = vrot.lane.b32.xlu0 %v391_v23, %s1657_s28  ;;  %1494 = vmatmul.mubr.msk.bf16.vlgmr.msra.gmra.mrb[0].mxu1 %vm226_vm10, %v1620_v21 }
  0x93   : > { %458 = vrot.lane.b32.xlu1 %v203_v17, %s1658_s29  ;;  %1505 = vmatprep.mubr.msk.bf16.mxu1 %vm1653_vm5, %v1647_v6 }
  0x96   : > { %520 = vrot.lane.b32.xlu0 %v510_v25, %s1659_s30 }
  0x97   : > { %582 = vrot.lane.b32.xlu1 %v572_v26, %s1660_s4 }
  0x9a   : > { %639 = vrot.lane.b32.xlu0 %v203_v17, %s1661_s5 }
  0x9b   : > { %701 = vrot.lane.b32.xlu1 %v691_v27, %s1662_s6 }
  0x9e   : > { %752 = vperm.xlu0 %1618, %v194_v28  }
  0x9f   : > { %757 = vperm.xlu1 %1619, %v195_v29  }
 0x100   : > { %v224_v30 = vpop.permute.xlu0 %223 }
 0x101   : > { %1486 = vmatpush3.bf16.msra.mxu0 %v224_v30  ;;  %v340_v32 = vpop.permute.xlu1 %339 }
 0x102   : > { %1497 = vmatprep.subr.bf16.mxu0 %v1647_v6 }
 0x104   : > { %1488 = vmatmul.mubr.msk.bf16.vlgmr.msra.gmra.mrb[0].mxu0 %vm226_vm10, %v1621_v31  ;;  %v402_v33 = vpop.permute.xlu0 %401 }
 0x105   : > { %1498 = vmatpush3.bf16.msra.mxu0 %v340_v32  ;;  %1504 = vmatpush3.bf16.msra.mxu1 %v402_v33  ;;  %v459_v37 = vpop.permute.xlu1 %458 }
 0x106   : > { %1515 = vmatprep.subr.bf16.mxu1 %v1647_v6  ;;  %1499 = vmatprep.mubr.msk.bf16.mxu0 %vm1653_vm5, %v1647_v6 }
 0x107   : > { %1509 = vmatprep.subr.bf16.mxu0 %v1647_v6 }
 0x108   : > { %1506 = vmatmul.mubr.msk.bf16.vlgmr.msra.gmra.mrb[4].mxu1 %vm226_vm10, %v1622_v34  ;;  %v521_v35 = vpop.permute.xlu0 %520 }
 0x109   : > { %1516 = vmatpush3.bf16.msra.mxu1 %v521_v35  ;;  %1517 = vmatprep.mubr.msk.bf16.mxu1 %vm1653_vm5, %v1647_v6  ;;  %v583_v41 = vpop.permute.xlu1 %582 }
 0x10a   : > { %1527 = vmatprep.subr.bf16.mxu1 %v1647_v6 }
 0x10c   : > { %1500 = vmatmul.mubr.msk.bf16.vlgmr.msra.gmra.mrb[4].mxu0 %vm226_vm10, %v1623_v36  ;;  %v640_v39 = vpop.permute.xlu0 %639 }
 0x10d   : > { %1510 = vmatpush3.bf16.msra.mxu0 %v459_v37  ;;  %1511 = vmatprep.mubr.msk.bf16.mxu0 %vm1653_vm5, %v1647_v6  ;;  %v702_v44 = vpop.permute.xlu1 %701 }
 0x10e   : > { %1521 = vmatprep.subr.bf16.mxu0 %v1647_v6 }
 0x110   : > { %1518 = vmatmul.mubr.msk.bf16.vlgmr.msra.gmra.mrb[8].mxu1 %vm226_vm10, %v1624_v38 }
 0x111   : > { %1528 = vmatpush3.bf16.msra.mxu1 %v640_v39  ;;  %1529 = vmatprep.mubr.msk.bf16.mxu1 %vm1653_vm5, %v1647_v6 }
 0x112   : > { %1539 = vmatprep.subr.bf16.mxu1 %v1647_v6 }
 0x114   : > { %1512 = vmatmul.mubr.msk.bf16.vlgmr.msra.gmra.mrb[8].mxu0 %vm226_vm10, %v1625_v40 }
 0x115   : > { %1522 = vmatpush3.bf16.msra.mxu0 %v583_v41  ;;  %1523 = vmatprep.mubr.msk.bf16.mxu0 %vm1653_vm5, %v1647_v6 }
 0x116   : > { %1533 = vmatprep.subr.bf16.mxu0 %v1647_v6 }
 0x118   : > { %1530 = vmatmul.mubr.msk.bf16.vlgmr.msra.gmra.mrb[12].mxu1 %vm226_vm10, %v1627_v42 }
 0x119   : > { %1541 = vmatprep.mubr.msk.bf16.mxu1 %vm1653_vm5, %v1647_v6 }
 0x11c   : > { %1524 = vmatmul.mubr.msk.bf16.vlgmr.msra.gmra.mrb[12].mxu0 %vm226_vm10, %v1626_v43 }
 0x11d   : > { %1534 = vmatpush3.bf16.msra.mxu0 %v702_v44  ;;  %1535 = vmatprep.mubr.msk.bf16.mxu0 %vm1653_vm5, %v1647_v6  ;;  %v753_v38 = vpop.permute.xlu0 %752 }
 0x11e   : > { %1545 = vmatprep.subr.bf16.mxu0 %v1647_v6  ;;  %v758_v42 = vpop.permute.xlu1 %757 }
 0x124   : > { %1536 = vmatmul.mubr.msk.bf16.vlgmr.msra.gmra.mrb[16].mxu0 %vm226_vm10, %v1628_v45 }
 0x125   : > { %1547 = vmatprep.mubr.msk.bf16.mxu0 %vm1653_vm5, %v1647_v6 }
 0x165   : > { %v313_v46 = vpop.f32.mrb[0].mxu1 }
 0x166   : > { %v1495_v47 = vpop.f32.mrb[1].mxu1 }
 0x167   : > { %v316_v48 = vpop.f32.mrb[2].mxu1 }
 0x168   : > { %v1496_v49 = vpop.f32.mrb[3].mxu1 }
 0x1d7   : > { %v264_v50 = vpop.f32.mrb[0].mxu0 }
 0x1d8   : > { %v314_v51 = vadd.f32 %v313_v46, %v264_v50  ;;  %v1489_v52 = vpop.f32.mrb[1].mxu0 }
 0x1d9   : > { %v267_v53 = vpop.f32.mrb[2].mxu0 }
 0x1da   : > { %v317_v54 = vadd.f32 %v316_v48, %v267_v53  ;;  %v1490_v55 = vpop.f32.mrb[3].mxu0 }
 0x1db   : > { %v441_v56 = vpop.f32.mrb[4].mxu1 }
 0x1dc   : > { %v1507_v57 = vpop.f32.mrb[5].mxu1 }
 0x1dd   : > { %v444_v58 = vpop.f32.mrb[6].mxu1  ;;  %v1630_v57 = vld [vmem:[%s1918_s1 + $0x50] sm:$0xff]  }
 0x1de   : > { %v1508_v59 = vpop.f32.mrb[7].mxu1 }
 0x1df   : > { %v379_v60 = vpop.f32.mrb[4].mxu0  ;;  %v1631_v59 = vld [vmem:[%s1918_s1 + $0x60] sm:$0xff]  }
 0x1e0   : > { %v386_v61 = vadd.f32 %v379_v60, %v314_v51  ;;  %v1501_v62 = vpop.f32.mrb[5].mxu0 }
 0x1e1   : > { %v382_v63 = vpop.f32.mrb[6].mxu0 }
 0x1e2   : > { %v387_v0 = vadd.f32 %v382_v63, %v317_v54  ;;  %v448_v1 = vadd.f32 %v441_v56, %v386_v61  ;;  %v1502_v2 = vpop.f32.mrb[7].mxu0  ;;  %v1629_v54 = vld [vmem:[%s1918_s1 + $0x48] sm:$0xff]   ;;  %v1407_v56 = vld [vmem:[%s1919_s2 + $0x10] sm:$0xff]  ;;  %v1632_v61 = vld [vmem:[%s1918_s1 + $0x58] sm:$0xff]  }
 0x1e3   : > { %v560_v3 = vpop.f32.mrb[8].mxu1  ;;  %v1633_v63 = vld [vmem:[%s1918_s1 + $0x70] sm:$0xff]  }
 0x1e4   : > { %v449_v4 = vadd.f32 %v444_v58, %v387_v0  ;;  %v1519_v5 = vpop.f32.mrb[9].mxu1 }
 0x1e5   : > { %v563_v9 = vpop.f32.mrb[10].mxu1 }
 0x1e6   : > { %v1520_v10 = vpop.f32.mrb[11].mxu1 }
 0x1e7   : > { %v498_v12 = vpop.f32.mrb[8].mxu0 }
 0x1e8   : > { %v505_v13 = vadd.f32 %v498_v12, %v448_v1  ;;  %v1513_v14 = vpop.f32.mrb[9].mxu0  ;;  %v1634_v1 = vld [vmem:[%s1918_s1 + $0x68] sm:$0xff]  }
 0x1e9   : > { %v501_v17 = vpop.f32.mrb[10].mxu0 }
 0x1ea   : > { %v506_v18 = vadd.f32 %v501_v17, %v449_v4  ;;  %v567_v20 = vadd.f32 %v560_v3, %v505_v13  ;;  %v1514_v21 = vpop.f32.mrb[11].mxu0  ;;  %v1636_v3 = vld [vmem:[%s1918_s1 + $0x80] sm:$0xff]   ;;  %v1635_v4 = vld [vmem:[%s1918_s1 + $0x78] sm:$0xff]  }
 0x1eb   : > { %v679_v23 = vpop.f32.mrb[12].mxu1 }
 0x1ec   : > { %v568_v25 = vadd.f32 %v563_v9, %v506_v18  ;;  %v1531_v26 = vpop.f32.mrb[13].mxu1  ;;  %v1637_v9 = vld [vmem:[%s1918_s1 + $0x88] sm:$0xff]  }
 0x1ed   : > { %v682_v27 = vpop.f32.mrb[14].mxu1 }
 0x1ee   : > { %v1532_v28 = vpop.f32.mrb[15].mxu1 }
 0x1ef   : > { %v622_v29 = vpop.f32.mrb[12].mxu0 }
 0x1f0   : > { %v629_v30 = vadd.f32 %v622_v29, %v567_v20  ;;  %v1525_v31 = vpop.f32.mrb[13].mxu0 }
 0x1f1   : > { %v625_v32 = vpop.f32.mrb[14].mxu0 }
 0x1f2   : > { %v630_v33 = vadd.f32 %v625_v32, %v568_v25  ;;  %v686_v34 = vadd.f32 %v679_v23, %v629_v30  ;;  %v1526_v35 = vpop.f32.mrb[15].mxu0 }
 0x1f4   : > { %v687_v36 = vadd.f32 %v682_v27, %v630_v33 }
 0x1f7   : > { %v741_v37 = vpop.f32.mrb[16].mxu0 }
 0x1f8   : > { %v748_v39 = vadd.f32 %v741_v37, %v686_v34  ;;  %v1537_v40 = vpop.f32.mrb[17].mxu0 }
 0x1f9   : > { %v744_v41 = vpop.f32.mrb[18].mxu0 }
 0x1fa   : > { %v749_v43 = vadd.f32 %v744_v41, %v687_v36  ;;  %v760_v44 = vadd.f32 %v753_v38, %v748_v39  ;;  %v1538_v45 = vpop.f32.mrb[19].mxu0 }
 0x1fc   : > { %v761_v46 = vadd.f32 %v758_v42, %v749_v43  ;;  %v762_v47 = vmax.f32 %v760_v44, 0.0 }
 0x1fe   : > { %v763_v48 = vmax.f32 %v761_v46, 0.0 }
 0x200   : > { %v767_v49 = vpack.c.bf16 %v763_v48, %v762_v47 }
 0x202   : > { %769 = vrot.lane.b32.xlu1 %v767_v49, %s1648_s18 }
 0x274   : > { %v770_v50 = vpop.permute.xlu1 %769 }
 0x275   : > { %772 = vst.msk [vmem:[#allocation2] sm:$0xff] %vm201_vm6, %v770_v50 }
 0x27c   : > { %v773_v51 = vld [vmem:[#allocation2] sm:$0xff] }
 0x27d   : > { %787 = vrot.lane.b32.xlu0 %v773_v51, %s1655_s24  ;;  %v883_v52 = vsel %vm328_vm7, %v773_v51, 0  ;;  %v774_v53 = vsel %vm210_vm8, %v773_v51, 0  ;;  %v942_v55 = vsel %vm390_vm9, %v773_v51, 0  ;;  %v1058_v11 = vsel %vm509_vm11, %v773_v51, 0 }
 0x27e   : > { %893 = vrot.lane.b32.xlu1 %v883_v52, %s1656_s25  ;;  %1546 = vmatpush3.bf16.msra.mxu0 %v774_v53  ;;  %v1117_v16 = vsel %vm571_vm12, %v773_v51, 0  ;;  %v1233_v15 = vsel %vm690_vm13, %v773_v51, 0 }
 0x27f   : > { %1557 = vmatprep.subr.bf16.mxu0 %v1647_v6 }
 0x281   : > { %952 = vrot.lane.b32.xlu0 %v942_v55, %s1657_s28  ;;  %1548 = vmatmul.mubr.msk.bf16.vlgmr.msra.gmra.mrb[20].mxu0 %vm226_vm10, %v1629_v54 }
 0x282   : > { %1009 = vrot.lane.b32.xlu1 %v773_v51, %s1658_s29  ;;  %1559 = vmatprep.mubr.msk.bf16.mxu0 %vm1653_vm5, %v1647_v6 }
 0x285   : > { %1068 = vrot.lane.b32.xlu0 %v1058_v11, %s1659_s30 }
 0x286   : > { %1127 = vrot.lane.b32.xlu1 %v1117_v16, %s1660_s4 }
 0x289   : > { %1184 = vrot.lane.b32.xlu0 %v773_v51, %s1661_s5 }
 0x28a   : > { %1243 = vrot.lane.b32.xlu1 %v1233_v15, %s1662_s6 }
 0x28d   : > { %1294 = vperm.xlu0 %1618, %v1407_v56  }
 0x28e   : > { %1299 = vperm.xlu1 %1619, %v1408_v19  }
 0x2ef   : > { %v788_v22 = vpop.permute.xlu0 %787 }
 0x2f0   : > { %1540 = vmatpush3.bf16.msra.mxu1 %v788_v22  ;;  %v894_v24 = vpop.permute.xlu1 %893 }
 0x2f1   : > { %1551 = vmatprep.subr.bf16.mxu1 %v1647_v6 }
 0x2f3   : > { %1542 = vmatmul.mubr.msk.bf16.vlgmr.msra.gmra.mrb[16].mxu1 %vm226_vm10, %v1630_v57  ;;  %v953_v58 = vpop.permute.xlu0 %952 }
 0x2f4   : > { %1552 = vmatpush3.bf16.msra.mxu1 %v894_v24  ;;  %1558 = vmatpush3.bf16.msra.mxu0 %v953_v58  ;;  %v1010_v62 = vpop.permute.xlu1 %1009 }
 0x2f5   : > { %1569 = vmatprep.subr.bf16.mxu0 %v1647_v6  ;;  %1553 = vmatprep.mubr.msk.bf16.mxu1 %vm1653_vm5, %v1647_v6 }
 0x2f6   : > { %1563 = vmatprep.subr.bf16.mxu1 %v1647_v6 }
 0x2f7   : > { %v1069_v60 = vpop.permute.xlu0 %1068  ;;  %1560 = vmatmul.mubr.msk.bf16.vlgmr.msra.gmra.mrb[24].mxu0 %vm226_vm10, %v1631_v59 }
 0x2f8   : > { %1570 = vmatpush3.bf16.msra.mxu0 %v1069_v60  ;;  %1571 = vmatprep.mubr.msk.bf16.mxu0 %vm1653_vm5, %v1647_v6  ;;  %v1128_v2 = vpop.permute.xlu1 %1127 }
 0x2f9   : > { %1581 = vmatprep.subr.bf16.mxu0 %v1647_v6 }
 0x2fb   : > { %1554 = vmatmul.mubr.msk.bf16.vlgmr.msra.gmra.mrb[20].mxu1 %vm226_vm10, %v1632_v61  ;;  %v1185_v0 = vpop.permute.xlu0 %1184 }
 0x2fc   : > { %1564 = vmatpush3.bf16.msra.mxu1 %v1010_v62  ;;  %1565 = vmatprep.mubr.msk.bf16.mxu1 %vm1653_vm5, %v1647_v6  ;;  %v1244_v5 = vpop.permute.xlu1 %1243 }
 0x2fd   : > { %1575 = vmatprep.subr.bf16.mxu1 %v1647_v6 }
 0x2ff   : > { %1572 = vmatmul.mubr.msk.bf16.vlgmr.msra.gmra.mrb[28].mxu0 %vm226_vm10, %v1633_v63 }
 0x300   : > { %1582 = vmatpush3.bf16.msra.mxu0 %v1185_v0  ;;  %1583 = vmatprep.mubr.msk.bf16.mxu0 %vm1653_vm5, %v1647_v6 }
 0x303   : > { %1566 = vmatmul.mubr.msk.bf16.vlgmr.msra.gmra.mrb[24].mxu1 %vm226_vm10, %v1634_v1 }
 0x304   : > { %1576 = vmatpush3.bf16.msra.mxu1 %v1128_v2  ;;  %1577 = vmatprep.mubr.msk.bf16.mxu1 %vm1653_vm5, %v1647_v6 }
 0x305   : > { %1587 = vmatprep.subr.bf16.mxu1 %v1647_v6 }
 0x307   : > { %1584 = vmatmul.mubr.msk.bf16.vlgmr.msra.gmra.mrb[32].mxu0 %vm226_vm10, %v1636_v3 }
 0x30b   : > { %1578 = vmatmul.mubr.msk.bf16.vlgmr.msra.gmra.mrb[28].mxu1 %vm226_vm10, %v1635_v4 }
 0x30c   : > { %1588 = vmatpush3.bf16.msra.mxu1 %v1244_v5  ;;  %1589 = vmatprep.mubr.msk.bf16.mxu1 %vm1653_vm5, %v1647_v6  ;;  %v1295_v58 = vpop.permute.xlu0 %1294 }
 0x30d   : > { %v1300_v63 = vpop.permute.xlu1 %1299 }
 0x313   : > { %1590 = vmatmul.mubr.msk.bf16.vlgmr.msra.gmra.mrb[32].mxu1 %vm226_vm10, %v1637_v9 }
 0x354   : > { %v876_v10 = vpop.f32.mrb[20].mxu0 }
 0x355   : > { %v1549_v12 = vpop.f32.mrb[21].mxu0 }
 0x356   : > { %v879_v13 = vpop.f32.mrb[22].mxu0 }
 0x357   : > { %v1550_v14 = vpop.f32.mrb[23].mxu0 }
 0x3c6   : > { %v827_v17 = vpop.f32.mrb[16].mxu1 }
 0x3c7   : > { %v1543_v18 = vpop.f32.mrb[17].mxu1  ;;  %v877_v20 = vadd.f32 %v876_v10, %v827_v17 }
 0x3c8   : > { %v830_v21 = vpop.f32.mrb[18].mxu1 }
 0x3c9   : > { %v1544_v23 = vpop.f32.mrb[19].mxu1  ;;  %v880_v25 = vadd.f32 %v879_v13, %v830_v21 }
 0x3ca   : > { %v992_v26 = vpop.f32.mrb[24].mxu0 }
 0x3cb   : > { %v1561_v27 = vpop.f32.mrb[25].mxu0 }
 0x3cc   : > { %v995_v28 = vpop.f32.mrb[26].mxu0 }
 0x3cd   : > { %v1562_v6 = vpop.f32.mrb[27].mxu0 }
 0x3ce   : > { %v933_v29 = vpop.f32.mrb[20].mxu1 }
 0x3cf   : > { %v940_v30 = vadd.f32 %v933_v29, %v877_v20  ;;  %v1555_v31 = vpop.f32.mrb[21].mxu1 }
 0x3d0   : > { %v936_v32 = vpop.f32.mrb[22].mxu1 }
 0x3d1   : > { %v941_v33 = vadd.f32 %v936_v32, %v880_v25  ;;  %v999_v34 = vadd.f32 %v992_v26, %v940_v30  ;;  %v1556_v35 = vpop.f32.mrb[23].mxu1 }
 0x3d2   : > { %v1108_v36 = vpop.f32.mrb[28].mxu0 }
 0x3d3   : > { %v1000_v37 = vadd.f32 %v995_v28, %v941_v33  ;;  %v1573_v38 = vpop.f32.mrb[29].mxu0 }
 0x3d4   : > { %v1111_v39 = vpop.f32.mrb[30].mxu0 }
 0x3d5   : > { %v1574_v40 = vpop.f32.mrb[31].mxu0 }
 0x3d6   : > { %v1049_v41 = vpop.f32.mrb[24].mxu1 }
 0x3d7   : > { %v1056_v42 = vadd.f32 %v1049_v41, %v999_v34  ;;  %v1567_v43 = vpop.f32.mrb[25].mxu1 }
 0x3d8   : > { %v1052_v44 = vpop.f32.mrb[26].mxu1 }
 0x3d9   : > { %v1057_v45 = vadd.f32 %v1052_v44, %v1000_v37  ;;  %v1115_v46 = vadd.f32 %v1108_v36, %v1056_v42  ;;  %v1568_v47 = vpop.f32.mrb[27].mxu1 }
 0x3da   : > { %v1224_v48 = vpop.f32.mrb[32].mxu0 }
 0x3db   : > { %v1116_v49 = vadd.f32 %v1111_v39, %v1057_v45  ;;  %v1585_v50 = vpop.f32.mrb[33].mxu0 }
 0x3dc   : > { %v1227_v51 = vpop.f32.mrb[34].mxu0 }
 0x3dd   : > { %v1586_v52 = vpop.f32.mrb[35].mxu0 }
 0x3de   : > { %v1167_v53 = vpop.f32.mrb[28].mxu1 }
 0x3df   : > { %v1174_v54 = vadd.f32 %v1167_v53, %v1115_v46  ;;  %v1579_v55 = vpop.f32.mrb[29].mxu1 }
 0x3e0   : > { %v1170_v11 = vpop.f32.mrb[30].mxu1 }
 0x3e1   : > { %v1175_v16 = vadd.f32 %v1170_v11, %v1116_v49  ;;  %v1231_v15 = vadd.f32 %v1224_v48, %v1174_v54  ;;  %v1580_v56 = vpop.f32.mrb[31].mxu1 }
 0x3e3   : > { %v1232_v19 = vadd.f32 %v1227_v51, %v1175_v16 }
 0x3e6   : > { %v1283_v22 = vpop.f32.mrb[32].mxu1 }
 0x3e7   : > { %v1290_v57 = vadd.f32 %v1283_v22, %v1231_v15  ;;  %v1591_v24 = vpop.f32.mrb[33].mxu1 }
 0x3e8   : > { %v1286_v59 = vpop.f32.mrb[34].mxu1 }
 0x3e9   : > { %v1302_v60 = vadd.f32 %v1295_v58, %v1290_v57  ;;  %v1291_v61 = vadd.f32 %v1286_v59, %v1232_v19  ;;  %v1592_v62 = vpop.f32.mrb[35].mxu1 }
 0x3eb   : > { %v1304_v0 = vadd.f32 %v1302_v60, %v1701_v7  ;;  %v1303_v1 = vadd.f32 %v1300_v63, %v1291_v61 }
 0x3ed   : > { %1307 = vst.msk [vmem:[%s170_s15] sm:$0xff] %vm1306_vm14, %v1304_v0  ;;  %v1305_v2 = vadd.f32 %v1303_v1, %v1703_v8 }
 0x3ef   : > { %1308 = vst.msk [vmem:[%s170_s15 + $0x8] sm:$0xff] %vm1306_vm14, %v1305_v2 }
 0x3f0 PF: > { %s13_s12 = sadd.s32 1, %s1644_s12  }
 0x3f1   : > { %p10_p4 = scmp.ge.s32.totalorder %s13_s12, 4  }
 0x3f3   :  { %12 = sbr.rel (!%p10_p4) target bundleno = 1 (0x1), region = 80 }

// kernel: hourglass_pallas.10
= control target key start
LH: loop header
LB: loop body
LE: loop exit
PB: predicated region body
PF: predicated region fallthrough
CT: control target
= control target key end

     0   :  { %s1682_s12 = smov 0   ;;  %s1918_s0 = inlined_call_operand.vmem [shape: f32[2,16,16], index: 0, kind: input, shape index: {}]   ;;  %s1919_s1 = inlined_call_operand.vmem [shape: bf16[18,16,16], index: 1, kind: input, shape index: {}]   ;;  %s1920_s2 = inlined_call_operand.vmem [shape: f32[2,16,1], index: 2, kind: input, shape index: {}]   ;;  %s1921_s3 = inlined_call_operand.vmem [shape: f32[2,16,16], index: 3, kind: output, shape index: {}]  }
   0x1 LB: > { %s1363_s13 = sadd.s32 4294967295, %s1643_s12   ;;  %p1367_p0 = scmp.ge.s32.totalorder %s1643_s12, 1  ;;  %s1643_s12 = sphi %s1682_s12, %s13_s12  }
   0x2   : > { %p137_p1 = scmp.lt.s32.totalorder %s1643_s12, 3 }
   0x4   : > { %p138_p2 = pnand %p1367_p0, %p137_p1 }
   0x5   : > { %p161_p3 = scmp.lt.s32.totalorder (!%p138_p2), %s1363_s13, 1  ;;  %v174_v0 = vlaneseq (!%p138_p2)  ;;  %vm190_vm0 = vcmask (!%p138_p2), 211968   ;;  %v1645_v1 = vmov (!%p138_p2), 0   ;;  %v1646_v6 = vmov (!%p138_p2), 0.0   ;;  %s1647_s18 = smov (!%p138_p2), 5   ;;  %v1619_v21 = vld [vmem:[%s1919_s1] sm:$0xff] (!%p138_p2)  }
   0x6   : > { %141 = sbr.rel (%p138_p2) target bundleno = 1008 (0x3f0), region = 32  ;;  %191 = vst.msk [vmem:[#allocation2] sm:$0xff] (!%p138_p2), %vm190_vm0, %v1645_v1  ;;  %1617 = vset.pattern.permute.xlu0 (!%p138_p2), %v1645_v1  ;;  %1618 = vset.pattern.permute.xlu1 (!%p138_p2), %v1645_v1  ;;  %s1648_s19 = smov (!%p138_p2), 4   ;;  %vm1652_vm5 = vmmov (!%p138_p2), 0   ;;  %vm201_vm6 = vcmask (!%p138_p2), 171048   ;;  %vm226_vm10 = vcmask (!%p138_p2), 130048  }
   0x7   : > { %v175_v2 = vand.u32 (!%p138_p2), 127, %v174_v0  ;;  %v207_v3 = vshrl.u32 (!%p138_p2), %v174_v0, 7  ;;  %1490 = vmatprep.subr.bf16.mxu1 (!%p138_p2), %v1646_v6  ;;  %1484 = vmatprep.subr.bf16.mxu0 (!%p138_p2), %v1646_v6  ;;  %s1649_s20 = smov (!%p138_p2), 2   ;;  %s1650_s21 = smov (!%p138_p2), 6   ;;  %v194_v28 = vld [vmem:[%s1920_s2] sm:$0xff] (!%p138_p2)  ;;  %v195_v29 = vld [vmem:[%s1920_s2 + $0x8] sm:$0xff] (!%p138_p2) }
   0x8   : > { %s1651_s22 = smov (!%p138_p2), 8   ;;  %1492 = vmatprep.mubr.msk.bf16.mxu1 (!%p138_p2), %vm1652_vm5, %v1646_v6  ;;  %1486 = vmatprep.mubr.msk.bf16.mxu0 (!%p138_p2), %vm1652_vm5, %v1646_v6  ;;  %s1653_s23 = smov (!%p138_p2), 10   ;;  %v1620_v31 = vld [vmem:[%s1919_s1 + $0x8] sm:$0xff] (!%p138_p2)   ;;  %v1621_v34 = vld [vmem:[%s1919_s1 + $0x18] sm:$0xff] (!%p138_p2)   ;;  %v1622_v36 = vld [vmem:[%s1919_s1 + $0x10] sm:$0xff] (!%p138_p2)  }
   0x9   : > { %v180_v4 = vand.u32 (!%p138_p2), 3, %v175_v2  ;;  %v208_v5 = vsub.s32 (!%p138_p2), 0, %v207_v3  ;;  %s1654_s24 = smov (!%p138_p2), 127   ;;  %s1655_s25 = smov (!%p138_p2), 126   ;;  %v1623_v38 = vld [vmem:[%s1919_s1 + $0x28] sm:$0xff] (!%p138_p2)   ;;  %v1624_v40 = vld [vmem:[%s1919_s1 + $0x20] sm:$0xff] (!%p138_p2)  }
   0xa   : > { %s1656_s28 = smov (!%p138_p2), 124   ;;  %s1657_s29 = smov (!%p138_p2), 123   ;;  %v1626_v42 = vld [vmem:[%s1919_s1 + $0x38] sm:$0xff] (!%p138_p2)   ;;  %v1625_v43 = vld [vmem:[%s1919_s1 + $0x30] sm:$0xff] (!%p138_p2)   ;;  %v1627_v45 = vld [vmem:[%s1919_s1 + $0x40] sm:$0xff] (!%p138_p2)  }
   0xb   : > { %vm188_vm1 = vcmp.ge.s32.totalorder (!%p138_p2), %v180_v4, 1  ;;  %vm189_vm2 = vcmp.le.s32.totalorder (!%p138_p2), %v180_v4, 2  ;;  %s1658_s30 = smov (!%p138_p2), 122   ;;  %s1659_s4 = smov (!%p138_p2), 120  }
   0xc   : > { %vm204_vm3 = vmpackc.low (!%p138_p2), %vm188_vm1, %vm188_vm1  ;;  %s1660_s5 = smov (!%p138_p2), 119   ;;  %s1661_s6 = smov (!%p138_p2), 118  }
   0xd   : > { %s1923_s13 = smov (!%p161_p3, %s1363_s13), 1  ;;  %v205_v10 = vsel %vm204_vm3, 65537, %v1645_v1  ;;  %vm320_vm4 = vmpackc.low %vm189_vm2, %vm189_vm2 }
   0xe   : > { %s1446_s14 = sshll.u32 %s1923_s13, 4  ;;  %v1707_v11 = vrot.slane %v205_v10, %v208_v5  ;;  %v321_v12 = vsel %vm320_vm4, 65537, %v1645_v1 }
   0xf   : > { %s165_s17 = scalar_lea.vmem %s1918_s0, %s1446_s14  ;;  %v325_v13 = vrot.slane %v321_v12, %v208_v5  ;;  %s170_s15 = scalar_lea.vmem %s1921_s3, %s1446_s14 }
  0x10   : > { %v1700_v7 = vld [vmem:[%s165_s17] sm:$0xff]  ;;  %v1702_v8 = vld [vmem:[%s165_s17 + $0x8] sm:$0xff]  ;;  %388 = vrot.lane.b32.xlu1 %v1707_v11, %s1648_s19  ;;  %vm210_vm8 = vcmp.ne.s16.totalorder %v1707_v11, 0 }
  0x11   : > { %v196_v9 = vpack.c.bf16 %v1702_v8, %v1700_v7 }
  0x13   : > { %198 = vrot.lane.b32.xlu0 %v196_v9, %s1647_s18 }
  0x14   : > { %507 = vrot.lane.b32.xlu1 %v325_v13, %s1650_s21 }
  0x17   : > { %326 = vrot.lane.b32.xlu0 %v325_v13, %s1649_s20 }
  0x18   : > { %688 = vrot.lane.b32.xlu1 %v325_v13, %s1653_s23 }
  0x1b   : > { %569 = vrot.lane.b32.xlu0 %v1707_v11, %s1651_s22 }
  0x82   : > { %v1716_v15 = vpop.permute.xlu1 %388 }
  0x83   : > { %vm390_vm9 = vcmp.ne.s16.totalorder %v1716_v15, 0 }
  0x85   : > { %v199_v14 = vpop.permute.xlu0 %198 }
  0x86   : > { %202 = vst.msk [vmem:[#allocation2] sm:$0xff] %vm201_vm6, %v199_v14  ;;  %v1725_v19 = vpop.permute.xlu1 %507 }
  0x87   : > { %vm509_vm11 = vcmp.ne.s16.totalorder %v1725_v19, 0  ;;  %v1407_v19 = vld [vmem:[%s1920_s2 + $0x18] sm:$0xff] }
  0x89   : > { %v1718_v16 = vpop.permute.xlu0 %326 }
  0x8a   : > { %vm328_vm7 = vcmp.ne.s16.totalorder %v1718_v16, 0  ;;  %v1744_v24 = vpop.permute.xlu1 %688 }
  0x8b   : > { %vm690_vm13 = vcmp.ne.s16.totalorder %v1744_v24, 0 }
  0x8d   : > { %v203_v17 = vld [vmem:[#allocation2] sm:$0xff]  ;;  %v1734_v22 = vpop.permute.xlu0 %569 }
  0x8e   : > { %v329_v18 = vsel %vm328_vm7, %v203_v17, 0  ;;  %223 = vrot.lane.b32.xlu0 %v203_v17, %s1654_s24  ;;  %v211_v20 = vsel %vm210_vm8, %v203_v17, 0  ;;  %v391_v23 = vsel %vm390_vm9, %v203_v17, 0  ;;  %vm571_vm12 = vcmp.ne.s16.totalorder %v1734_v22, 0 }
  0x8f   : > { %339 = vrot.lane.b32.xlu1 %v329_v18, %s1655_s25  ;;  %1491 = vmatpush3.bf16.msra.mxu1 %v211_v20  ;;  %v510_v25 = vsel %vm509_vm11, %v203_v17, 0  ;;  %v572_v26 = vsel %vm571_vm12, %v203_v17, 0  ;;  %v691_v27 = vsel %vm690_vm13, %v203_v17, 0 }
  0x90   : > { %1502 = vmatprep.subr.bf16.mxu1 %v1646_v6 }
  0x92   : > { %401 = vrot.lane.b32.xlu0 %v391_v23, %s1656_s28  ;;  %1493 = vmatmul.mubr.msk.bf16.vlgmr.msra.gmra.mrb[0].mxu1 %vm226_vm10, %v1619_v21 }
  0x93   : > { %458 = vrot.lane.b32.xlu1 %v203_v17, %s1657_s29  ;;  %1504 = vmatprep.mubr.msk.bf16.mxu1 %vm1652_vm5, %v1646_v6 }
  0x96   : > { %520 = vrot.lane.b32.xlu0 %v510_v25, %s1658_s30 }
  0x97   : > { %582 = vrot.lane.b32.xlu1 %v572_v26, %s1659_s4 }
  0x9a   : > { %639 = vrot.lane.b32.xlu0 %v203_v17, %s1660_s5 }
  0x9b   : > { %701 = vrot.lane.b32.xlu1 %v691_v27, %s1661_s6 }
  0x9e   : > { %752 = vperm.xlu0 %1617, %v194_v28  }
  0x9f   : > { %757 = vperm.xlu1 %1618, %v195_v29  }
 0x100   : > { %v224_v30 = vpop.permute.xlu0 %223 }
 0x101   : > { %1485 = vmatpush3.bf16.msra.mxu0 %v224_v30  ;;  %v340_v32 = vpop.permute.xlu1 %339 }
 0x102   : > { %1496 = vmatprep.subr.bf16.mxu0 %v1646_v6 }
 0x104   : > { %1487 = vmatmul.mubr.msk.bf16.vlgmr.msra.gmra.mrb[0].mxu0 %vm226_vm10, %v1620_v31  ;;  %v402_v33 = vpop.permute.xlu0 %401 }
 0x105   : > { %1497 = vmatpush3.bf16.msra.mxu0 %v340_v32  ;;  %1503 = vmatpush3.bf16.msra.mxu1 %v402_v33  ;;  %v459_v37 = vpop.permute.xlu1 %458 }
 0x106   : > { %1514 = vmatprep.subr.bf16.mxu1 %v1646_v6  ;;  %1498 = vmatprep.mubr.msk.bf16.mxu0 %vm1652_vm5, %v1646_v6 }
 0x107   : > { %1508 = vmatprep.subr.bf16.mxu0 %v1646_v6 }
 0x108   : > { %1505 = vmatmul.mubr.msk.bf16.vlgmr.msra.gmra.mrb[4].mxu1 %vm226_vm10, %v1621_v34  ;;  %v521_v35 = vpop.permute.xlu0 %520 }
 0x109   : > { %1515 = vmatpush3.bf16.msra.mxu1 %v521_v35  ;;  %1516 = vmatprep.mubr.msk.bf16.mxu1 %vm1652_vm5, %v1646_v6  ;;  %v583_v41 = vpop.permute.xlu1 %582 }
 0x10a   : > { %1526 = vmatprep.subr.bf16.mxu1 %v1646_v6 }
 0x10c   : > { %1499 = vmatmul.mubr.msk.bf16.vlgmr.msra.gmra.mrb[4].mxu0 %vm226_vm10, %v1622_v36  ;;  %v640_v39 = vpop.permute.xlu0 %639 }
 0x10d   : > { %1509 = vmatpush3.bf16.msra.mxu0 %v459_v37  ;;  %1510 = vmatprep.mubr.msk.bf16.mxu0 %vm1652_vm5, %v1646_v6  ;;  %v702_v44 = vpop.permute.xlu1 %701 }
 0x10e   : > { %1520 = vmatprep.subr.bf16.mxu0 %v1646_v6 }
 0x110   : > { %1517 = vmatmul.mubr.msk.bf16.vlgmr.msra.gmra.mrb[8].mxu1 %vm226_vm10, %v1623_v38 }
 0x111   : > { %1527 = vmatpush3.bf16.msra.mxu1 %v640_v39  ;;  %1528 = vmatprep.mubr.msk.bf16.mxu1 %vm1652_vm5, %v1646_v6 }
 0x112   : > { %1538 = vmatprep.subr.bf16.mxu1 %v1646_v6 }
 0x114   : > { %1511 = vmatmul.mubr.msk.bf16.vlgmr.msra.gmra.mrb[8].mxu0 %vm226_vm10, %v1624_v40 }
 0x115   : > { %1521 = vmatpush3.bf16.msra.mxu0 %v583_v41  ;;  %1522 = vmatprep.mubr.msk.bf16.mxu0 %vm1652_vm5, %v1646_v6 }
 0x116   : > { %1532 = vmatprep.subr.bf16.mxu0 %v1646_v6 }
 0x118   : > { %1529 = vmatmul.mubr.msk.bf16.vlgmr.msra.gmra.mrb[12].mxu1 %vm226_vm10, %v1626_v42 }
 0x119   : > { %1540 = vmatprep.mubr.msk.bf16.mxu1 %vm1652_vm5, %v1646_v6 }
 0x11c   : > { %1523 = vmatmul.mubr.msk.bf16.vlgmr.msra.gmra.mrb[12].mxu0 %vm226_vm10, %v1625_v43 }
 0x11d   : > { %1533 = vmatpush3.bf16.msra.mxu0 %v702_v44  ;;  %1534 = vmatprep.mubr.msk.bf16.mxu0 %vm1652_vm5, %v1646_v6  ;;  %v753_v38 = vpop.permute.xlu0 %752 }
 0x11e   : > { %1544 = vmatprep.subr.bf16.mxu0 %v1646_v6  ;;  %v758_v42 = vpop.permute.xlu1 %757 }
 0x124   : > { %1535 = vmatmul.mubr.msk.bf16.vlgmr.msra.gmra.mrb[16].mxu0 %vm226_vm10, %v1627_v45 }
 0x125   : > { %1546 = vmatprep.mubr.msk.bf16.mxu0 %vm1652_vm5, %v1646_v6 }
 0x165   : > { %v313_v46 = vpop.f32.mrb[0].mxu1 }
 0x166   : > { %v1494_v47 = vpop.f32.mrb[1].mxu1 }
 0x167   : > { %v316_v48 = vpop.f32.mrb[2].mxu1 }
 0x168   : > { %v1495_v49 = vpop.f32.mrb[3].mxu1 }
 0x1d7   : > { %v264_v50 = vpop.f32.mrb[0].mxu0 }
 0x1d8   : > { %v314_v51 = vadd.f32 %v313_v46, %v264_v50  ;;  %v1488_v52 = vpop.f32.mrb[1].mxu0 }
 0x1d9   : > { %v267_v53 = vpop.f32.mrb[2].mxu0 }
 0x1da   : > { %v317_v54 = vadd.f32 %v316_v48, %v267_v53  ;;  %v1489_v55 = vpop.f32.mrb[3].mxu0 }
 0x1db   : > { %v441_v56 = vpop.f32.mrb[4].mxu1 }
 0x1dc   : > { %v1506_v57 = vpop.f32.mrb[5].mxu1 }
 0x1dd   : > { %v444_v58 = vpop.f32.mrb[6].mxu1  ;;  %v1629_v57 = vld [vmem:[%s1919_s1 + $0x50] sm:$0xff]  }
 0x1de   : > { %v1507_v59 = vpop.f32.mrb[7].mxu1 }
 0x1df   : > { %v379_v60 = vpop.f32.mrb[4].mxu0  ;;  %v1630_v59 = vld [vmem:[%s1919_s1 + $0x60] sm:$0xff]  }
 0x1e0   : > { %v386_v61 = vadd.f32 %v379_v60, %v314_v51  ;;  %v1500_v62 = vpop.f32.mrb[5].mxu0 }
 0x1e1   : > { %v382_v63 = vpop.f32.mrb[6].mxu0 }
 0x1e2   : > { %v387_v0 = vadd.f32 %v382_v63, %v317_v54  ;;  %v448_v1 = vadd.f32 %v441_v56, %v386_v61  ;;  %v1501_v2 = vpop.f32.mrb[7].mxu0  ;;  %v1628_v54 = vld [vmem:[%s1919_s1 + $0x48] sm:$0xff]   ;;  %v1406_v56 = vld [vmem:[%s1920_s2 + $0x10] sm:$0xff]  ;;  %v1631_v61 = vld [vmem:[%s1919_s1 + $0x58] sm:$0xff]  }
 0x1e3   : > { %v560_v3 = vpop.f32.mrb[8].mxu1  ;;  %v1632_v63 = vld [vmem:[%s1919_s1 + $0x70] sm:$0xff]  }
 0x1e4   : > { %v449_v4 = vadd.f32 %v444_v58, %v387_v0  ;;  %v1518_v5 = vpop.f32.mrb[9].mxu1 }
 0x1e5   : > { %v563_v9 = vpop.f32.mrb[10].mxu1 }
 0x1e6   : > { %v1519_v10 = vpop.f32.mrb[11].mxu1 }
 0x1e7   : > { %v498_v12 = vpop.f32.mrb[8].mxu0 }
 0x1e8   : > { %v505_v13 = vadd.f32 %v498_v12, %v448_v1  ;;  %v1512_v14 = vpop.f32.mrb[9].mxu0  ;;  %v1633_v1 = vld [vmem:[%s1919_s1 + $0x68] sm:$0xff]  }
 0x1e9   : > { %v501_v17 = vpop.f32.mrb[10].mxu0 }
 0x1ea   : > { %v506_v18 = vadd.f32 %v501_v17, %v449_v4  ;;  %v567_v20 = vadd.f32 %v560_v3, %v505_v13  ;;  %v1513_v21 = vpop.f32.mrb[11].mxu0  ;;  %v1635_v3 = vld [vmem:[%s1919_s1 + $0x80] sm:$0xff]   ;;  %v1634_v4 = vld [vmem:[%s1919_s1 + $0x78] sm:$0xff]  }
 0x1eb   : > { %v679_v23 = vpop.f32.mrb[12].mxu1 }
 0x1ec   : > { %v568_v25 = vadd.f32 %v563_v9, %v506_v18  ;;  %v1530_v26 = vpop.f32.mrb[13].mxu1  ;;  %v1636_v9 = vld [vmem:[%s1919_s1 + $0x88] sm:$0xff]  }
 0x1ed   : > { %v682_v27 = vpop.f32.mrb[14].mxu1 }
 0x1ee   : > { %v1531_v28 = vpop.f32.mrb[15].mxu1 }
 0x1ef   : > { %v622_v29 = vpop.f32.mrb[12].mxu0 }
 0x1f0   : > { %v629_v30 = vadd.f32 %v622_v29, %v567_v20  ;;  %v1524_v31 = vpop.f32.mrb[13].mxu0 }
 0x1f1   : > { %v625_v32 = vpop.f32.mrb[14].mxu0 }
 0x1f2   : > { %v630_v33 = vadd.f32 %v625_v32, %v568_v25  ;;  %v686_v34 = vadd.f32 %v679_v23, %v629_v30  ;;  %v1525_v35 = vpop.f32.mrb[15].mxu0 }
 0x1f4   : > { %v687_v36 = vadd.f32 %v682_v27, %v630_v33 }
 0x1f7   : > { %v741_v37 = vpop.f32.mrb[16].mxu0 }
 0x1f8   : > { %v748_v39 = vadd.f32 %v741_v37, %v686_v34  ;;  %v1536_v40 = vpop.f32.mrb[17].mxu0 }
 0x1f9   : > { %v744_v41 = vpop.f32.mrb[18].mxu0 }
 0x1fa   : > { %v749_v43 = vadd.f32 %v744_v41, %v687_v36  ;;  %v760_v44 = vadd.f32 %v753_v38, %v748_v39  ;;  %v1537_v45 = vpop.f32.mrb[19].mxu0 }
 0x1fc   : > { %v761_v46 = vadd.f32 %v758_v42, %v749_v43  ;;  %v762_v47 = vmax.f32 %v760_v44, 0.0 }
 0x1fe   : > { %v763_v48 = vmax.f32 %v761_v46, 0.0 }
 0x200   : > { %v767_v49 = vpack.c.bf16 %v763_v48, %v762_v47 }
 0x202   : > { %769 = vrot.lane.b32.xlu1 %v767_v49, %s1647_s18 }
 0x274   : > { %v770_v50 = vpop.permute.xlu1 %769 }
 0x275   : > { %772 = vst.msk [vmem:[#allocation2] sm:$0xff] %vm201_vm6, %v770_v50 }
 0x27c   : > { %v773_v51 = vld [vmem:[#allocation2] sm:$0xff] }
 0x27d   : > { %787 = vrot.lane.b32.xlu0 %v773_v51, %s1654_s24  ;;  %v883_v52 = vsel %vm328_vm7, %v773_v51, 0  ;;  %v774_v53 = vsel %vm210_vm8, %v773_v51, 0  ;;  %v942_v55 = vsel %vm390_vm9, %v773_v51, 0  ;;  %v1058_v11 = vsel %vm509_vm11, %v773_v51, 0 }
 0x27e   : > { %893 = vrot.lane.b32.xlu1 %v883_v52, %s1655_s25  ;;  %1545 = vmatpush3.bf16.msra.mxu0 %v774_v53  ;;  %v1117_v16 = vsel %vm571_vm12, %v773_v51, 0  ;;  %v1233_v15 = vsel %vm690_vm13, %v773_v51, 0 }
 0x27f   : > { %1556 = vmatprep.subr.bf16.mxu0 %v1646_v6 }
 0x281   : > { %952 = vrot.lane.b32.xlu0 %v942_v55, %s1656_s28  ;;  %1547 = vmatmul.mubr.msk.bf16.vlgmr.msra.gmra.mrb[20].mxu0 %vm226_vm10, %v1628_v54 }
 0x282   : > { %1009 = vrot.lane.b32.xlu1 %v773_v51, %s1657_s29  ;;  %1558 = vmatprep.mubr.msk.bf16.mxu0 %vm1652_vm5, %v1646_v6 }
 0x285   : > { %1068 = vrot.lane.b32.xlu0 %v1058_v11, %s1658_s30 }
 0x286   : > { %1127 = vrot.lane.b32.xlu1 %v1117_v16, %s1659_s4 }
 0x289   : > { %1184 = vrot.lane.b32.xlu0 %v773_v51, %s1660_s5 }
 0x28a   : > { %1243 = vrot.lane.b32.xlu1 %v1233_v15, %s1661_s6 }
 0x28d   : > { %1294 = vperm.xlu0 %1617, %v1406_v56  }
 0x28e   : > { %1299 = vperm.xlu1 %1618, %v1407_v19  }
 0x2ef   : > { %v788_v22 = vpop.permute.xlu0 %787 }
 0x2f0   : > { %1539 = vmatpush3.bf16.msra.mxu1 %v788_v22  ;;  %v894_v24 = vpop.permute.xlu1 %893 }
 0x2f1   : > { %1550 = vmatprep.subr.bf16.mxu1 %v1646_v6 }
 0x2f3   : > { %1541 = vmatmul.mubr.msk.bf16.vlgmr.msra.gmra.mrb[16].mxu1 %vm226_vm10, %v1629_v57  ;;  %v953_v58 = vpop.permute.xlu0 %952 }
 0x2f4   : > { %1551 = vmatpush3.bf16.msra.mxu1 %v894_v24  ;;  %1557 = vmatpush3.bf16.msra.mxu0 %v953_v58  ;;  %v1010_v62 = vpop.permute.xlu1 %1009 }
 0x2f5   : > { %1568 = vmatprep.subr.bf16.mxu0 %v1646_v6  ;;  %1552 = vmatprep.mubr.msk.bf16.mxu1 %vm1652_vm5, %v1646_v6 }
 0x2f6   : > { %1562 = vmatprep.subr.bf16.mxu1 %v1646_v6 }
 0x2f7   : > { %v1069_v60 = vpop.permute.xlu0 %1068  ;;  %1559 = vmatmul.mubr.msk.bf16.vlgmr.msra.gmra.mrb[24].mxu0 %vm226_vm10, %v1630_v59 }
 0x2f8   : > { %1569 = vmatpush3.bf16.msra.mxu0 %v1069_v60  ;;  %1570 = vmatprep.mubr.msk.bf16.mxu0 %vm1652_vm5, %v1646_v6  ;;  %v1128_v2 = vpop.permute.xlu1 %1127 }
 0x2f9   : > { %1580 = vmatprep.subr.bf16.mxu0 %v1646_v6 }
 0x2fb   : > { %1553 = vmatmul.mubr.msk.bf16.vlgmr.msra.gmra.mrb[20].mxu1 %vm226_vm10, %v1631_v61  ;;  %v1185_v0 = vpop.permute.xlu0 %1184 }
 0x2fc   : > { %1563 = vmatpush3.bf16.msra.mxu1 %v1010_v62  ;;  %1564 = vmatprep.mubr.msk.bf16.mxu1 %vm1652_vm5, %v1646_v6  ;;  %v1244_v5 = vpop.permute.xlu1 %1243 }
 0x2fd   : > { %1574 = vmatprep.subr.bf16.mxu1 %v1646_v6 }
 0x2ff   : > { %1571 = vmatmul.mubr.msk.bf16.vlgmr.msra.gmra.mrb[28].mxu0 %vm226_vm10, %v1632_v63 }
 0x300   : > { %1581 = vmatpush3.bf16.msra.mxu0 %v1185_v0  ;;  %1582 = vmatprep.mubr.msk.bf16.mxu0 %vm1652_vm5, %v1646_v6 }
 0x303   : > { %1565 = vmatmul.mubr.msk.bf16.vlgmr.msra.gmra.mrb[24].mxu1 %vm226_vm10, %v1633_v1 }
 0x304   : > { %1575 = vmatpush3.bf16.msra.mxu1 %v1128_v2  ;;  %1576 = vmatprep.mubr.msk.bf16.mxu1 %vm1652_vm5, %v1646_v6 }
 0x305   : > { %1586 = vmatprep.subr.bf16.mxu1 %v1646_v6 }
 0x307   : > { %1583 = vmatmul.mubr.msk.bf16.vlgmr.msra.gmra.mrb[32].mxu0 %vm226_vm10, %v1635_v3 }
 0x30b   : > { %1577 = vmatmul.mubr.msk.bf16.vlgmr.msra.gmra.mrb[28].mxu1 %vm226_vm10, %v1634_v4 }
 0x30c   : > { %1587 = vmatpush3.bf16.msra.mxu1 %v1244_v5  ;;  %1588 = vmatprep.mubr.msk.bf16.mxu1 %vm1652_vm5, %v1646_v6  ;;  %v1295_v58 = vpop.permute.xlu0 %1294 }
 0x30d   : > { %v1300_v63 = vpop.permute.xlu1 %1299 }
 0x313   : > { %1589 = vmatmul.mubr.msk.bf16.vlgmr.msra.gmra.mrb[32].mxu1 %vm226_vm10, %v1636_v9 }
 0x354   : > { %v876_v10 = vpop.f32.mrb[20].mxu0 }
 0x355   : > { %v1548_v12 = vpop.f32.mrb[21].mxu0 }
 0x356   : > { %v879_v13 = vpop.f32.mrb[22].mxu0 }
 0x357   : > { %v1549_v14 = vpop.f32.mrb[23].mxu0 }
 0x3c6   : > { %v827_v17 = vpop.f32.mrb[16].mxu1 }
 0x3c7   : > { %v1542_v18 = vpop.f32.mrb[17].mxu1  ;;  %v877_v20 = vadd.f32 %v876_v10, %v827_v17 }
 0x3c8   : > { %v830_v21 = vpop.f32.mrb[18].mxu1 }
 0x3c9   : > { %v1543_v23 = vpop.f32.mrb[19].mxu1  ;;  %v880_v25 = vadd.f32 %v879_v13, %v830_v21 }
 0x3ca   : > { %v992_v26 = vpop.f32.mrb[24].mxu0 }
 0x3cb   : > { %v1560_v27 = vpop.f32.mrb[25].mxu0 }
 0x3cc   : > { %v995_v28 = vpop.f32.mrb[26].mxu0 }
 0x3cd   : > { %v1561_v6 = vpop.f32.mrb[27].mxu0 }
 0x3ce   : > { %v933_v29 = vpop.f32.mrb[20].mxu1 }
 0x3cf   : > { %v940_v30 = vadd.f32 %v933_v29, %v877_v20  ;;  %v1554_v31 = vpop.f32.mrb[21].mxu1 }
 0x3d0   : > { %v936_v32 = vpop.f32.mrb[22].mxu1 }
 0x3d1   : > { %v941_v33 = vadd.f32 %v936_v32, %v880_v25  ;;  %v999_v34 = vadd.f32 %v992_v26, %v940_v30  ;;  %v1555_v35 = vpop.f32.mrb[23].mxu1 }
 0x3d2   : > { %v1108_v36 = vpop.f32.mrb[28].mxu0 }
 0x3d3   : > { %v1000_v37 = vadd.f32 %v995_v28, %v941_v33  ;;  %v1572_v38 = vpop.f32.mrb[29].mxu0 }
 0x3d4   : > { %v1111_v39 = vpop.f32.mrb[30].mxu0 }
 0x3d5   : > { %v1573_v40 = vpop.f32.mrb[31].mxu0 }
 0x3d6   : > { %v1049_v41 = vpop.f32.mrb[24].mxu1 }
 0x3d7   : > { %v1056_v42 = vadd.f32 %v1049_v41, %v999_v34  ;;  %v1566_v43 = vpop.f32.mrb[25].mxu1 }
 0x3d8   : > { %v1052_v44 = vpop.f32.mrb[26].mxu1 }
 0x3d9   : > { %v1057_v45 = vadd.f32 %v1052_v44, %v1000_v37  ;;  %v1115_v46 = vadd.f32 %v1108_v36, %v1056_v42  ;;  %v1567_v47 = vpop.f32.mrb[27].mxu1 }
 0x3da   : > { %v1224_v48 = vpop.f32.mrb[32].mxu0 }
 0x3db   : > { %v1116_v49 = vadd.f32 %v1111_v39, %v1057_v45  ;;  %v1584_v50 = vpop.f32.mrb[33].mxu0 }
 0x3dc   : > { %v1227_v51 = vpop.f32.mrb[34].mxu0 }
 0x3dd   : > { %v1585_v52 = vpop.f32.mrb[35].mxu0 }
 0x3de   : > { %v1167_v53 = vpop.f32.mrb[28].mxu1 }
 0x3df   : > { %v1174_v54 = vadd.f32 %v1167_v53, %v1115_v46  ;;  %v1578_v55 = vpop.f32.mrb[29].mxu1 }
 0x3e0   : > { %v1170_v11 = vpop.f32.mrb[30].mxu1 }
 0x3e1   : > { %v1175_v16 = vadd.f32 %v1170_v11, %v1116_v49  ;;  %v1231_v15 = vadd.f32 %v1224_v48, %v1174_v54  ;;  %v1579_v56 = vpop.f32.mrb[31].mxu1 }
 0x3e3   : > { %v1232_v19 = vadd.f32 %v1227_v51, %v1175_v16 }
 0x3e6   : > { %v1283_v22 = vpop.f32.mrb[32].mxu1 }
 0x3e7   : > { %v1290_v57 = vadd.f32 %v1283_v22, %v1231_v15  ;;  %v1590_v24 = vpop.f32.mrb[33].mxu1 }
 0x3e8   : > { %v1286_v59 = vpop.f32.mrb[34].mxu1 }
 0x3e9   : > { %v1302_v60 = vadd.f32 %v1295_v58, %v1290_v57  ;;  %v1291_v61 = vadd.f32 %v1286_v59, %v1232_v19  ;;  %v1591_v62 = vpop.f32.mrb[35].mxu1 }
 0x3eb   : > { %v1304_v0 = vadd.f32 %v1302_v60, %v1700_v7  ;;  %v1303_v1 = vadd.f32 %v1300_v63, %v1291_v61 }
 0x3ed   : > { %1306 = vst.msk [vmem:[%s170_s15] sm:$0xff] %vm226_vm10, %v1304_v0  ;;  %v1305_v2 = vadd.f32 %v1303_v1, %v1702_v8 }
 0x3ef   : > { %1307 = vst.msk [vmem:[%s170_s15 + $0x8] sm:$0xff] %vm226_vm10, %v1305_v2 }
 0x3f0 PF: > { %s13_s12 = sadd.s32 1, %s1643_s12  }
 0x3f1   : > { %p10_p4 = scmp.ge.s32.totalorder %s13_s12, 4  }
 0x3f3   :  { %12 = sbr.rel (!%p10_p4) target bundleno = 1 (0x1), region = 80 }

// kernel: hourglass_pallas.7
= control target key start
LH: loop header
LB: loop body
LE: loop exit
PB: predicated region body
PF: predicated region fallthrough
CT: control target
= control target key end

     0   :  { %s1922_s12 = smov 0   ;;  %s2328_s0 = inlined_call_operand.vmem [shape: f32[2,16,256], index: 0, kind: input, shape index: {}]   ;;  %s2329_s1 = inlined_call_operand.vmem [shape: bf16[18,16,16], index: 1, kind: input, shape index: {}]   ;;  %s2330_s2 = inlined_call_operand.vmem [shape: f32[2,16,1], index: 2, kind: input, shape index: {}]   ;;  %s2331_s3 = inlined_call_operand.vmem [shape: f32[2,16,256], index: 3, kind: output, shape index: {}]  }
   0x1 LB: > { %s1685_s13 = sadd.s32 4294967295, %s1885_s12   ;;  %p1689_p0 = scmp.ge.s32.totalorder %s1885_s12, 1  ;;  %s1885_s12 = sphi %s1922_s12, %s13_s12  }
   0x2   : > { %p137_p1 = scmp.lt.s32.totalorder %s1885_s12, 3 }
   0x4   : > { %p138_p2 = pnand %p1689_p0, %p137_p1 }
   0x5   : > { %p161_p3 = scmp.lt.s32.totalorder (!%p138_p2), %s1685_s13, 1  ;;  %v174_v0 = vlaneseq (!%p138_p2)  ;;  %vm207_vm0 = vcmask (!%p138_p2), 277504   ;;  %v1887_v1 = vmov (!%p138_p2), 0   ;;  %s1888_s18 = smov (!%p138_p2), 17   ;;  %vm228_vm7 = vcmask (!%p138_p2), 1047688   ;;  %v1861_v50 = vld [vmem:[%s2329_s1 + $0x8] sm:$0xff] (!%p138_p2)  }
   0x6   : > { %141 = sbr.rel (%p138_p2) target bundleno = 1195 (0x4ab), region = 32  ;;  %205 = vst [vmem:[#allocation2] sm:$0xff] (!%p138_p2), %v1887_v1  ;;  %208 = vst.msk [vmem:[#allocation2 + $0x10] sm:$0xff] (!%p138_p2), %vm207_vm0, %v1887_v1  ;;  %310 = vmatprep.mubr.bf16.mxu0 (!%p138_p2), %v1887_v1  ;;  %1859 = vset.pattern.permute.xlu0 (!%p138_p2), %v1887_v1  ;;  %s1889_s19 = smov (!%p138_p2), 2   ;;  %vm223_vm8 = vcmask (!%p138_p2), 138240   ;;  %vm386_vm9 = vcmask (!%p138_p2), 15360  }
   0x7   : > { %v175_v2 = vand.u32 (!%p138_p2), 127, %v174_v0  ;;  %v238_v3 = vshrl.u32 (!%p138_p2), %v174_v0, 7  ;;  %1860 = vset.pattern.permute.xlu1 (!%p138_p2), %v1887_v1  ;;  %1040 = vmatprep.mubr.bf16.mxu1 (!%p138_p2), %v1887_v1  ;;  %s1890_s20 = smov (!%p138_p2), 16   ;;  %s1891_s21 = smov (!%p138_p2), 18   ;;  %vm274_vm11 = vcmask (!%p138_p2), 130048   ;;  %v1862_v62 = vld [vmem:[%s2329_s1] sm:$0xff] (!%p138_p2)  }
   0x8   : > { %s1892_s22 = smov (!%p138_p2), 127   ;;  %s1893_s23 = smov (!%p138_p2), 32  }
   0x9   : > { %v176_v4 = vadd.s32 (!%p138_p2), 128, %v175_v2  ;;  %v181_v5 = vand.u32 (!%p138_p2), 15, %v175_v2  ;;  %v239_v9 = vsub.s32 (!%p138_p2), 0, %v238_v3  ;;  %v243_v14 = vsub.s32 (!%p138_p2), 4, %v238_v3  ;;  %s1894_s24 = smov (!%p138_p2), 126   ;;  %s1895_s25 = smov (!%p138_p2), 34  }
   0xa   : > { %s1896_s26 = smov (!%p138_p2), 112   ;;  %s1897_s27 = smov (!%p138_p2), 111  }
   0xb   : > { %v188_v8 = vand.u32 (!%p138_p2), 15, %v176_v4  ;;  %vm203_vm1 = vcmp.le.s32.totalorder (!%p138_p2), %v181_v5, 14  ;;  %vm201_vm2 = vcmp.ge.s32.totalorder (!%p138_p2), %v181_v5, 1  ;;  %s1898_s28 = smov (!%p138_p2), 110   ;;  %s1899_s4 = smov (!%p138_p2), 96  }
   0xc   : > { %s1900_s5 = smov (!%p138_p2), 95   ;;  %s1901_s8 = smov (!%p138_p2), 94  }
   0xd   : > { %s2362_s13 = smov (!%p161_p3, %s1685_s13), 1  ;;  %vm204_vm3 = vcmp.le.s32.totalorder %v188_v8, 14  ;;  %vm202_vm4 = vcmp.ge.s32.totalorder %v188_v8, 1 }
   0xe   : > { %s1770_s14 = sshll.u32 %s2362_s13, 5  ;;  %vm372_vm5 = vmpackc.low %vm204_vm3, %vm203_vm1  ;;  %vm623_vm1 = vcmask 146432  }
   0xf   : > { %s165_s17 = scalar_lea.vmem %s2328_s0, %s1770_s14  ;;  %v373_v15 = vsel %vm372_vm5, 65537, %v1887_v1  ;;  %vm235_vm6 = vmpackc.low %vm202_vm4, %vm201_vm2 }
  0x10   : > { %v1945_v6 = vld [vmem:[%s165_s17] sm:$0xff]  ;;  %v1947_v7 = vld [vmem:[%s165_s17 + $0x10] sm:$0xff]  ;;  %v1949_v10 = vld [vmem:[%s165_s17 + $0x8] sm:$0xff]  ;;  %v377_v16 = vrot.slane %v373_v15, %v239_v9  ;;  %v236_v17 = vsel %vm235_vm6, 65537, %v1887_v1  ;;  %v381_v18 = vrot.slane %v373_v15, %v243_v14  ;;  %vm2334_vm6 = vcmask 1039360  }
  0x11   : > { %v215_v11 = vpack.c.bf16 %v1947_v7, %v1945_v6  ;;  %v1953_v12 = vld [vmem:[%s165_s17 + $0x18] sm:$0xff]  ;;  %v1961_v19 = vrot.slane %v236_v17, %v239_v9  ;;  %v1964_v20 = vrot.slane %v236_v17, %v243_v14  ;;  %v1863_v14 = vld [vmem:[%s2329_s1 + $0x10] sm:$0xff]   ;;  %v213_v15 = vld [vmem:[%s2330_s2] sm:$0xff] }
  0x12   : > { %v216_v13 = vpack.c.bf16 %v1953_v12, %v1949_v10  ;;  %382 = vrot.lane.b32.xlu1 %v377_v16, %s1889_s19 }
  0x13   : > { %219 = vrot.lane.b32.xlu0 %v215_v11, %s1888_s18 }
  0x16   : > { %384 = vrot.lane.b32.xlu1 %v381_v18, %s1889_s19 }
  0x17   : > { %221 = vrot.lane.b32.xlu0 %v216_v13, %s1888_s18 }
  0x1a   : > { %468 = vrot.lane.b32.xlu1 %v1964_v20, %s1890_s20 }
  0x1b   : > { %466 = vrot.lane.b32.xlu0 %v1961_v19, %s1890_s20 }
  0x1e   : > { %621 = vrot.lane.b32.xlu1 %v381_v18, %s1891_s21 }
  0x1f   : > { %619 = vrot.lane.b32.xlu0 %v377_v16, %s1891_s21 }
  0x84   : > { %v1968_v22 = vpop.permute.xlu1 %382 }
  0x85   : > { %v220_v21 = vpop.permute.xlu0 %219  ;;  %vm388_vm13 = vcmp.ne.s16.totalorder %v1968_v22, 0 }
  0x86   : > { %229 = vst.msk [vmem:[#allocation2] sm:$0xff] %vm228_vm7, %v220_v21 }
  0x88   : > { %v1978_v26 = vpop.permute.xlu1 %384 }
  0x89   : > { %v222_v23 = vpop.permute.xlu0 %221  ;;  %v1988_v28 = vsel %vm386_vm9, %v1968_v22, %v1978_v26  ;;  %vm390_vm10 = vcmp.ne.s16.totalorder %v1978_v26, 0  ;;  %vm2337_vm9 = vcmp.ne.s16.totalorder %v1964_v20, 0 }
  0x8a   : > { %v1971_v24 = vsel %vm223_vm8, %v220_v21, %v222_v23  ;;  %232 = vst.msk [vmem:[#allocation2 + $0x10] sm:$0xff] %vm223_vm8, %v222_v23  ;;  %vm389_vm12 = vcmp.ne.s16.totalorder %v1988_v28, 0 }
  0x8b   : > { %265 = vrot.lane.b32.xlu0 %v1971_v24, %s1892_s22  ;;  %v392_v33 = vsel %vm389_vm12, %v1971_v24, 0 }
  0x8c   : > { %v1992_v29 = vpop.permute.xlu1 %468 }
  0x8d   : > { %v1976_v25 = vld [vmem:[#allocation2] sm:$0xff]  ;;  %v1999_v31 = vpop.permute.xlu0 %466  ;;  %vm474_vm2 = vcmp.ne.s16.totalorder %v1992_v29, 0 }
  0x8e   : > { %v2005_v32 = vsel %vm274_vm11, %v1999_v31, %v1992_v29  ;;  %v391_v34 = vsel %vm388_vm13, %v1976_v25, 0  ;;  %vm472_vm15 = vcmp.ne.s16.totalorder %v1999_v31, 0 }
  0x8f   : > { %263 = vrot.lane.b32.xlu0 %v1976_v25, %s1892_s22  ;;  %vm473_vm14 = vcmp.ne.s16.totalorder %v2005_v32, 0  ;;  %v475_v37 = vsel %vm472_vm15, %v1976_v25, 0 }
  0x90   : > { %v476_v35 = vsel %vm473_vm14, %v1971_v24, 0  ;;  %v2022_v36 = vpop.permute.xlu1 %621 }
  0x91   : > { %v1982_v27 = vld [vmem:[#allocation2 + $0x10] sm:$0xff]  ;;  %v2028_v38 = vpop.permute.xlu0 %619  ;;  %vm2333_vm5 = vcmp.ne.s16.totalorder %v2022_v36, 0 }
  0x92   : > { %267 = vrot.lane.b32.xlu1 %v1982_v27, %s1892_s22  ;;  %v393_v30 = vsel %vm390_vm10, %v1982_v27, 0  ;;  %v2033_v39 = vsel %vm623_vm1, %v2028_v38, %v2022_v36  ;;  %v477_v40 = vsel %vm474_vm2, %v1982_v27, 0  ;;  %vm2332_vm4 = vcmp.ne.s16.totalorder %v2028_v38, 0 }
  0x93   : > { %705 = vrot.lane.b32.xlu0 %v1964_v20, %s1893_s23  ;;  %vm626_vm3 = vcmp.ne.s16.totalorder %v2033_v39, 0  ;;  %v628_v42 = vsel %vm2332_vm4, %v1976_v25, 0  ;;  %v630_v43 = vsel %vm2333_vm5, %v1982_v27, 0  ;;  %vm707_vm1 = vcmask 261120  }
  0x94   : > { %v629_v41 = vsel %vm626_vm3, %v1971_v24, 0  ;;  %vm2336_vm5 = vcmp.ne.s16.totalorder %v1961_v19, 0 }
  0x95   : > { %v247_v54 = vsel %vm2336_vm5, %v1976_v25, 0 }
  0x96   : > { %703 = vrot.lane.b32.xlu1 %v1961_v19, %s1893_s23 }
  0x97   : > { %409 = vrot.lane.b32.xlu0 %v393_v30, %s1894_s24 }
  0x9a   : > { %407 = vrot.lane.b32.xlu1 %v392_v33, %s1894_s24 }
  0x9b   : > { %856 = vrot.lane.b32.xlu0 %v377_v16, %s1895_s25  ;;  %v214_v16 = vld [vmem:[%s2330_s2 + $0x8] sm:$0xff] }
  0x9e   : > { %405 = vrot.lane.b32.xlu1 %v391_v34, %s1894_s24 }
  0x9f   : > { %491 = vrot.lane.b32.xlu0 %v476_v35, %s1896_s26  ;;  %v1865_v35 = vld [vmem:[%s2329_s1 + $0x20] sm:$0xff]  }
  0xa2   : > { %858 = vrot.lane.b32.xlu1 %v381_v18, %s1895_s25 }
  0xa3   : > { %489 = vrot.lane.b32.xlu0 %v475_v37, %s1896_s26 }
  0xa6   : > { %493 = vrot.lane.b32.xlu1 %v477_v40, %s1896_s26 }
  0xa7   : > { %562 = vrot.lane.b32.xlu0 %v1982_v27, %s1897_s27 }
  0xaa   : > { %560 = vrot.lane.b32.xlu1 %v1971_v24, %s1897_s27 }
  0xab   : > { %644 = vrot.lane.b32.xlu0 %v629_v41, %s1898_s28  ;;  %v1866_v41 = vld [vmem:[%s2329_s1 + $0x28] sm:$0xff]  }
  0xae   : > { %558 = vrot.lane.b32.xlu1 %v1976_v25, %s1897_s27 }
  0xaf   : > { %642 = vrot.lane.b32.xlu0 %v628_v42, %s1898_s28 }
  0xb2   : > { %646 = vrot.lane.b32.xlu1 %v630_v43, %s1898_s28 }
  0xfd   : > { %v266_v44 = vpop.permute.xlu0 %265 }
 0x101   : > { %v264_v45 = vpop.permute.xlu0 %263 }
 0x102   : > { %v270_v49 = vsel %vm2334_vm6, %v264_v45, %v266_v44 }
 0x104   : > { %v268_v46 = vpop.permute.xlu1 %267 }
 0x105   : > { %v271_v47 = vsel %vm2334_vm6, %v266_v44, %v268_v46  ;;  %v2062_v48 = vpop.permute.xlu0 %705 }
 0x106   : > { %278 = vmatprep.subr.bf16.mxu0 %v271_v47  ;;  %vm2335_vm4 = vcmp.ne.s16.totalorder %v2062_v48, 0 }
 0x107   : > { %279 = vmatpush1.bf16.msra.mxu0 %v270_v49  ;;  %v714_v51 = vsel %vm2335_vm4, %v1982_v27, 0  ;;  %vm2338_vm4 = vcmask 1031168   ;;  %v1867_v49 = vld [vmem:[%s2329_s1 + $0x30] sm:$0xff]  }
 0x108   : > { %v2073_v52 = vpop.permute.xlu1 %703  ;;  %1699 = vmatprep.subr.msk.bf16.mxu0 %vm2337_vm9, %v1971_v24  ;;  %730 = vrot.lane.b32.xlu0 %v714_v51, %s1899_s4 }
 0x109   : > { %v2081_v53 = vsel %vm707_vm1, %v2073_v52, %v2062_v48  ;;  %v410_v55 = vpop.permute.xlu0 %409  ;;  %vm709_vm1 = vcmp.ne.s16.totalorder %v2073_v52, 0  ;;  %v1729_v52 = vld [vmem:[%s2330_s2 + $0x10] sm:$0xff] }
 0x10a   : > { %vm710_vm6 = vcmp.ne.s16.totalorder %v2081_v53, 0  ;;  %1697 = vmatmul.mubr.msk.bf16.vlgmr.msra.gmra.mrb[0].mxu0 %vm274_vm11, %v1861_v50  ;;  %v712_v59 = vsel %vm709_vm1, %v1976_v25, 0 }
 0x10b   : > { %330 = vmatpush1.bf16.msra.mxu0 %v247_v54  ;;  %v713_v56 = vsel %vm710_vm6, %v1971_v24, 0  ;;  %361 = vmatprep.mubr.bf16.mxu0 %v1887_v1 }
 0x10c   : > { %v408_v57 = vpop.permute.xlu1 %407  ;;  %728 = vrot.lane.b32.xlu1 %v713_v56, %s1899_s4  ;;  %797 = vrot.lane.b32.xlu0 %v1971_v24, %s1900_s5 }
 0x10d   : > { %v413_v58 = vsel %vm2338_vm4, %v408_v57, %v410_v55  ;;  %v2101_v61 = vpop.permute.xlu0 %856 }
 0x10e   : > { %419 = vmatprep.subr.bf16.mxu0 %v413_v58 }
 0x110   : > { %v406_v60 = vpop.permute.xlu1 %405  ;;  %726 = vrot.lane.b32.xlu1 %v712_v59, %s1899_s4  ;;  %795 = vrot.lane.b32.xlu0 %v1976_v25, %s1900_s5  ;;  %v1868_v59 = vld [vmem:[%s2329_s1 + $0x38] sm:$0xff]  }
 0x111   : > { %v412_v2 = vsel %vm2338_vm4, %v406_v60, %v408_v57  ;;  %v492_v3 = vpop.permute.xlu0 %491  ;;  %vm2343_vm4 = vcmask 916480  }
 0x114   : > { %v2108_v63 = vpop.permute.xlu1 %858  ;;  %799 = vrot.lane.b32.xlu1 %v1982_v27, %s1900_s5 }
 0x115   : > { %vm864_vm5 = vcmp.ne.s16.totalorder %v2108_v63, 0  ;;  %v2116_v0 = vsel %vm207_vm0, %v2101_v61, %v2108_v63  ;;  %vm2340_vm0 = vcmp.ne.s16.totalorder %v2101_v61, 0  ;;  %v490_v13 = vpop.permute.xlu0 %489  ;;  %v1730_v63 = vld [vmem:[%s2330_s2 + $0x18] sm:$0xff] }
 0x116   : > { %vm2339_vm9 = vcmp.ne.s16.totalorder %v2116_v0, 0  ;;  %1700 = vmatmul.mubr.msk.bf16.vlgmr.msra.gmra.mrb[0].mxu0 %vm274_vm11, %v1862_v62  ;;  %v867_v4 = vsel %vm864_vm5, %v1982_v27, 0  ;;  %v865_v11 = vsel %vm2340_vm0, %v1976_v25, 0  ;;  %v496_v18 = vsel %vm2343_vm4, %v490_v13, %v492_v3  ;;  %v1864_v25 = vld [vmem:[%s2329_s1 + $0x18] sm:$0xff]  }
 0x117   : > { %420 = vmatpush1.bf16.msra.mxu0 %v412_v2  ;;  %883 = vrot.lane.b32.xlu0 %v867_v4, %s1901_s8  ;;  %v866_v5 = vsel %vm2339_vm9, %v1971_v24, 0  ;;  %vm2341_vm9 = vcmask 908288   ;;  %vm2342_vm0 = vcmask 900096   ;;  %v1869_v2 = vld [vmem:[%s2329_s1 + $0x40] sm:$0xff]  }
 0x118   : > { %v494_v8 = vpop.permute.xlu1 %493  ;;  %881 = vrot.lane.b32.xlu1 %v866_v5, %s1901_s8  ;;  %451 = vmatprep.mubr.bf16.mxu0 %v1887_v1 }
 0x119   : > { %v497_v9 = vsel %vm2343_vm4, %v492_v3, %v494_v8  ;;  %v563_v21 = vpop.permute.xlu0 %562  ;;  %vm885_vm4 = vcmask 769024  }
 0x11a   : > { %503 = vmatprep.subr.bf16.mxu0 %v497_v9 }
 0x11b   : > { %942 = vperm.xlu0 %1859, %v213_v15  }
 0x11c   : > { %879 = vrot.lane.b32.xlu1 %v865_v11, %s1901_s8  ;;  %v561_v17 = vpop.permute.xlu1 %560 }
 0x11d   : > { %v566_v23 = vsel %vm2341_vm9, %v561_v17, %v563_v21  ;;  %v645_v33 = vpop.permute.xlu0 %644 }
 0x120   : > { %947 = vperm.xlu1 %1860, %v214_v16   ;;  %v559_v24 = vpop.permute.xlu1 %558 }
 0x121   : > { %v565_v30 = vsel %vm2341_vm9, %v559_v24, %v561_v17  ;;  %v643_v37 = vpop.permute.xlu0 %642  ;;  %vm732_vm9 = vcmask 785408  }
 0x122   : > { %1704 = vmatmul.mubr.msk.bf16.vlgmr.msra.gmra.mrb[0].mxu0 %vm274_vm11, %v1863_v14  ;;  %v649_v40 = vsel %vm2342_vm0, %v643_v37, %v645_v33 }
 0x123   : > { %504 = vmatpush1.bf16.msra.mxu0 %v496_v18  ;;  %535 = vmatprep.mubr.bf16.mxu0 %v1887_v1 }
 0x124   : > { %572 = vmatprep.subr.bf16.mxu0 %v566_v23  ;;  %v647_v27 = vpop.permute.xlu1 %646 }
 0x125   : > { %v650_v34 = vsel %vm2342_vm0, %v645_v33, %v647_v27  ;;  %vm801_vm0 = vcmask 777216  }
 0x12e   : > { %1708 = vmatmul.mubr.msk.bf16.vlgmr.msra.gmra.mrb[0].mxu0 %vm274_vm11, %v1864_v25 }
 0x12f   : > { %573 = vmatpush1.bf16.msra.mxu0 %v565_v30  ;;  %604 = vmatprep.mubr.bf16.mxu0 %v1887_v1 }
 0x130   : > { %656 = vmatprep.subr.bf16.mxu0 %v650_v34 }
 0x13a   : > { %1712 = vmatmul.mubr.msk.bf16.vlgmr.msra.gmra.mrb[0].mxu0 %vm274_vm11, %v1865_v35 }
 0x13b   : > { %657 = vmatpush1.bf16.msra.mxu0 %v649_v40  ;;  %688 = vmatprep.mubr.bf16.mxu0 %v1887_v1 }
 0x146   : > { %1716 = vmatmul.mubr.msk.bf16.vlgmr.msra.gmra.mrb[0].mxu0 %vm274_vm11, %v1866_v41 }
 0x147   : > { %772 = vmatprep.mubr.bf16.mxu0 %v1887_v1 }
 0x17a   : > { %v731_v42 = vpop.permute.xlu0 %730 }
 0x17e   : > { %v729_v43 = vpop.permute.xlu1 %728  ;;  %v798_v45 = vpop.permute.xlu0 %797 }
 0x17f   : > { %v734_v44 = vsel %vm732_vm9, %v729_v43, %v731_v42 }
 0x180   : > { %740 = vmatprep.subr.bf16.mxu0 %v734_v44 }
 0x182   : > { %v727_v46 = vpop.permute.xlu1 %726  ;;  %v796_v50 = vpop.permute.xlu0 %795 }
 0x183   : > { %v733_v47 = vsel %vm732_vm9, %v727_v46, %v729_v43  ;;  %v802_v55 = vsel %vm801_vm0, %v796_v50, %v798_v45 }
 0x184   : > { %741 = vmatpush1.bf16.msra.mxu0 %v733_v47 }
 0x186   : > { %v800_v51 = vpop.permute.xlu1 %799 }
 0x187   : > { %1720 = vmatmul.mubr.msk.bf16.vlgmr.msra.gmra.mrb[0].mxu0 %vm274_vm11, %v1867_v49  ;;  %v803_v54 = vsel %vm801_vm0, %v798_v45, %v800_v51 }
 0x188   : > { %809 = vmatprep.subr.bf16.mxu0 %v803_v54  ;;  %841 = vmatprep.mubr.bf16.mxu0 %v1887_v1 }
 0x189   : > { %810 = vmatpush1.bf16.msra.mxu0 %v802_v55  ;;  %v884_v56 = vpop.permute.xlu0 %883  ;;  %v1871_v55 = vld [vmem:[%s2329_s1 + $0x48] sm:$0xff]  }
 0x18a   : > { %v882_v57 = vpop.permute.xlu1 %881 }
 0x18b   : > { %v887_v58 = vsel %vm885_vm4, %v882_v57, %v884_v56 }
 0x18c   : > { %893 = vmatprep.subr.bf16.mxu0 %v887_v58 }
 0x18e   : > { %v880_v60 = vpop.permute.xlu1 %879 }
 0x18f   : > { %v886_v62 = vsel %vm885_vm4, %v880_v60, %v882_v57 }
 0x193   : > { %1724 = vmatmul.mubr.msk.bf16.vlgmr.msra.gmra.mrb[0].mxu0 %vm274_vm11, %v1868_v59  ;;  %v1872_v59 = vld [vmem:[%s2329_s1 + $0x58] sm:$0xff]  }
 0x194   : > { %894 = vmatpush1.bf16.msra.mxu0 %v886_v62  ;;  %925 = vmatprep.mubr.bf16.mxu0 %v1887_v1 }
 0x19a   : > { %v943_v3 = vpop.permute.xlu0 %942 }
 0x19f   : > { %1728 = vmatmul.mubr.msk.bf16.vlgmr.msra.gmra.mrb[0].mxu0 %vm274_vm11, %v1869_v2  ;;  %v948_v5 = vpop.permute.xlu1 %947 }
 0x272   : > { %v927_v4 = vpop.f32.mrb[0].mxu0 }
 0x273   : > { %v950_v8 = vadd.f32 %v943_v3, %v927_v4  ;;  %v929_v9 = vpop.f32.mrb[1].mxu0 }
 0x274   : > { %v951_v11 = vadd.f32 %v943_v3, %v929_v9  ;;  %v931_v13 = vpop.f32.mrb[2].mxu0 }
 0x275   : > { %v952_v14 = vadd.f32 %v948_v5, %v931_v13  ;;  %v933_v15 = vpop.f32.mrb[3].mxu0  ;;  %v954_v17 = vmax.f32 %v950_v8, 0.0 }
 0x276   : > { %v953_v16 = vadd.f32 %v948_v5, %v933_v15  ;;  %v955_v21 = vmax.f32 %v951_v11, 0.0  ;;  %v1873_v5 = vld [vmem:[%s2329_s1 + $0x60] sm:$0xff]   ;;  %v1874_v15 = vld [vmem:[%s2329_s1 + $0x68] sm:$0xff]  }
 0x277   : > { %v956_v18 = vmax.f32 %v952_v14, 0.0 }
 0x278   : > { %v957_v23 = vmax.f32 %v953_v16, 0.0 }
 0x279   : > { %v961_v24 = vpack.c.bf16 %v956_v18, %v954_v17 }
 0x27a   : > { %v962_v25 = vpack.c.bf16 %v957_v23, %v955_v21 }
 0x27b   : > { %965 = vrot.lane.b32.xlu1 %v961_v24, %s1888_s18  ;;  %v1875_v24 = vld [vmem:[%s2329_s1 + $0x70] sm:$0xff]  }
 0x27c   : > { %967 = vrot.lane.b32.xlu0 %v962_v25, %s1888_s18  ;;  %s170_s18 = scalar_lea.vmem %s2331_s3, %s1770_s14 }
 0x2ed   : > { %v966_v27 = vpop.permute.xlu1 %965 }
 0x2ee   : > { %973 = vst.msk [vmem:[#allocation2] sm:$0xff] %vm228_vm7, %v966_v27  ;;  %v968_v30 = vpop.permute.xlu0 %967  ;;  %vm2344_vm7 = vcmp.ne.s16.totalorder %v2028_v38, 0 }
 0x2ef   : > { %v969_v33 = vsel %vm223_vm8, %v966_v27, %v968_v30  ;;  %975 = vst.msk [vmem:[#allocation2 + $0x10] sm:$0xff] %vm223_vm8, %v968_v30  ;;  %vm2345_vm8 = vcmp.ne.s16.totalorder %v2022_v36, 0 }
 0x2f0   : > { %997 = vrot.lane.b32.xlu1 %v969_v33, %s1892_s22  ;;  %v1103_v40 = vsel %vm389_vm12, %v969_v33, 0  ;;  %v1177_v41 = vsel %vm473_vm14, %v969_v33, 0  ;;  %v1319_v22 = vsel %vm626_vm3, %v969_v33, 0  ;;  %v1393_v39 = vsel %vm710_vm6, %v969_v33, 0 }
 0x2f1   : > { %vm2347_vm12 = vcmp.ne.s16.totalorder %v2116_v0, 0  ;;  %vm2349_vm14 = vcmask 1039360   ;;  %vm2352_vm3 = vcmp.ne.s16.totalorder %v1961_v19, 0 }
 0x2f5   : > { %v976_v34 = vld [vmem:[#allocation2] sm:$0xff] }
 0x2f6   : > { %v983_v35 = vld [vmem:[#allocation2 + $0x10] sm:$0xff]  ;;  %995 = vrot.lane.b32.xlu1 %v976_v34, %s1892_s22  ;;  %v1102_v42 = vsel %vm388_vm13, %v976_v34, 0  ;;  %v1176_v26 = vsel %vm472_vm15, %v976_v34, 0  ;;  %v1318_v31 = vsel %vm2344_vm7, %v976_v34, 0  ;;  %v1392_v38 = vsel %vm709_vm1, %v976_v34, 0  ;;  %vm2350_vm15 = vmmov %vm2349_vm14 }
 0x2f7   : > { %999 = vrot.lane.b32.xlu0 %v983_v35, %s1892_s22  ;;  %v1104_v37 = vsel %vm390_vm10, %v983_v35, 0  ;;  %v1178_v28 = vsel %vm474_vm2, %v983_v35, 0  ;;  %v1320_v29 = vsel %vm2345_vm8, %v983_v35, 0  ;;  %vm2346_vm10 = vcmp.ne.s16.totalorder %v2062_v48, 0 }
 0x2f8   : > { %v1394_v32 = vsel %vm2346_vm10, %v983_v35, 0  ;;  %v1536_v36 = vsel %vm864_vm5, %v983_v35, 0  ;;  %v1535_v48 = vsel %vm2347_vm12, %v969_v33, 0  ;;  %vm2348_vm13 = vcmp.ne.s16.totalorder %v2101_v61, 0  ;;  %v1870_v61 = vld [vmem:[%s2329_s1 + $0x50] sm:$0xff]  }
 0x2f9   : > { %v1534_v53 = vsel %vm2348_vm13, %v976_v34, 0  ;;  %vm2351_vm2 = vcmp.ne.s16.totalorder %v1964_v20, 0  ;;  %v978_v50 = vsel %vm2352_vm3, %v976_v34, 0  ;;  %vm2353_vm5 = vcmask 1031168  }
 0x2fa   : > { %1120 = vrot.lane.b32.xlu1 %v1104_v37, %s1894_s24  ;;  %vm2354_vm6 = vmmov %vm2353_vm5  ;;  %vm2355_vm1 = vcmask 916480   ;;  %vm2357_vm8 = vcmask 908288   ;;  %vm2359_vm12 = vcmask 900096  }
 0x2fb   : > { %1118 = vrot.lane.b32.xlu0 %v1103_v40, %s1894_s24  ;;  %vm2356_vm7 = vmmov %vm2355_vm1 }
 0x2fc   : > { %vm2358_vm10 = vmmov %vm2357_vm8 }
 0x2fd   : > { %vm2360_vm13 = vmmov %vm2359_vm12 }
 0x2fe   : > { %1192 = vrot.lane.b32.xlu1 %v1177_v41, %s1896_s26 }
 0x2ff   : > { %1116 = vrot.lane.b32.xlu0 %v1102_v42, %s1894_s24 }
 0x302   : > { %1190 = vrot.lane.b32.xlu1 %v1176_v26, %s1896_s26  ;;  %v1877_v26 = vld [vmem:[%s2329_s1 + $0x80] sm:$0xff]  }
 0x303   : > { %1194 = vrot.lane.b32.xlu0 %v1178_v28, %s1896_s26 }
 0x306   : > { %1262 = vrot.lane.b32.xlu1 %v983_v35, %s1897_s27 }
 0x307   : > { %1260 = vrot.lane.b32.xlu0 %v969_v33, %s1897_s27 }
 0x30a   : > { %1334 = vrot.lane.b32.xlu1 %v1319_v22, %s1898_s28 }
 0x30b   : > { %1258 = vrot.lane.b32.xlu0 %v976_v34, %s1897_s27 }
 0x30e   : > { %1332 = vrot.lane.b32.xlu1 %v1318_v31, %s1898_s28  ;;  %v1878_v31 = vld [vmem:[%s2329_s1 + $0x88] sm:$0xff]  }
 0x30f   : > { %1336 = vrot.lane.b32.xlu0 %v1320_v29, %s1898_s28 }
 0x312   : > { %1410 = vrot.lane.b32.xlu1 %v1394_v32, %s1899_s4 }
 0x313   : > { %1408 = vrot.lane.b32.xlu0 %v1393_v39, %s1899_s4 }
 0x316   : > { %1476 = vrot.lane.b32.xlu1 %v969_v33, %s1900_s5 }
 0x317   : > { %1406 = vrot.lane.b32.xlu0 %v1392_v38, %s1899_s4 }
 0x31a   : > { %1474 = vrot.lane.b32.xlu1 %v976_v34, %s1900_s5 }
 0x31b   : > { %1478 = vrot.lane.b32.xlu0 %v983_v35, %s1900_s5  ;;  %v1876_v35 = vld [vmem:[%s2329_s1 + $0x78] sm:$0xff]  }
 0x31e   : > { %1552 = vrot.lane.b32.xlu1 %v1536_v36, %s1901_s8 }
 0x31f   : > { %1550 = vrot.lane.b32.xlu0 %v1535_v48, %s1901_s8 }
 0x322   : > { %1610 = vperm.xlu1 %1860, %v1729_v52  }
 0x323   : > { %1548 = vrot.lane.b32.xlu0 %v1534_v53, %s1901_s8 }
 0x327   : > { %1615 = vperm.xlu0 %1859, %v1730_v63  }
 0x362   : > { %v998_v0 = vpop.permute.xlu1 %997 }
 0x368   : > { %v996_v43 = vpop.permute.xlu1 %995 }
 0x369   : > { %v1000_v44 = vpop.permute.xlu0 %999  ;;  %v1001_v46 = vsel %vm2350_vm15, %v996_v43, %v998_v0 }
 0x36a   : > { %v1002_v45 = vsel %vm2349_vm14, %v998_v0, %v1000_v44 }
 0x36b   : > { %1008 = vmatprep.subr.bf16.mxu1 %v1002_v45 }
 0x36c   : > { %1009 = vmatpush1.bf16.msra.mxu1 %v1001_v46  ;;  %v1121_v49 = vpop.permute.xlu1 %1120 }
 0x36d   : > { %v1119_v47 = vpop.permute.xlu0 %1118  ;;  %1738 = vmatprep.subr.msk.bf16.mxu1 %vm2351_vm2, %v969_v33 }
 0x36e   : > { %v1123_v51 = vsel %vm2353_vm5, %v1119_v47, %v1121_v49 }
 0x36f   : > { %1736 = vmatmul.mubr.msk.bf16.vlgmr.msra.gmra.mrb[0].mxu1 %vm274_vm11, %v1870_v61 }
 0x370   : > { %1060 = vmatpush1.bf16.msra.mxu1 %v978_v50  ;;  %1091 = vmatprep.mubr.bf16.mxu1 %v1887_v1  ;;  %v1193_v20 = vpop.permute.xlu1 %1192 }
 0x371   : > { %1129 = vmatprep.subr.bf16.mxu1 %v1123_v51  ;;  %v1117_v54 = vpop.permute.xlu0 %1116 }
 0x372   : > { %v1122_v57 = vsel %vm2354_vm6, %v1117_v54, %v1119_v47 }
 0x374   : > { %v1191_v58 = vpop.permute.xlu1 %1190 }
 0x375   : > { %v1195_v56 = vpop.permute.xlu0 %1194  ;;  %v1196_v2 = vsel %vm2356_vm7, %v1191_v58, %v1193_v20 }
 0x376   : > { %v1197_v19 = vsel %vm2355_vm1, %v1193_v20, %v1195_v56 }
 0x378   : > { %v1263_v62 = vpop.permute.xlu1 %1262 }
 0x379   : > { %v1261_v60 = vpop.permute.xlu0 %1260 }
 0x37a   : > { %v1265_v3 = vsel %vm2357_vm8, %v1261_v60, %v1263_v62 }
 0x37b   : > { %1739 = vmatmul.mubr.msk.bf16.vlgmr.msra.gmra.mrb[0].mxu1 %vm274_vm11, %v1871_v55 }
 0x37c   : > { %1130 = vmatpush1.bf16.msra.mxu1 %v1122_v57  ;;  %1161 = vmatprep.mubr.bf16.mxu1 %v1887_v1  ;;  %v1335_v9 = vpop.permute.xlu1 %1334 }
 0x37d   : > { %1203 = vmatprep.subr.bf16.mxu1 %v1197_v19  ;;  %v1259_v4 = vpop.permute.xlu0 %1258 }
 0x37e   : > { %v1264_v11 = vsel %vm2358_vm10, %v1259_v4, %v1261_v60 }
 0x380   : > { %v1333_v14 = vpop.permute.xlu1 %1332 }
 0x381   : > { %v1337_v8 = vpop.permute.xlu0 %1336  ;;  %v1338_v18 = vsel %vm2360_vm13, %v1333_v14, %v1335_v9 }
 0x382   : > { %v1339_v13 = vsel %vm2359_vm12, %v1335_v9, %v1337_v8 }
 0x384   : > { %v1411_v17 = vpop.permute.xlu1 %1410 }
 0x385   : > { %v1409_v16 = vpop.permute.xlu0 %1408 }
 0x386   : > { %v1413_v21 = vsel %vm732_vm9, %v1409_v16, %v1411_v17 }
 0x387   : > { %1743 = vmatmul.mubr.msk.bf16.vlgmr.msra.gmra.mrb[0].mxu1 %vm274_vm11, %v1872_v59 }
 0x388   : > { %1204 = vmatpush1.bf16.msra.mxu1 %v1196_v2  ;;  %1235 = vmatprep.mubr.bf16.mxu1 %v1887_v1  ;;  %v1477_v27 = vpop.permute.xlu1 %1476 }
 0x389   : > { %1271 = vmatprep.subr.bf16.mxu1 %v1265_v3  ;;  %v1407_v23 = vpop.permute.xlu0 %1406 }
 0x38a   : > { %v1412_v30 = vsel %vm732_vm9, %v1407_v23, %v1409_v16 }
 0x38c   : > { %v1475_v34 = vpop.permute.xlu1 %1474 }
 0x38d   : > { %v1479_v25 = vpop.permute.xlu0 %1478  ;;  %v1480_v41 = vsel %vm801_vm0, %v1475_v34, %v1477_v27 }
 0x38e   : > { %v1481_v33 = vsel %vm801_vm0, %v1477_v27, %v1479_v25 }
 0x390   : > { %v1553_v40 = vpop.permute.xlu1 %1552 }
 0x391   : > { %v1551_v37 = vpop.permute.xlu0 %1550 }
 0x392   : > { %v1555_v42 = vsel %vm885_vm4, %v1551_v37, %v1553_v40 }
 0x393   : > { %1747 = vmatmul.mubr.msk.bf16.vlgmr.msra.gmra.mrb[0].mxu1 %vm274_vm11, %v1873_v5 }
 0x394   : > { %1272 = vmatpush1.bf16.msra.mxu1 %v1264_v11  ;;  %1303 = vmatprep.mubr.bf16.mxu1 %v1887_v1 }
 0x395   : > { %1345 = vmatprep.subr.bf16.mxu1 %v1339_v13  ;;  %v1549_v28 = vpop.permute.xlu0 %1548 }
 0x396   : > { %v1554_v22 = vsel %vm885_vm4, %v1549_v28, %v1551_v37 }
 0x39f   : > { %1751 = vmatmul.mubr.msk.bf16.vlgmr.msra.gmra.mrb[0].mxu1 %vm274_vm11, %v1874_v15 }
 0x3a0   : > { %1346 = vmatpush1.bf16.msra.mxu1 %v1338_v18  ;;  %1377 = vmatprep.mubr.bf16.mxu1 %v1887_v1 }
 0x3a1   : > { %1419 = vmatprep.subr.bf16.mxu1 %v1413_v21  ;;  %v1611_v29 = vpop.permute.xlu1 %1610 }
 0x3a6   : > { %v1616_v36 = vpop.permute.xlu0 %1615 }
 0x3ab   : > { %1755 = vmatmul.mubr.msk.bf16.vlgmr.msra.gmra.mrb[0].mxu1 %vm274_vm11, %v1875_v24 }
 0x3ac   : > { %1420 = vmatpush1.bf16.msra.mxu1 %v1412_v30  ;;  %1451 = vmatprep.mubr.bf16.mxu1 %v1887_v1 }
 0x3ad   : > { %1487 = vmatprep.subr.bf16.mxu1 %v1481_v33 }
 0x3b7   : > { %1759 = vmatmul.mubr.msk.bf16.vlgmr.msra.gmra.mrb[0].mxu1 %vm274_vm11, %v1876_v35 }
 0x3b8   : > { %1488 = vmatpush1.bf16.msra.mxu1 %v1480_v41  ;;  %1519 = vmatprep.mubr.bf16.mxu1 %v1887_v1 }
 0x3b9   : > { %1561 = vmatprep.subr.bf16.mxu1 %v1555_v42 }
 0x3c3   : > { %1763 = vmatmul.mubr.msk.bf16.vlgmr.msra.gmra.mrb[0].mxu1 %vm274_vm11, %v1877_v26 }
 0x3c4   : > { %1562 = vmatpush1.bf16.msra.mxu1 %v1554_v22  ;;  %1593 = vmatprep.mubr.bf16.mxu1 %v1887_v1 }
 0x3cf   : > { %1767 = vmatmul.mubr.msk.bf16.vlgmr.msra.gmra.mrb[0].mxu1 %vm274_vm11, %v1878_v31 }
 0x4a2   : > { %v1595_v32 = vpop.f32.mrb[0].mxu1 }
 0x4a3   : > { %v1618_v39 = vadd.f32 %v1611_v29, %v1595_v32  ;;  %v1597_v38 = vpop.f32.mrb[1].mxu1 }
 0x4a4   : > { %v1619_v48 = vadd.f32 %v1611_v29, %v1597_v38  ;;  %v1599_v52 = vpop.f32.mrb[2].mxu1 }
 0x4a5   : > { %v1622_v1 = vadd.f32 %v1618_v39, %v1945_v6  ;;  %v1620_v53 = vadd.f32 %v1616_v36, %v1599_v52  ;;  %v1601_v63 = vpop.f32.mrb[3].mxu1 }
 0x4a6   : > { %v1623_v0 = vadd.f32 %v1619_v48, %v1949_v10  ;;  %v1621_v43 = vadd.f32 %v1616_v36, %v1601_v63 }
 0x4a7   : > { %1626 = vst [vmem:[%s170_s18] sm:$0xff] %v1622_v1  ;;  %v1624_v44 = vadd.f32 %v1620_v53, %v1947_v7 }
 0x4a8   : > { %1627 = vst [vmem:[%s170_s18 + $0x8] sm:$0xff] %v1623_v0  ;;  %v1625_v45 = vadd.f32 %v1621_v43, %v1953_v12 }
 0x4a9   : > { %1628 = vst [vmem:[%s170_s18 + $0x10] sm:$0xff] %v1624_v44 }
 0x4aa   : > { %1629 = vst [vmem:[%s170_s18 + $0x18] sm:$0xff] %v1625_v45 }
 0x4ab PF: > { %s13_s12 = sadd.s32 1, %s1885_s12  }
 0x4ac   : > { %p10_p4 = scmp.ge.s32.totalorder %s13_s12, 4  }
 0x4ae   :  { %12 = sbr.rel (!%p10_p4) target bundleno = 1 (0x1), region = 80 }

</bundles_post_ra>
